<compile_context>
chip_gen: v7x
topology: tpu7x:2x2x1
jax: 0.10.0
libtpu: 0.0.40
codegen_flags: <defaults>
</compile_context>

<pallas_src>
import functools
import math

import jax
import jax.numpy as jnp
from jax.experimental import pallas as pl
from jax.experimental.pallas import tpu as pltpu

LEAKY_SLOPE = 0.01                    # F.leaky_relu default negative_slope
BN_EPS = 1e-5                         # nn.BatchNorm1d default eps
LANE = 128                            # TPU lane width: keep feature dims lane-dense
VMEM_LIMIT_BYTES = 48 * 1024 * 1024   # explicit scoped-VMEM cap, safe on v5e/v6e/v7x
X_RESIDENT_BYTES = 8 * 1024 * 1024    # keep x fully VMEM-resident below this size


# ---------------------------------------------------------------------------
# small helpers
# ---------------------------------------------------------------------------
def _round_up(v, m):
    return ((v + m - 1) // m) * m


def _choose_tiles(n, tm_target, tk_target):
    """Row tile tm, adj-column tile tk, padded node count Np.
    Both tiles are multiples of 128 (lane width; also covers int8/bf16 sublane packing)
    and nest (larger is a multiple of the smaller) so one zero-padded Np divides both.
    Zero padding keeps BN stats exact: padded adj rows/cols and x rows are zero."""
    n128 = _round_up(n, LANE)
    tm = max(LANE, min(tm_target, n128) // LANE * LANE)
    tk = max(LANE, min(tk_target, n128) // LANE * LANE)
    if tk >= tm:
        tk = tk // tm * tm
    else:
        tm = tm // tk * tk
    np_ = _round_up(n, max(tm, tk))
    return np_, tm, tk


def _pad2(a, rows, cols):
    return jnp.pad(a, ((0, rows - a.shape[0]), (0, cols - a.shape[1])))


def _pad_cols(a, cols):
    return jnp.pad(a, ((0, 0), (0, cols - a.shape[1])))


def prepare_adj(adj):
    """One-time conversion of a dense 0/1 adjacency to int8 (exact, half the HBM bytes of
    bf16, a quarter of f32).  Call this OUTSIDE the per-step forward so the cast's HBM
    round-trip is paid once, not once per call.  Weighted adjacencies: pass bf16 instead."""
    return adj.astype(jnp.int8)


# ---------------------------------------------------------------------------
# kernels
# ---------------------------------------------------------------------------
def _agg_stats_kernel(apply_w, x_resident, tm, tk, adj_ref, *refs):
    """acc += adj_tile @ x_tile over K; at last K: +x (folded self-loop of adj + I),
    optional @W, and per-row-tile partial BatchNorm statistics."""
    refs = list(refs)
    if x_resident:
        x_ref = refs.pop(0)          # full (Np, dmid) block, VMEM-resident across the grid
    else:
        xk_ref = refs.pop(0)         # (tk, dmid) rows matching this adj column panel
        xi_ref = refs.pop(0)         # (tm, dmid) rows of this row tile (self-loop)
    w_ref = refs.pop(0) if apply_w else None
    h_ref, stats_ref, acc_ref = refs

    i = pl.program_id(0)
    k = pl.program_id(1)

    @pl.when(k == 0)
    def _init():
        acc_ref[...] = jnp.zeros_like(acc_ref)

    if x_resident:
        xk = x_ref[pl.ds(pl.multiple_of(k * tk, tk), tk), :]
    else:
        xk = xk_ref[...]
    # adj streams in its storage dtype (int8 for 0/1 graphs) and is cast to the compute
    # dtype right before the MXU: the aggregation is HBM-bound, so bytes >> cast cost.
    acc_ref[...] += jnp.dot(adj_ref[...].astype(xk.dtype), xk,
                            preferred_element_type=jnp.float32)

    @pl.when(k == pl.num_programs(1) - 1)
    def _finalize():
        if x_resident:
            xi = x_ref[pl.ds(pl.multiple_of(i * tm, tm), tm), :]
        else:
            xi = xi_ref[...]
        agg = acc_ref[...] + xi.astype(jnp.float32)     # (adj + I) @ x self-loop term
        if apply_w:
            h = jnp.dot(agg.astype(w_ref.dtype), w_ref[...],
                        preferred_element_type=jnp.float32)
        else:
            h = agg
        h_ref[...] = h.astype(h_ref.dtype)              # bf16 roundtrip on the fast path
        ssum = jnp.sum(h, axis=0, keepdims=True)        # (1, Dp)
        ssq = jnp.sum(h * h, axis=0, keepdims=True)     # (1, Dp)
        stats_ref[...] = jnp.concatenate([ssum, ssq], axis=0)[None, :, :]


def _bn_act_res_kernel(has_proj, needs_mask, n_true, tm,
                       h_ref, ss_ref, x_ref, *rest):
    """y = leaky_relu(h * scale + shift) + residual(x) for one row tile.
    scale/shift is the pre-folded BatchNorm affine (computed once per layer)."""
    if has_proj:
        wr_ref, br_ref, o_ref = rest
    else:
        (o_ref,) = rest

    ss = ss_ref[...]                                    # (2, Dp) f32: [scale; shift]
    h = h_ref[...].astype(jnp.float32) * ss[0:1, :] + ss[1:2, :]
    h = jnp.where(h >= 0.0, h, LEAKY_SLOPE * h)         # leaky_relu
    # TODO(synk): non-zero dropout would need pltpu.prng_seed/prng_random_bits here.

    if has_proj:
        res = jnp.dot(x_ref[...], wr_ref[...],
                      preferred_element_type=jnp.float32) + br_ref[...]
    else:
        res = x_ref[...].astype(jnp.float32)            # identity residual: plain add

    out = h + res
    if needs_mask:
        # Zero the zero-padded rows so the next layer's self-loop and BN stats stay exact.
        row = pl.program_id(0) * tm + jax.lax.broadcasted_iota(jnp.int32, out.shape, 0)
        out = jnp.where(row < n_true, out, 0.0)
    o_ref[...] = out.astype(o_ref.dtype)


def _linear_kernel(x_ref, w_ref, o_ref):
    o_ref[...] = jnp.dot(x_ref[...], w_ref[...],
                         preferred_element_type=jnp.float32).astype(o_ref.dtype)


# ---------------------------------------------------------------------------
# pallas_call wrappers
# ---------------------------------------------------------------------------
def _linear(x, w, *, tm, out_dtype):
    np_, din_p = x.shape
    dout_p = w.shape[1]
    return pl.pallas_call(
        _linear_kernel,
        out_shape=jax.ShapeDtypeStruct((np_, dout_p), out_dtype),
        grid=(np_ // tm,),
        in_specs=[pl.BlockSpec((tm, din_p), lambda i: (i, 0)),
                  pl.BlockSpec((din_p, dout_p), lambda i: (0, 0))],
        out_specs=pl.BlockSpec((tm, dout_p), lambda i: (i, 0)),
        compiler_params=pltpu.CompilerParams(
            dimension_semantics=("parallel",),
            vmem_limit_bytes=VMEM_LIMIT_BYTES),
    )(x, w)


def _aggregate(adj_p, xin, w, *, tm, tk, apply_w, x_resident):
    np_ = adj_p.shape[0]
    dmid = xin.shape[1]
    dout_p = w.shape[1] if apply_w else dmid
    r, kk = np_ // tm, np_ // tk

    in_specs = [pl.BlockSpec((tm, tk), lambda i, k: (i, k))]       # adj panel stream
    inputs = [adj_p]
    if x_resident:
        # Full x block with constant index: DMA'd once, stays VMEM-resident for all tiles.
        in_specs.append(pl.BlockSpec((np_, dmid), lambda i, k: (0, 0)))
        inputs.append(xin)
    else:
        in_specs.append(pl.BlockSpec((tk, dmid), lambda i, k: (k, 0)))   # x k-panel
        in_specs.append(pl.BlockSpec((tm, dmid), lambda i, k: (i, 0)))   # self-loop rows
        inputs += [xin, xin]
    if apply_w:
        in_specs.append(pl.BlockSpec((dmid, dout_p), lambda i, k: (0, 0)))
        inputs.append(w)

    return pl.pallas_call(
        functools.partial(_agg_stats_kernel, apply_w, x_resident, tm, tk),
        out_shape=(jax.ShapeDtypeStruct((np_, dout_p), xin.dtype),      # h in compute dtype
                   jax.ShapeDtypeStruct((r, 2, dout_p), jnp.float32)),  # partial BN stats
        grid=(r, kk),
        in_specs=in_specs,
        out_specs=(pl.BlockSpec((tm, dout_p), lambda i, k: (i, 0)),
                   pl.BlockSpec((1, 2, dout_p), lambda i, k: (i, 0, 0))),
        scratch_shapes=[pltpu.VMEM((tm, dmid), jnp.float32)],
        compiler_params=pltpu.CompilerParams(
            dimension_semantics=("parallel", "arbitrary"),
            vmem_limit_bytes=VMEM_LIMIT_BYTES),
    )(*inputs)


def _bn_fold(stats, gamma_p, beta_p, n_true):
    """Tiny (r, 2, Dp) -> (2, Dp) finalize of BatchNorm batch stats, once per layer."""
    inv_n = 1.0 / n_true
    ssum = jnp.sum(stats[:, 0, :], axis=0)
    ssq = jnp.sum(stats[:, 1, :], axis=0)
    mean = ssum * inv_n
    var = jnp.maximum(ssq * inv_n - mean * mean, 0.0)   # clamp cancellation-induced <0
    inv = jax.lax.rsqrt(var + BN_EPS)
    scale = gamma_p * inv
    shift = beta_p - mean * scale
    return jnp.stack([scale, shift], axis=0)            # (2, Dp) f32


def _bn_act_residual(h, scale_shift, x, wr, br, *, tm, out_dtype, n_true):
    np_, dout_p = h.shape
    din_p = x.shape[1]
    has_proj = wr is not None
    needs_mask = np_ > n_true

    in_specs = [
        pl.BlockSpec((tm, dout_p), lambda i: (i, 0)),        # pre-BN activations
        pl.BlockSpec((2, dout_p), lambda i: (0, 0)),         # folded BN scale/shift
        pl.BlockSpec((tm, din_p), lambda i: (i, 0)),         # layer input rows (residual)
    ]
    inputs = [h, scale_shift, x]
    if has_proj:
        in_specs += [pl.BlockSpec((din_p, dout_p), lambda i: (0, 0)),
                     pl.BlockSpec((1, dout_p), lambda i: (0, 0))]
        inputs += [wr, br]

    return pl.pallas_call(
        functools.partial(_bn_act_res_kernel, has_proj, needs_mask, n_true, tm),
        out_shape=jax.ShapeDtypeStruct((np_, dout_p), out_dtype),
        grid=(np_ // tm,),
        in_specs=in_specs,
        out_specs=pl.BlockSpec((tm, dout_p), lambda i: (i, 0)),
        compiler_params=pltpu.CompilerParams(
            dimension_semantics=("parallel",),
            vmem_limit_bytes=VMEM_LIMIT_BYTES),
    )(*inputs)


# ---------------------------------------------------------------------------
# forward / reference / init
# ---------------------------------------------------------------------------
def resgcn_forward(x, adj, params, *, matmul_dtype=jnp.bfloat16, tm=512, tk=1024,
                   x_resident_bytes=X_RESIDENT_BYTES):
    """ResGCN forward.  `adj` should be pre-converted (prepare_adj -> int8 for 0/1 graphs,
    bf16 for weighted) so no per-call dtype cast touches HBM; only zero-padding happens
    here and only when N is not tile-aligned.  tm = node row tile, tk = adj-column tile."""
    n = x.shape[0]
    cd = matmul_dtype
    np_, tm, tk = _choose_tiles(n, tm, tk)

    adj_p = adj if np_ == n else jnp.pad(adj, ((0, np_ - n), (0, np_ - n)))

    din0_p = _round_up(x.shape[1], LANE)                         # lane-dense features
    xp = jnp.pad(x, ((0, np_ - n), (0, din0_p - x.shape[1]))).astype(cd)

    num_layers = len(params)
    for li, (w, gamma, beta, wr, br) in enumerate(params):
        din, dout = w.shape
        din_p, dout_p = _round_up(din, LANE), _round_up(dout, LANE)

        wp = _pad2(w, din_p, dout_p).astype(cd)
        gp = jnp.pad(gamma.astype(jnp.float32), (0, dout_p - dout))
        bp = jnp.pad(beta.astype(jnp.float32), (0, dout_p - dout))
        if wr is not None:
            wrp = _pad2(wr, din_p, dout_p).astype(cd)
            brp = _pad_cols(br.reshape(1, -1).astype(jnp.float32), dout_p)
        else:
            wrp, brp = None, None

        # Matmul association: apply W before the N^2 aggregation when it shrinks features.
        proj_first = din_p > dout_p
        dmid = dout_p if proj_first else din_p
        x_resident = np_ * dmid * jnp.dtype(cd).itemsize <= x_resident_bytes

        if proj_first:
            xw = _linear(xp, wp, tm=tm, out_dtype=cd)
            h, stats = _aggregate(adj_p, xw, None, tm=tm, tk=tk,
                                  apply_w=False, x_resident=x_resident)
        else:
            h, stats = _aggregate(adj_p, xp, wp, tm=tm, tk=tk,
                                  apply_w=True, x_resident=x_resident)

        scale_shift = _bn_fold(stats, gp, bp, n)        # tiny per-layer finalize (f32)

        out_dtype = jnp.float32 if li == num_layers - 1 else cd
        xp = _bn_act_residual(h, scale_shift, xp, wrp, brp, tm=tm,
                              out_dtype=out_dtype, n_true=n)

    return xp[:n, :params[-1][0].shape[1]].astype(jnp.float32)


def resgcn_reference(x, adj, params, *, matmul_dtype=jnp.float32):
    """Pure-JAX reference (mirrors the kernel's cast points and matmul association)."""
    f32 = jnp.float32
    cd = matmul_dtype
    adj_c = adj.astype(cd)
    xr = x
    for li, (w, gamma, beta, wr, br) in enumerate(params):
        din, dout = w.shape
        din_p, dout_p = _round_up(din, LANE), _round_up(dout, LANE)
        xb = xr.astype(cd)
        wc = w.astype(cd)
        if din_p > dout_p:
            xw = jnp.dot(xb, wc, preferred_element_type=f32).astype(cd)
            h = jnp.dot(adj_c, xw, preferred_element_type=f32) + xw.astype(f32)
        else:
            agg = jnp.dot(adj_c, xb, preferred_element_type=f32) + xb.astype(f32)
            h = jnp.dot(agg.astype(cd), wc, preferred_element_type=f32)
        # (GCN bias omitted: zero-init + training-mode BN mean subtraction cancels it.)
        mean = jnp.mean(h, axis=0, keepdims=True)
        var = jnp.maximum(jnp.mean(h * h, axis=0, keepdims=True) - mean * mean, 0.0)
        hn = (h - mean) * jax.lax.rsqrt(var + BN_EPS)
        hn = hn * gamma.reshape(1, -1) + beta.reshape(1, -1)
        hn = jnp.where(hn >= 0.0, hn, LEAKY_SLOPE * hn)
        if wr is not None:
            res = jnp.dot(xb, wr.astype(cd), preferred_element_type=f32) + br.reshape(1, -1)
        else:
            res = xb.astype(f32)
        out = hn + res
        xr = out if li == len(params) - 1 else out.astype(cd)
    return xr.astype(f32)


def init_resgcn_params(key, in_features, hidden_dims):
    """Synthetic parameters matching the PyTorch module's shapes/init style.
    Returns [(w, gamma, beta, wr_or_None, br_or_None), ...].  The GCNLayer bias is omitted
    (zero-init + training-mode BatchNorm mean subtraction cancels it exactly)."""
    dims = [in_features] + list(hidden_dims)
    params = []
    for i in range(len(dims) - 1):
        din, dout = dims[i], dims[i + 1]
        key, kw, kg, kb, kwr, kbr = jax.random.split(key, 6)
        bound_w = math.sqrt(6.0 / din)                    # kaiming-uniform-ish
        w = jax.random.uniform(kw, (din, dout), jnp.float32, -bound_w, bound_w)
        gamma = 1.0 + 0.1 * jax.random.normal(kg, (dout,), jnp.float32)
        beta = 0.1 * jax.random.normal(kb, (dout,), jnp.float32)
        if din != dout:
            bound_r = 1.0 / math.sqrt(din)
            wr = jax.random.uniform(kwr, (din, dout), jnp.float32, -bound_r, bound_r)
            br = jax.random.uniform(kbr, (dout,), jnp.float32, -bound_r, bound_r)
        else:
            wr, br = None, None                           # identity residual
        params.append((w, gamma, beta, wr, br))
    return params


if __name__ == "__main__":
    def make_case(seed, n, in_features, hidden_dims):
        k_x, k_adj, k_p = jax.random.split(jax.random.PRNGKey(seed), 3)
        x = jax.random.normal(k_x, (n, in_features), jnp.float32)
        a = (jax.random.uniform(k_adj, (n, n)) < 0.1).astype(jnp.float32)
        adj = jnp.maximum(a, a.T)        # symmetric 0/1 adjacency (dense form of sparse adj)
        return x, adj, init_resgcn_params(k_p, in_features, hidden_dims)

    fwd = jax.jit(resgcn_forward,
                  static_argnames=("matmul_dtype", "tm", "tk", "x_resident_bytes"))

    # Case 1: tile-aligned N; layer widths exercise (a) a Linear residual, (b) an identity
    # residual, (c) the proj-first ordering.
    N, IN_F, HID = 256, 48, [160, 160, 64]
    x, adj, params = make_case(0, N, IN_F, HID)
    adj_i8 = prepare_adj(adj)            # one-time int8 conversion OUTSIDE the forward
    ref = resgcn_reference(x, adj, params, matmul_dtype=jnp.float32)

    # 1a) exact-semantics check (f32 matmuls), multi-tile grid, x VMEM-resident path.
    out = jax.block_until_ready(
        fwd(x, adj_i8, params, matmul_dtype=jnp.float32, tm=128, tk=128))
    assert out.shape == (N, HID[-1])
    assert bool(jnp.allclose(out, ref, atol=1e-3, rtol=1e-3)), \
        "f32 Pallas output mismatch vs reference (resident-x path)"

    # 1b) exact-semantics check with the streamed-x (large-graph) kernel variant.
    out_s = jax.block_until_ready(
        fwd(x, adj_i8, params, matmul_dtype=jnp.float32, tm=128, tk=128,
            x_resident_bytes=0))
    assert bool(jnp.allclose(out_s, ref, atol=1e-3, rtol=1e-3)), \
        "f32 Pallas output mismatch vs reference (streamed-x path)"

    # 1c) fast path: bf16 MXU operands + bf16 h roundtrip (int8 adj of 0/1 is exact).
    out_bf = jax.block_until_ready(fwd(x, adj_i8, params, matmul_dtype=jnp.bfloat16))
    rel = jnp.linalg.norm(out_bf - ref) / jnp.linalg.norm(ref)
    assert bool(rel < 5e-2), f"bf16 path deviates too much from f32 reference: {rel}"

    # Case 2: non-tile-aligned N -> zero-padded rows + in-kernel row masking.
    N2 = 200
    x2, adj2, params2 = make_case(1, N2, 40, [96, 96])
    ref2 = resgcn_reference(x2, adj2, params2, matmul_dtype=jnp.float32)
    out2 = jax.block_until_ready(
        fwd(x2, prepare_adj(adj2), params2, matmul_dtype=jnp.float32, tm=128, tk=128))
    assert out2.shape == (N2, 96)
    assert bool(jnp.allclose(out2, ref2, atol=1e-3, rtol=1e-3)), \
        "f32 Pallas output mismatch vs reference (padded-N path)"

    print("KERNEL_OK")
</pallas_src>

<mosaic_0001>
module attributes {stable_mosaic.version = 11 : i64} {
  func.func @_agg_stats_kernel(%arg0: i32, %arg1: i32, %arg2: memref<128x128xi8, #tpu.memory_space<vmem>>, %arg3: memref<256x128xf32, #tpu.memory_space<vmem>>, %arg4: memref<128x256xf32, #tpu.memory_space<vmem>>, %arg5: memref<128x256xf32, #tpu.memory_space<vmem>>, %arg6: memref<1x2x256xf32, #tpu.memory_space<vmem>>, %arg7: memref<128x128xf32, #tpu.memory_space<vmem>>) attributes {dimension_semantics = [#tpu.dimension_semantics<parallel>, #tpu.dimension_semantics<arbitrary>], iteration_bounds = array<i64: 2, 2>, scalar_prefetch = 0 : i64, scratch_operands = 1 : i64, tpu.core_type = #tpu.core_type<tc>, window_params = [{transform_indices = @transform_0, window_bounds = array<i64: 128, 128>}, {pipeline_mode = #tpu.pipeline_mode<synchronous>, transform_indices = @transform_1, window_bounds = array<i64: 256, 128>}, {pipeline_mode = #tpu.pipeline_mode<synchronous>, transform_indices = @transform_2, window_bounds = array<i64: 128, 256>}, {transform_indices = @transform_3, window_bounds = array<i64: 128, 256>}, {transform_indices = @transform_4, window_bounds = array<i64: 1, 2, 256>}]} {
    %c0_i32 = arith.constant 0 : i32
    %0 = arith.cmpi eq, %arg1, %c0_i32 : i32
    %1 = arith.extui %0 : i1 to i32
    %c0_i32_0 = arith.constant 0 : i32
    %2 = arith.cmpi ne, %1, %c0_i32_0 : i32
    scf.if %2 {
      %cst_8 = arith.constant 0.000000e+00 : f32
      %16 = vector.broadcast %cst_8 : f32 to vector<128x128xf32>
      %c0_9 = arith.constant 0 : index
      %c0_10 = arith.constant 0 : index
      %17 = vector.load %arg7[%c0_9, %c0_10] : memref<128x128xf32, #tpu.memory_space<vmem>>, vector<128x128xf32>
      tpu.vector_store %arg7[%c0_9, %c0_10], %16 {strides = array<i32>} : memref<128x128xf32, #tpu.memory_space<vmem>>, vector<128x128xf32>,
    } else {
    }
    %c128_i32 = arith.constant 128 : i32
    %3 = arith.muli %arg1, %c128_i32 : i32
    %4 = tpu.assume_multiple %3, 128 : i32
    %5 = arith.index_cast %4 : i32 to index
    %c0 = arith.constant 0 : index
    %6 = vector.load %arg3[%5, %c0] : memref<256x128xf32, #tpu.memory_space<vmem>>, vector<128x128xf32>
    %c0_1 = arith.constant 0 : index
    %c0_2 = arith.constant 0 : index
    %7 = vector.load %arg7[%c0_1, %c0_2] : memref<128x128xf32, #tpu.memory_space<vmem>>, vector<128x128xf32>
    %c0_3 = arith.constant 0 : index
    %c0_4 = arith.constant 0 : index
    %8 = vector.load %arg2[%c0_3, %c0_4] : memref<128x128xi8, #tpu.memory_space<vmem>>, vector<128x128xi8>
    %9 = arith.sitofp %8 : vector<128x128xi8> to vector<128x128xf32>
    %cst = arith.constant dense<0.000000e+00> : vector<128x128xf32>
    %10 = tpu.matmul %9, %6, %cst {dimension_numbers = #tpu.dot_dimension_numbers<[1], [0], [0], [1], [0, 0, 1, 1], [], []>} : vector<128x128xf32>, vector<128x128xf32>, vector<128x128xf32> -> vector<128x128xf32>
    %11 = arith.addf %7, %10 : vector<128x128xf32>
    %c0_5 = arith.constant 0 : index
    %c0_6 = arith.constant 0 : index
    %12 = vector.load %arg7[%c0_5, %c0_6] : memref<128x128xf32, #tpu.memory_space<vmem>>, vector<128x128xf32>
    tpu.vector_store %arg7[%c0_5, %c0_6], %11 {strides = array<i32>} : memref<128x128xf32, #tpu.memory_space<vmem>>, vector<128x128xf32>,
    %c1_i32 = arith.constant 1 : i32
    %13 = arith.cmpi eq, %arg1, %c1_i32 : i32
    %14 = arith.extui %13 : i1 to i32
    %c0_i32_7 = arith.constant 0 : i32
    %15 = arith.cmpi ne, %14, %c0_i32_7 : i32
    scf.if %15 {
      %c128_i32_8 = arith.constant 128 : i32
      %16 = arith.muli %arg0, %c128_i32_8 : i32
      %17 = tpu.assume_multiple %16, 128 : i32
      %18 = arith.index_cast %17 : i32 to index
      %c0_9 = arith.constant 0 : index
      %19 = vector.load %arg3[%18, %c0_9] : memref<256x128xf32, #tpu.memory_space<vmem>>, vector<128x128xf32>
      %c0_10 = arith.constant 0 : index
      %c0_11 = arith.constant 0 : index
      %20 = vector.load %arg7[%c0_10, %c0_11] : memref<128x128xf32, #tpu.memory_space<vmem>>, vector<128x128xf32>
      %21 = arith.addf %20, %19 : vector<128x128xf32>
      %c0_12 = arith.constant 0 : index
      %c0_13 = arith.constant 0 : index
      %22 = vector.load %arg4[%c0_12, %c0_13] : memref<128x256xf32, #tpu.memory_space<vmem>>, vector<128x256xf32>
      %cst_14 = arith.constant dense<0.000000e+00> : vector<128x256xf32>
      %23 = tpu.matmul %21, %22, %cst_14 {dimension_numbers = #tpu.dot_dimension_numbers<[1], [0], [0], [1], [0, 0, 1, 1], [], []>} : vector<128x128xf32>, vector<128x256xf32>, vector<128x256xf32> -> vector<128x256xf32>
      %c0_15 = arith.constant 0 : index
      %c0_16 = arith.constant 0 : index
      %24 = vector.load %arg5[%c0_15, %c0_16] : memref<128x256xf32, #tpu.memory_space<vmem>>, vector<128x256xf32>
      tpu.vector_store %arg5[%c0_15, %c0_16], %23 {strides = array<i32>} : memref<128x256xf32, #tpu.memory_space<vmem>>, vector<128x256xf32>,
      %cst_17 = arith.constant dense<0.000000e+00> : vector<256xf32>
      %25 = vector.multi_reduction <add>, %23, %cst_17 [0] : vector<128x256xf32> to vector<256xf32>
      %26 = vector.shape_cast %25 : vector<256xf32> to vector<1x256xf32>
      %27 = arith.mulf %23, %23 : vector<128x256xf32>
      %cst_18 = arith.constant dense<0.000000e+00> : vector<256xf32>
      %28 = vector.multi_reduction <add>, %27, %cst_18 [0] : vector<128x256xf32> to vector<256xf32>
      %29 = vector.shape_cast %28 : vector<256xf32> to vector<1x256xf32>
      %30 = tpu.concatenate %26, %29 in 0 : vector<1x256xf32>, vector<1x256xf32> -> vector<2x256xf32>
      %31 = vector.shape_cast %30 : vector<2x256xf32> to vector<1x2x256xf32>
      %c0_19 = arith.constant 0 : index
      %c0_20 = arith.constant 0 : index
      %c0_21 = arith.constant 0 : index
      %32 = vector.load %arg6[%c0_19, %c0_20, %c0_21] : memref<1x2x256xf32, #tpu.memory_space<vmem>>, vector<1x2x256xf32>
      tpu.vector_store %arg6[%c0_19, %c0_20, %c0_21], %31 {strides = array<i32>} : memref<1x2x256xf32, #tpu.memory_space<vmem>>, vector<1x2x256xf32>,
    } else {
    }
    return
  }
  func.func @transform_0(%arg0: i32, %arg1: i32) -> (i32, i32) {
    %c0_i32 = arith.constant 0 : i32
    return %arg0, %arg1 : i32, i32
  }
  func.func @transform_1(%arg0: i32, %arg1: i32) -> (i32, i32) {
    %c0_i32 = arith.constant 0 : i32
    %c0_i32_0 = arith.constant 0 : i32
    %c0_i32_1 = arith.constant 0 : i32
    return %c0_i32, %c0_i32_0 : i32, i32
  }
  func.func @transform_2(%arg0: i32, %arg1: i32) -> (i32, i32) {
    %c0_i32 = arith.constant 0 : i32
    %c0_i32_0 = arith.constant 0 : i32
    %c0_i32_1 = arith.constant 0 : i32
    return %c0_i32, %c0_i32_0 : i32, i32
  }
  func.func @transform_3(%arg0: i32, %arg1: i32) -> (i32, i32) {
    %c0_i32 = arith.constant 0 : i32
    %c0_i32_0 = arith.constant 0 : i32
    return %arg0, %c0_i32 : i32, i32
  }
  func.func @transform_4(%arg0: i32, %arg1: i32) -> (i32, i32, i32) {
    %c0_i32 = arith.constant 0 : i32
    %c0_i32_0 = arith.constant 0 : i32
    %c0_i32_1 = arith.constant 0 : i32
    return %arg0, %c0_i32, %c0_i32_0 : i32, i32, i32
  }
}

module attributes {stable_mosaic.version = 11 : i64} {
  func.func @_bn_act_res_kernel(%arg0: i32, %arg1: memref<128x256xf32, #tpu.memory_space<vmem>>, %arg2: memref<2x256xf32, #tpu.memory_space<vmem>>, %arg3: memref<128x128xf32, #tpu.memory_space<vmem>>, %arg4: memref<128x256xf32, #tpu.memory_space<vmem>>, %arg5: memref<1x256xf32, #tpu.memory_space<vmem>>, %arg6: memref<128x256xf32, #tpu.memory_space<vmem>>) attributes {dimension_semantics = [#tpu.dimension_semantics<parallel>], iteration_bounds = array<i64: 2>, scalar_prefetch = 0 : i64, scratch_operands = 0 : i64, tpu.core_type = #tpu.core_type<tc>, window_params = [{transform_indices = @transform_0, window_bounds = array<i64: 128, 256>}, {pipeline_mode = #tpu.pipeline_mode<synchronous>, transform_indices = @transform_1, window_bounds = array<i64: 2, 256>}, {transform_indices = @transform_2, window_bounds = array<i64: 128, 128>}, {pipeline_mode = #tpu.pipeline_mode<synchronous>, transform_indices = @transform_3, window_bounds = array<i64: 128, 256>}, {pipeline_mode = #tpu.pipeline_mode<synchronous>, transform_indices = @transform_4, window_bounds = array<i64: 1, 256>}, {transform_indices = @transform_5, window_bounds = array<i64: 128, 256>}]} {
    %c0 = arith.constant 0 : index
    %c0_0 = arith.constant 0 : index
    %0 = vector.load %arg2[%c0, %c0_0] : memref<2x256xf32, #tpu.memory_space<vmem>>, vector<2x256xf32>
    %c0_1 = arith.constant 0 : index
    %c0_2 = arith.constant 0 : index
    %1 = vector.load %arg1[%c0_1, %c0_2] : memref<128x256xf32, #tpu.memory_space<vmem>>, vector<128x256xf32>
    %2 = vector.extract_strided_slice %0 {offsets = [0, 0], sizes = [1, 256], strides = [1, 1]} : vector<2x256xf32> to vector<1x256xf32>
    %3 = vector.broadcast %2 : vector<1x256xf32> to vector<128x256xf32>
    %4 = arith.mulf %1, %3 : vector<128x256xf32>
    %5 = vector.extract_strided_slice %0 {offsets = [1, 0], sizes = [1, 256], strides = [1, 1]} : vector<2x256xf32> to vector<1x256xf32>
    %6 = vector.broadcast %5 : vector<1x256xf32> to vector<128x256xf32>
    %7 = arith.addf %4, %6 : vector<128x256xf32>
    %cst = arith.constant 0.000000e+00 : f32
    %8 = vector.broadcast %cst : f32 to vector<128x256xf32>
    %9 = arith.cmpf oge, %7, %8 : vector<128x256xf32>
    %cst_3 = arith.constant 0.00999999977 : f32
    %10 = vector.broadcast %cst_3 : f32 to vector<128x256xf32>
    %11 = arith.mulf %10, %7 : vector<128x256xf32>
    %12 = arith.select %9, %7, %11 : vector<128x256xi1>, vector<128x256xf32>
    %c0_4 = arith.constant 0 : index
    %c0_5 = arith.constant 0 : index
    %13 = vector.load %arg3[%c0_4, %c0_5] : memref<128x128xf32, #tpu.memory_space<vmem>>, vector<128x128xf32>
    %c0_6 = arith.constant 0 : index
    %c0_7 = arith.constant 0 : index
    %14 = vector.load %arg4[%c0_6, %c0_7] : memref<128x256xf32, #tpu.memory_space<vmem>>, vector<128x256xf32>
    %cst_8 = arith.constant dense<0.000000e+00> : vector<128x256xf32>
    %15 = tpu.matmul %13, %14, %cst_8 {dimension_numbers = #tpu.dot_dimension_numbers<[1], [0], [0], [1], [0, 0, 1, 1], [], []>} : vector<128x128xf32>, vector<128x256xf32>, vector<128x256xf32> -> vector<128x256xf32>
    %c0_9 = arith.constant 0 : index
    %c0_10 = arith.constant 0 : index
    %16 = vector.load %arg5[%c0_9, %c0_10] : memref<1x256xf32, #tpu.memory_space<vmem>>, vector<1x256xf32>
    %17 = vector.broadcast %16 : vector<1x256xf32> to vector<128x256xf32>
    %18 = arith.addf %15, %17 : vector<128x256xf32>
    %19 = arith.addf %12, %18 : vector<128x256xf32>
    %c0_11 = arith.constant 0 : index
    %c0_12 = arith.constant 0 : index
    %20 = vector.load %arg6[%c0_11, %c0_12] : memref<128x256xf32, #tpu.memory_space<vmem>>, vector<128x256xf32>
    tpu.vector_store %arg6[%c0_11, %c0_12], %19 {strides = array<i32>} : memref<128x256xf32, #tpu.memory_space<vmem>>, vector<128x256xf32>,
    return
  }
  func.func @transform_0(%arg0: i32) -> (i32, i32) {
    %c0_i32 = arith.constant 0 : i32
    %c0_i32_0 = arith.constant 0 : i32
    return %arg0, %c0_i32 : i32, i32
  }
  func.func @transform_1(%arg0: i32) -> (i32, i32) {
    %c0_i32 = arith.constant 0 : i32
    %c0_i32_0 = arith.constant 0 : i32
    %c0_i32_1 = arith.constant 0 : i32
    return %c0_i32, %c0_i32_0 : i32, i32
  }
  func.func @transform_2(%arg0: i32) -> (i32, i32) {
    %c0_i32 = arith.constant 0 : i32
    %c0_i32_0 = arith.constant 0 : i32
    return %arg0, %c0_i32 : i32, i32
  }
  func.func @transform_3(%arg0: i32) -> (i32, i32) {
    %c0_i32 = arith.constant 0 : i32
    %c0_i32_0 = arith.constant 0 : i32
    %c0_i32_1 = arith.constant 0 : i32
    return %c0_i32, %c0_i32_0 : i32, i32
  }
  func.func @transform_4(%arg0: i32) -> (i32, i32) {
    %c0_i32 = arith.constant 0 : i32
    %c0_i32_0 = arith.constant 0 : i32
    %c0_i32_1 = arith.constant 0 : i32
    return %c0_i32, %c0_i32_0 : i32, i32
  }
  func.func @transform_5(%arg0: i32) -> (i32, i32) {
    %c0_i32 = arith.constant 0 : i32
    %c0_i32_0 = arith.constant 0 : i32
    return %arg0, %c0_i32 : i32, i32
  }
}

module attributes {stable_mosaic.version = 11 : i64} {
  func.func @_agg_stats_kernel(%arg0: i32, %arg1: i32, %arg2: memref<128x128xi8, #tpu.memory_space<vmem>>, %arg3: memref<256x256xf32, #tpu.memory_space<vmem>>, %arg4: memref<256x256xf32, #tpu.memory_space<vmem>>, %arg5: memref<128x256xf32, #tpu.memory_space<vmem>>, %arg6: memref<1x2x256xf32, #tpu.memory_space<vmem>>, %arg7: memref<128x256xf32, #tpu.memory_space<vmem>>) attributes {dimension_semantics = [#tpu.dimension_semantics<parallel>, #tpu.dimension_semantics<arbitrary>], iteration_bounds = array<i64: 2, 2>, scalar_prefetch = 0 : i64, scratch_operands = 1 : i64, tpu.core_type = #tpu.core_type<tc>, window_params = [{transform_indices = @transform_0, window_bounds = array<i64: 128, 128>}, {pipeline_mode = #tpu.pipeline_mode<synchronous>, transform_indices = @transform_1, window_bounds = array<i64: 256, 256>}, {pipeline_mode = #tpu.pipeline_mode<synchronous>, transform_indices = @transform_2, window_bounds = array<i64: 256, 256>}, {transform_indices = @transform_3, window_bounds = array<i64: 128, 256>}, {transform_indices = @transform_4, window_bounds = array<i64: 1, 2, 256>}]} {
    %c0_i32 = arith.constant 0 : i32
    %0 = arith.cmpi eq, %arg1, %c0_i32 : i32
    %1 = arith.extui %0 : i1 to i32
    %c0_i32_0 = arith.constant 0 : i32
    %2 = arith.cmpi ne, %1, %c0_i32_0 : i32
    scf.if %2 {
      %cst_8 = arith.constant 0.000000e+00 : f32
      %16 = vector.broadcast %cst_8 : f32 to vector<128x256xf32>
      %c0_9 = arith.constant 0 : index
      %c0_10 = arith.constant 0 : index
      %17 = vector.load %arg7[%c0_9, %c0_10] : memref<128x256xf32, #tpu.memory_space<vmem>>, vector<128x256xf32>
      tpu.vector_store %arg7[%c0_9, %c0_10], %16 {strides = array<i32>} : memref<128x256xf32, #tpu.memory_space<vmem>>, vector<128x256xf32>,
    } else {
    }
    %c128_i32 = arith.constant 128 : i32
    %3 = arith.muli %arg1, %c128_i32 : i32
    %4 = tpu.assume_multiple %3, 128 : i32
    %5 = arith.index_cast %4 : i32 to index
    %c0 = arith.constant 0 : index
    %6 = vector.load %arg3[%5, %c0] : memref<256x256xf32, #tpu.memory_space<vmem>>, vector<128x256xf32>
    %c0_1 = arith.constant 0 : index
    %c0_2 = arith.constant 0 : index
    %7 = vector.load %arg7[%c0_1, %c0_2] : memref<128x256xf32, #tpu.memory_space<vmem>>, vector<128x256xf32>
    %c0_3 = arith.constant 0 : index
    %c0_4 = arith.constant 0 : index
    %8 = vector.load %arg2[%c0_3, %c0_4] : memref<128x128xi8, #tpu.memory_space<vmem>>, vector<128x128xi8>
    %9 = arith.sitofp %8 : vector<128x128xi8> to vector<128x128xf32>
    %cst = arith.constant dense<0.000000e+00> : vector<128x256xf32>
    %10 = tpu.matmul %9, %6, %cst {dimension_numbers = #tpu.dot_dimension_numbers<[1], [0], [0], [1], [0, 0, 1, 1], [], []>} : vector<128x128xf32>, vector<128x256xf32>, vector<128x256xf32> -> vector<128x256xf32>
    %11 = arith.addf %7, %10 : vector<128x256xf32>
    %c0_5 = arith.constant 0 : index
    %c0_6 = arith.constant 0 : index
    %12 = vector.load %arg7[%c0_5, %c0_6] : memref<128x256xf32, #tpu.memory_space<vmem>>, vector<128x256xf32>
    tpu.vector_store %arg7[%c0_5, %c0_6], %11 {strides = array<i32>} : memref<128x256xf32, #tpu.memory_space<vmem>>, vector<128x256xf32>,
    %c1_i32 = arith.constant 1 : i32
    %13 = arith.cmpi eq, %arg1, %c1_i32 : i32
    %14 = arith.extui %13 : i1 to i32
    %c0_i32_7 = arith.constant 0 : i32
    %15 = arith.cmpi ne, %14, %c0_i32_7 : i32
    scf.if %15 {
      %c128_i32_8 = arith.constant 128 : i32
      %16 = arith.muli %arg0, %c128_i32_8 : i32
      %17 = tpu.assume_multiple %16, 128 : i32
      %18 = arith.index_cast %17 : i32 to index
      %c0_9 = arith.constant 0 : index
      %19 = vector.load %arg3[%18, %c0_9] : memref<256x256xf32, #tpu.memory_space<vmem>>, vector<128x256xf32>
      %c0_10 = arith.constant 0 : index
      %c0_11 = arith.constant 0 : index
      %20 = vector.load %arg7[%c0_10, %c0_11] : memref<128x256xf32, #tpu.memory_space<vmem>>, vector<128x256xf32>
      %21 = arith.addf %20, %19 : vector<128x256xf32>
      %c0_12 = arith.constant 0 : index
      %c0_13 = arith.constant 0 : index
      %22 = vector.load %arg4[%c0_12, %c0_13] : memref<256x256xf32, #tpu.memory_space<vmem>>, vector<256x256xf32>
      %cst_14 = arith.constant dense<0.000000e+00> : vector<128x256xf32>
      %23 = tpu.matmul %21, %22, %cst_14 {dimension_numbers = #tpu.dot_dimension_numbers<[1], [0], [0], [1], [0, 0, 1, 1], [], []>} : vector<128x256xf32>, vector<256x256xf32>, vector<128x256xf32> -> vector<128x256xf32>
      %c0_15 = arith.constant 0 : index
      %c0_16 = arith.constant 0 : index
      %24 = vector.load %arg5[%c0_15, %c0_16] : memref<128x256xf32, #tpu.memory_space<vmem>>, vector<128x256xf32>
      tpu.vector_store %arg5[%c0_15, %c0_16], %23 {strides = array<i32>} : memref<128x256xf32, #tpu.memory_space<vmem>>, vector<128x256xf32>,
      %cst_17 = arith.constant dense<0.000000e+00> : vector<256xf32>
      %25 = vector.multi_reduction <add>, %23, %cst_17 [0] : vector<128x256xf32> to vector<256xf32>
      %26 = vector.shape_cast %25 : vector<256xf32> to vector<1x256xf32>
      %27 = arith.mulf %23, %23 : vector<128x256xf32>
      %cst_18 = arith.constant dense<0.000000e+00> : vector<256xf32>
      %28 = vector.multi_reduction <add>, %27, %cst_18 [0] : vector<128x256xf32> to vector<256xf32>
      %29 = vector.shape_cast %28 : vector<256xf32> to vector<1x256xf32>
      %30 = tpu.concatenate %26, %29 in 0 : vector<1x256xf32>, vector<1x256xf32> -> vector<2x256xf32>
      %31 = vector.shape_cast %30 : vector<2x256xf32> to vector<1x2x256xf32>
      %c0_19 = arith.constant 0 : index
      %c0_20 = arith.constant 0 : index
      %c0_21 = arith.constant 0 : index
      %32 = vector.load %arg6[%c0_19, %c0_20, %c0_21] : memref<1x2x256xf32, #tpu.memory_space<vmem>>, vector<1x2x256xf32>
      tpu.vector_store %arg6[%c0_19, %c0_20, %c0_21], %31 {strides = array<i32>} : memref<1x2x256xf32, #tpu.memory_space<vmem>>, vector<1x2x256xf32>,
    } else {
    }
    return
  }
  func.func @transform_0(%arg0: i32, %arg1: i32) -> (i32, i32) {
    %c0_i32 = arith.constant 0 : i32
    return %arg0, %arg1 : i32, i32
  }
  func.func @transform_1(%arg0: i32, %arg1: i32) -> (i32, i32) {
    %c0_i32 = arith.constant 0 : i32
    %c0_i32_0 = arith.constant 0 : i32
    %c0_i32_1 = arith.constant 0 : i32
    return %c0_i32, %c0_i32_0 : i32, i32
  }
  func.func @transform_2(%arg0: i32, %arg1: i32) -> (i32, i32) {
    %c0_i32 = arith.constant 0 : i32
    %c0_i32_0 = arith.constant 0 : i32
    %c0_i32_1 = arith.constant 0 : i32
    return %c0_i32, %c0_i32_0 : i32, i32
  }
  func.func @transform_3(%arg0: i32, %arg1: i32) -> (i32, i32) {
    %c0_i32 = arith.constant 0 : i32
    %c0_i32_0 = arith.constant 0 : i32
    return %arg0, %c0_i32 : i32, i32
  }
  func.func @transform_4(%arg0: i32, %arg1: i32) -> (i32, i32, i32) {
    %c0_i32 = arith.constant 0 : i32
    %c0_i32_0 = arith.constant 0 : i32
    %c0_i32_1 = arith.constant 0 : i32
    return %arg0, %c0_i32, %c0_i32_0 : i32, i32, i32
  }
}

module attributes {stable_mosaic.version = 11 : i64} {
  func.func @_bn_act_res_kernel(%arg0: i32, %arg1: memref<128x256xf32, #tpu.memory_space<vmem>>, %arg2: memref<2x256xf32, #tpu.memory_space<vmem>>, %arg3: memref<128x256xf32, #tpu.memory_space<vmem>>, %arg4: memref<128x256xf32, #tpu.memory_space<vmem>>) attributes {dimension_semantics = [#tpu.dimension_semantics<parallel>], iteration_bounds = array<i64: 2>, scalar_prefetch = 0 : i64, scratch_operands = 0 : i64, tpu.core_type = #tpu.core_type<tc>, window_params = [{transform_indices = @transform_0, window_bounds = array<i64: 128, 256>}, {pipeline_mode = #tpu.pipeline_mode<synchronous>, transform_indices = @transform_1, window_bounds = array<i64: 2, 256>}, {transform_indices = @transform_2, window_bounds = array<i64: 128, 256>}, {transform_indices = @transform_3, window_bounds = array<i64: 128, 256>}]} {
    %c0 = arith.constant 0 : index
    %c0_0 = arith.constant 0 : index
    %0 = vector.load %arg2[%c0, %c0_0] : memref<2x256xf32, #tpu.memory_space<vmem>>, vector<2x256xf32>
    %c0_1 = arith.constant 0 : index
    %c0_2 = arith.constant 0 : index
    %1 = vector.load %arg1[%c0_1, %c0_2] : memref<128x256xf32, #tpu.memory_space<vmem>>, vector<128x256xf32>
    %2 = vector.extract_strided_slice %0 {offsets = [0, 0], sizes = [1, 256], strides = [1, 1]} : vector<2x256xf32> to vector<1x256xf32>
    %3 = vector.broadcast %2 : vector<1x256xf32> to vector<128x256xf32>
    %4 = arith.mulf %1, %3 : vector<128x256xf32>
    %5 = vector.extract_strided_slice %0 {offsets = [1, 0], sizes = [1, 256], strides = [1, 1]} : vector<2x256xf32> to vector<1x256xf32>
    %6 = vector.broadcast %5 : vector<1x256xf32> to vector<128x256xf32>
    %7 = arith.addf %4, %6 : vector<128x256xf32>
    %cst = arith.constant 0.000000e+00 : f32
    %8 = vector.broadcast %cst : f32 to vector<128x256xf32>
    %9 = arith.cmpf oge, %7, %8 : vector<128x256xf32>
    %cst_3 = arith.constant 0.00999999977 : f32
    %10 = vector.broadcast %cst_3 : f32 to vector<128x256xf32>
    %11 = arith.mulf %10, %7 : vector<128x256xf32>
    %12 = arith.select %9, %7, %11 : vector<128x256xi1>, vector<128x256xf32>
    %c0_4 = arith.constant 0 : index
    %c0_5 = arith.constant 0 : index
    %13 = vector.load %arg3[%c0_4, %c0_5] : memref<128x256xf32, #tpu.memory_space<vmem>>, vector<128x256xf32>
    %14 = arith.addf %12, %13 : vector<128x256xf32>
    %c0_6 = arith.constant 0 : index
    %c0_7 = arith.constant 0 : index
    %15 = vector.load %arg4[%c0_6, %c0_7] : memref<128x256xf32, #tpu.memory_space<vmem>>, vector<128x256xf32>
    tpu.vector_store %arg4[%c0_6, %c0_7], %14 {strides = array<i32>} : memref<128x256xf32, #tpu.memory_space<vmem>>, vector<128x256xf32>,
    return
  }
  func.func @transform_0(%arg0: i32) -> (i32, i32) {
    %c0_i32 = arith.constant 0 : i32
    %c0_i32_0 = arith.constant 0 : i32
    return %arg0, %c0_i32 : i32, i32
  }
  func.func @transform_1(%arg0: i32) -> (i32, i32) {
    %c0_i32 = arith.constant 0 : i32
    %c0_i32_0 = arith.constant 0 : i32
    %c0_i32_1 = arith.constant 0 : i32
    return %c0_i32, %c0_i32_0 : i32, i32
  }
  func.func @transform_2(%arg0: i32) -> (i32, i32) {
    %c0_i32 = arith.constant 0 : i32
    %c0_i32_0 = arith.constant 0 : i32
    return %arg0, %c0_i32 : i32, i32
  }
  func.func @transform_3(%arg0: i32) -> (i32, i32) {
    %c0_i32 = arith.constant 0 : i32
    %c0_i32_0 = arith.constant 0 : i32
    return %arg0, %c0_i32 : i32, i32
  }
}

module attributes {stable_mosaic.version = 11 : i64} {
  func.func @_linear_kernel(%arg0: i32, %arg1: memref<128x256xf32, #tpu.memory_space<vmem>>, %arg2: memref<256x128xf32, #tpu.memory_space<vmem>>, %arg3: memref<128x128xf32, #tpu.memory_space<vmem>>) attributes {dimension_semantics = [#tpu.dimension_semantics<parallel>], iteration_bounds = array<i64: 2>, scalar_prefetch = 0 : i64, scratch_operands = 0 : i64, tpu.core_type = #tpu.core_type<tc>, window_params = [{transform_indices = @transform_0, window_bounds = array<i64: 128, 256>}, {pipeline_mode = #tpu.pipeline_mode<synchronous>, transform_indices = @transform_1, window_bounds = array<i64: 256, 128>}, {transform_indices = @transform_2, window_bounds = array<i64: 128, 128>}]} {
    %c0 = arith.constant 0 : index
    %c0_0 = arith.constant 0 : index
    %0 = vector.load %arg1[%c0, %c0_0] : memref<128x256xf32, #tpu.memory_space<vmem>>, vector<128x256xf32>
    %c0_1 = arith.constant 0 : index
    %c0_2 = arith.constant 0 : index
    %1 = vector.load %arg2[%c0_1, %c0_2] : memref<256x128xf32, #tpu.memory_space<vmem>>, vector<256x128xf32>
    %cst = arith.constant dense<0.000000e+00> : vector<128x128xf32>
    %2 = tpu.matmul %0, %1, %cst {dimension_numbers = #tpu.dot_dimension_numbers<[1], [0], [0], [1], [0, 0, 1, 1], [], []>} : vector<128x256xf32>, vector<256x128xf32>, vector<128x128xf32> -> vector<128x128xf32>
    %c0_3 = arith.constant 0 : index
    %c0_4 = arith.constant 0 : index
    %3 = vector.load %arg3[%c0_3, %c0_4] : memref<128x128xf32, #tpu.memory_space<vmem>>, vector<128x128xf32>
    tpu.vector_store %arg3[%c0_3, %c0_4], %2 {strides = array<i32>} : memref<128x128xf32, #tpu.memory_space<vmem>>, vector<128x128xf32>,
    return
  }
  func.func @transform_0(%arg0: i32) -> (i32, i32) {
    %c0_i32 = arith.constant 0 : i32
    %c0_i32_0 = arith.constant 0 : i32
    return %arg0, %c0_i32 : i32, i32
  }
  func.func @transform_1(%arg0: i32) -> (i32, i32) {
    %c0_i32 = arith.constant 0 : i32
    %c0_i32_0 = arith.constant 0 : i32
    %c0_i32_1 = arith.constant 0 : i32
    return %c0_i32, %c0_i32_0 : i32, i32
  }
  func.func @transform_2(%arg0: i32) -> (i32, i32) {
    %c0_i32 = arith.constant 0 : i32
    %c0_i32_0 = arith.constant 0 : i32
    return %arg0, %c0_i32 : i32, i32
  }
}

module attributes {stable_mosaic.version = 11 : i64} {
  func.func @_agg_stats_kernel(%arg0: i32, %arg1: i32, %arg2: memref<128x128xi8, #tpu.memory_space<vmem>>, %arg3: memref<256x128xf32, #tpu.memory_space<vmem>>, %arg4: memref<128x128xf32, #tpu.memory_space<vmem>>, %arg5: memref<1x2x128xf32, #tpu.memory_space<vmem>>, %arg6: memref<128x128xf32, #tpu.memory_space<vmem>>) attributes {dimension_semantics = [#tpu.dimension_semantics<parallel>, #tpu.dimension_semantics<arbitrary>], iteration_bounds = array<i64: 2, 2>, scalar_prefetch = 0 : i64, scratch_operands = 1 : i64, tpu.core_type = #tpu.core_type<tc>, window_params = [{transform_indices = @transform_0, window_bounds = array<i64: 128, 128>}, {pipeline_mode = #tpu.pipeline_mode<synchronous>, transform_indices = @transform_1, window_bounds = array<i64: 256, 128>}, {transform_indices = @transform_2, window_bounds = array<i64: 128, 128>}, {transform_indices = @transform_3, window_bounds = array<i64: 1, 2, 128>}]} {
    %c0_i32 = arith.constant 0 : i32
    %0 = arith.cmpi eq, %arg1, %c0_i32 : i32
    %1 = arith.extui %0 : i1 to i32
    %c0_i32_0 = arith.constant 0 : i32
    %2 = arith.cmpi ne, %1, %c0_i32_0 : i32
    scf.if %2 {
      %cst_8 = arith.constant 0.000000e+00 : f32
      %16 = vector.broadcast %cst_8 : f32 to vector<128x128xf32>
      %c0_9 = arith.constant 0 : index
      %c0_10 = arith.constant 0 : index
      %17 = vector.load %arg6[%c0_9, %c0_10] : memref<128x128xf32, #tpu.memory_space<vmem>>, vector<128x128xf32>
      tpu.vector_store %arg6[%c0_9, %c0_10], %16 {strides = array<i32>} : memref<128x128xf32, #tpu.memory_space<vmem>>, vector<128x128xf32>,
    } else {
    }
    %c128_i32 = arith.constant 128 : i32
    %3 = arith.muli %arg1, %c128_i32 : i32
    %4 = tpu.assume_multiple %3, 128 : i32
    %5 = arith.index_cast %4 : i32 to index
    %c0 = arith.constant 0 : index
    %6 = vector.load %arg3[%5, %c0] : memref<256x128xf32, #tpu.memory_space<vmem>>, vector<128x128xf32>
    %c0_1 = arith.constant 0 : index
    %c0_2 = arith.constant 0 : index
    %7 = vector.load %arg6[%c0_1, %c0_2] : memref<128x128xf32, #tpu.memory_space<vmem>>, vector<128x128xf32>
    %c0_3 = arith.constant 0 : index
    %c0_4 = arith.constant 0 : index
    %8 = vector.load %arg2[%c0_3, %c0_4] : memref<128x128xi8, #tpu.memory_space<vmem>>, vector<128x128xi8>
    %9 = arith.sitofp %8 : vector<128x128xi8> to vector<128x128xf32>
    %cst = arith.constant dense<0.000000e+00> : vector<128x128xf32>
    %10 = tpu.matmul %9, %6, %cst {dimension_numbers = #tpu.dot_dimension_numbers<[1], [0], [0], [1], [0, 0, 1, 1], [], []>} : vector<128x128xf32>, vector<128x128xf32>, vector<128x128xf32> -> vector<128x128xf32>
    %11 = arith.addf %7, %10 : vector<128x128xf32>
    %c0_5 = arith.constant 0 : index
    %c0_6 = arith.constant 0 : index
    %12 = vector.load %arg6[%c0_5, %c0_6] : memref<128x128xf32, #tpu.memory_space<vmem>>, vector<128x128xf32>
    tpu.vector_store %arg6[%c0_5, %c0_6], %11 {strides = array<i32>} : memref<128x128xf32, #tpu.memory_space<vmem>>, vector<128x128xf32>,
    %c1_i32 = arith.constant 1 : i32
    %13 = arith.cmpi eq, %arg1, %c1_i32 : i32
    %14 = arith.extui %13 : i1 to i32
    %c0_i32_7 = arith.constant 0 : i32
    %15 = arith.cmpi ne, %14, %c0_i32_7 : i32
    scf.if %15 {
      %c128_i32_8 = arith.constant 128 : i32
      %16 = arith.muli %arg0, %c128_i32_8 : i32
      %17 = tpu.assume_multiple %16, 128 : i32
      %18 = arith.index_cast %17 : i32 to index
      %c0_9 = arith.constant 0 : index
      %19 = vector.load %arg3[%18, %c0_9] : memref<256x128xf32, #tpu.memory_space<vmem>>, vector<128x128xf32>
      %c0_10 = arith.constant 0 : index
      %c0_11 = arith.constant 0 : index
      %20 = vector.load %arg6[%c0_10, %c0_11] : memref<128x128xf32, #tpu.memory_space<vmem>>, vector<128x128xf32>
      %21 = arith.addf %20, %19 : vector<128x128xf32>
      %c0_12 = arith.constant 0 : index
      %c0_13 = arith.constant 0 : index
      %22 = vector.load %arg4[%c0_12, %c0_13] : memref<128x128xf32, #tpu.memory_space<vmem>>, vector<128x128xf32>
      tpu.vector_store %arg4[%c0_12, %c0_13], %21 {strides = array<i32>} : memref<128x128xf32, #tpu.memory_space<vmem>>, vector<128x128xf32>,
      %cst_14 = arith.constant dense<0.000000e+00> : vector<128xf32>
      %23 = vector.multi_reduction <add>, %21, %cst_14 [0] : vector<128x128xf32> to vector<128xf32>
      %24 = vector.shape_cast %23 : vector<128xf32> to vector<1x128xf32>
      %25 = arith.mulf %21, %21 : vector<128x128xf32>
      %cst_15 = arith.constant dense<0.000000e+00> : vector<128xf32>
      %26 = vector.multi_reduction <add>, %25, %cst_15 [0] : vector<128x128xf32> to vector<128xf32>
      %27 = vector.shape_cast %26 : vector<128xf32> to vector<1x128xf32>
      %28 = tpu.concatenate %24, %27 in 0 : vector<1x128xf32>, vector<1x128xf32> -> vector<2x128xf32>
      %29 = vector.shape_cast %28 : vector<2x128xf32> to vector<1x2x128xf32>
      %c0_16 = arith.constant 0 : index
      %c0_17 = arith.constant 0 : index
      %c0_18 = arith.constant 0 : index
      %30 = vector.load %arg5[%c0_16, %c0_17, %c0_18] : memref<1x2x128xf32, #tpu.memory_space<vmem>>, vector<1x2x128xf32>
      tpu.vector_store %arg5[%c0_16, %c0_17, %c0_18], %29 {strides = array<i32>} : memref<1x2x128xf32, #tpu.memory_space<vmem>>, vector<1x2x128xf32>,
    } else {
    }
    return
  }
  func.func @transform_0(%arg0: i32, %arg1: i32) -> (i32, i32) {
    %c0_i32 = arith.constant 0 : i32
    return %arg0, %arg1 : i32, i32
  }
  func.func @transform_1(%arg0: i32, %arg1: i32) -> (i32, i32) {
    %c0_i32 = arith.constant 0 : i32
    %c0_i32_0 = arith.constant 0 : i32
    %c0_i32_1 = arith.constant 0 : i32
    return %c0_i32, %c0_i32_0 : i32, i32
  }
  func.func @transform_2(%arg0: i32, %arg1: i32) -> (i32, i32) {
    %c0_i32 = arith.constant 0 : i32
    %c0_i32_0 = arith.constant 0 : i32
    return %arg0, %c0_i32 : i32, i32
  }
  func.func @transform_3(%arg0: i32, %arg1: i32) -> (i32, i32, i32) {
    %c0_i32 = arith.constant 0 : i32
    %c0_i32_0 = arith.constant 0 : i32
    %c0_i32_1 = arith.constant 0 : i32
    return %arg0, %c0_i32, %c0_i32_0 : i32, i32, i32
  }
}

module attributes {stable_mosaic.version = 11 : i64} {
  func.func @_bn_act_res_kernel(%arg0: i32, %arg1: memref<128x128xf32, #tpu.memory_space<vmem>>, %arg2: memref<2x128xf32, #tpu.memory_space<vmem>>, %arg3: memref<128x256xf32, #tpu.memory_space<vmem>>, %arg4: memref<256x128xf32, #tpu.memory_space<vmem>>, %arg5: memref<1x128xf32, #tpu.memory_space<vmem>>, %arg6: memref<128x128xf32, #tpu.memory_space<vmem>>) attributes {dimension_semantics = [#tpu.dimension_semantics<parallel>], iteration_bounds = array<i64: 2>, scalar_prefetch = 0 : i64, scratch_operands = 0 : i64, tpu.core_type = #tpu.core_type<tc>, window_params = [{transform_indices = @transform_0, window_bounds = array<i64: 128, 128>}, {pipeline_mode = #tpu.pipeline_mode<synchronous>, transform_indices = @transform_1, window_bounds = array<i64: 2, 128>}, {transform_indices = @transform_2, window_bounds = array<i64: 128, 256>}, {pipeline_mode = #tpu.pipeline_mode<synchronous>, transform_indices = @transform_3, window_bounds = array<i64: 256, 128>}, {pipeline_mode = #tpu.pipeline_mode<synchronous>, transform_indices = @transform_4, window_bounds = array<i64: 1, 128>}, {transform_indices = @transform_5, window_bounds = array<i64: 128, 128>}]} {
    %c0 = arith.constant 0 : index
    %c0_0 = arith.constant 0 : index
    %0 = vector.load %arg2[%c0, %c0_0] : memref<2x128xf32, #tpu.memory_space<vmem>>, vector<2x128xf32>
    %c0_1 = arith.constant 0 : index
    %c0_2 = arith.constant 0 : index
    %1 = vector.load %arg1[%c0_1, %c0_2] : memref<128x128xf32, #tpu.memory_space<vmem>>, vector<128x128xf32>
    %2 = vector.extract_strided_slice %0 {offsets = [0, 0], sizes = [1, 128], strides = [1, 1]} : vector<2x128xf32> to vector<1x128xf32>
    %3 = vector.broadcast %2 : vector<1x128xf32> to vector<128x128xf32>
    %4 = arith.mulf %1, %3 : vector<128x128xf32>
    %5 = vector.extract_strided_slice %0 {offsets = [1, 0], sizes = [1, 128], strides = [1, 1]} : vector<2x128xf32> to vector<1x128xf32>
    %6 = vector.broadcast %5 : vector<1x128xf32> to vector<128x128xf32>
    %7 = arith.addf %4, %6 : vector<128x128xf32>
    %cst = arith.constant 0.000000e+00 : f32
    %8 = vector.broadcast %cst : f32 to vector<128x128xf32>
    %9 = arith.cmpf oge, %7, %8 : vector<128x128xf32>
    %cst_3 = arith.constant 0.00999999977 : f32
    %10 = vector.broadcast %cst_3 : f32 to vector<128x128xf32>
    %11 = arith.mulf %10, %7 : vector<128x128xf32>
    %12 = arith.select %9, %7, %11 : vector<128x128xi1>, vector<128x128xf32>
    %c0_4 = arith.constant 0 : index
    %c0_5 = arith.constant 0 : index
    %13 = vector.load %arg3[%c0_4, %c0_5] : memref<128x256xf32, #tpu.memory_space<vmem>>, vector<128x256xf32>
    %c0_6 = arith.constant 0 : index
    %c0_7 = arith.constant 0 : index
    %14 = vector.load %arg4[%c0_6, %c0_7] : memref<256x128xf32, #tpu.memory_space<vmem>>, vector<256x128xf32>
    %cst_8 = arith.constant dense<0.000000e+00> : vector<128x128xf32>
    %15 = tpu.matmul %13, %14, %cst_8 {dimension_numbers = #tpu.dot_dimension_numbers<[1], [0], [0], [1], [0, 0, 1, 1], [], []>} : vector<128x256xf32>, vector<256x128xf32>, vector<128x128xf32> -> vector<128x128xf32>
    %c0_9 = arith.constant 0 : index
    %c0_10 = arith.constant 0 : index
    %16 = vector.load %arg5[%c0_9, %c0_10] : memref<1x128xf32, #tpu.memory_space<vmem>>, vector<1x128xf32>
    %17 = vector.broadcast %16 : vector<1x128xf32> to vector<128x128xf32>
    %18 = arith.addf %15, %17 : vector<128x128xf32>
    %19 = arith.addf %12, %18 : vector<128x128xf32>
    %c0_11 = arith.constant 0 : index
    %c0_12 = arith.constant 0 : index
    %20 = vector.load %arg6[%c0_11, %c0_12] : memref<128x128xf32, #tpu.memory_space<vmem>>, vector<128x128xf32>
    tpu.vector_store %arg6[%c0_11, %c0_12], %19 {strides = array<i32>} : memref<128x128xf32, #tpu.memory_space<vmem>>, vector<128x128xf32>,
    return
  }
  func.func @transform_0(%arg0: i32) -> (i32, i32) {
    %c0_i32 = arith.constant 0 : i32
    %c0_i32_0 = arith.constant 0 : i32
    return %arg0, %c0_i32 : i32, i32
  }
  func.func @transform_1(%arg0: i32) -> (i32, i32) {
    %c0_i32 = arith.constant 0 : i32
    %c0_i32_0 = arith.constant 0 : i32
    %c0_i32_1 = arith.constant 0 : i32
    return %c0_i32, %c0_i32_0 : i32, i32
  }
  func.func @transform_2(%arg0: i32) -> (i32, i32) {
    %c0_i32 = arith.constant 0 : i32
    %c0_i32_0 = arith.constant 0 : i32
    return %arg0, %c0_i32 : i32, i32
  }
  func.func @transform_3(%arg0: i32) -> (i32, i32) {
    %c0_i32 = arith.constant 0 : i32
    %c0_i32_0 = arith.constant 0 : i32
    %c0_i32_1 = arith.constant 0 : i32
    return %c0_i32, %c0_i32_0 : i32, i32
  }
  func.func @transform_4(%arg0: i32) -> (i32, i32) {
    %c0_i32 = arith.constant 0 : i32
    %c0_i32_0 = arith.constant 0 : i32
    %c0_i32_1 = arith.constant 0 : i32
    return %c0_i32, %c0_i32_0 : i32, i32
  }
  func.func @transform_5(%arg0: i32) -> (i32, i32) {
    %c0_i32 = arith.constant 0 : i32
    %c0_i32_0 = arith.constant 0 : i32
    return %arg0, %c0_i32 : i32, i32
  }
}

</mosaic_0001>

<bundles_post_ra>
// kernel: resgcn_forward.10
= control target key start
LH: loop header
LB: loop body
LE: loop exit
PB: predicated region body
PF: predicated region fallthrough
CT: control target
= control target key end

     0   :  { %s655_s12 = smov 0   ;;  %s860_s0 = inlined_call_operand.vmem [shape: f32[256,256], index: 0, kind: input, shape index: {}]   ;;  %s861_s1 = inlined_call_operand.vmem [shape: f32[2,256], index: 1, kind: input, shape index: {}]   ;;  %s862_s2 = inlined_call_operand.vmem [shape: f32[256,256], index: 2, kind: input, shape index: {}]   ;;  %s863_s3 = inlined_call_operand.vmem [shape: f32[256,256], index: 3, kind: output, shape index: {}]  }
   0x1 LB: > { %s600_s13 = sadd.s32 4294967295, %s633_s12   ;;  %p604_p0 = scmp.ge.s32.totalorder %s633_s12, 1  ;;  %s633_s12 = sphi %s655_s12, %s13_s12  }
   0x2   : > { %p151_p1 = scmp.lt.s32.totalorder %s633_s12, 3 }
   0x4   : > { %p152_p2 = pnand %p604_p0, %p151_p1 }
   0x5   : > { %s605_s14 = sshll.u32 (!%p152_p2), %s600_s13, 4  ;;  %v238_v0 = vlaneseq (!%p152_p2)  ;;  %v204_v2 = vld [vmem:[%s861_s1] sm:$0xf] (!%p152_p2) }
   0x6   : > { %155 = sbr.rel (%p152_p2) target bundleno = 72 (0x48), region = 32  ;;  %p184_p3 = scmp.lt.s32.totalorder (!%p152_p2), %s605_s14, 31 }
   0x7   : > { %v239_v1 = vshrl.u32 (!%p152_p2), %v238_v0, 7 }
   0x9   : > { %v240_v3 = vsub.s32 (!%p152_p2), 0, %v239_v1  ;;  %v290_v4 = vsub.s32 (!%p152_p2), 1, %v239_v1  ;;  %v244_v5 = vsub.s32 (!%p152_p2), 2, %v239_v1  ;;  %v294_v6 = vsub.s32 (!%p152_p2), 3, %v239_v1 }
   0xb   : > { %v241_v7 = vrot.slane (!%p152_p2), %v204_v2, %v240_v3  ;;  %v291_v8 = vrot.slane (!%p152_p2), %v204_v2, %v290_v4  ;;  %v245_v9 = vrot.slane (!%p152_p2), %v204_v2, %v244_v5  ;;  %v295_v10 = vrot.slane (!%p152_p2), %v204_v2, %v294_v6 }
   0xd   : > { %s865_s14 = smov (!%p184_p3, %s605_s14), 31  ;;  %v676_v13 = vrot.slane %v241_v7, %v240_v3  ;;  %v678_v14 = vrot.slane %v291_v8, %v290_v4  ;;  %v680_v15 = vrot.slane %v245_v9, %v240_v3  ;;  %v682_v16 = vrot.slane %v295_v10, %v290_v4 }
   0xe   : > { %s666_s17 = sshll.u32 %s865_s14, 4 }
   0xf   : > { %s672_s20 = scalar_lea.vmem %s860_s0, %s666_s17  ;;  %s689_s23 = scalar_lea.vmem %s862_s2, %s666_s17 }
  0x10   : > { %v205_v11 = vld [vmem:[%s672_s20] sm:$0xff]  ;;  %v206_v12 = vld [vmem:[%s672_s20 + $0x8] sm:$0xff]  ;;  %v207_v17 = vld [vmem:[%s672_s20 + $0x10] sm:$0xff]  ;;  %s718_s26 = scalar_lea.vmem %s863_s3, %s666_s17 }
  0x11   : > { %v208_v18 = vld [vmem:[%s672_s20 + $0x18] sm:$0xff]  ;;  %v209_v19 = vld [vmem:[%s672_s20 + $0x20] sm:$0xff]  ;;  %v256_v20 = vmul.f32 %v676_v13, %v205_v11  ;;  %v257_v21 = vmul.f32 %v680_v15, %v206_v12  ;;  %v258_v22 = vmul.f32 %v676_v13, %v207_v17  ;;  %v210_v24 = vld [vmem:[%s672_s20 + $0x28] sm:$0xff] }
  0x12   : > { %v259_v23 = vmul.f32 %v680_v15, %v208_v18  ;;  %v260_v25 = vmul.f32 %v676_v13, %v209_v19  ;;  %v261_v26 = vmul.f32 %v680_v15, %v210_v24  ;;  %v211_v27 = vld [vmem:[%s672_s20 + $0x30] sm:$0xff]  ;;  %v212_v28 = vld [vmem:[%s672_s20 + $0x38] sm:$0xff]  ;;  %v434_v30 = vld [vmem:[%s689_s23] sm:$0xff] }
  0x13   : > { %v306_v29 = vadd.f32 %v678_v14, %v256_v20  ;;  %v307_v31 = vadd.f32 %v682_v16, %v257_v21  ;;  %v308_v32 = vadd.f32 %v678_v14, %v258_v22  ;;  %v435_v34 = vld [vmem:[%s689_s23 + $0x8] sm:$0xff]  ;;  %v436_v35 = vld [vmem:[%s689_s23 + $0x10] sm:$0xff]  ;;  %v437_v36 = vld [vmem:[%s689_s23 + $0x18] sm:$0xff]  ;;  %v262_v39 = vmul.f32 %v676_v13, %v211_v27 }
  0x14   : > { %v309_v33 = vadd.f32 %v682_v16, %v259_v23  ;;  %v310_v37 = vadd.f32 %v678_v14, %v260_v25  ;;  %v311_v38 = vadd.f32 %v682_v16, %v261_v26  ;;  %v263_v40 = vmul.f32 %v680_v15, %v212_v28  ;;  %v438_v48 = vld [vmem:[%s689_s23 + $0x20] sm:$0xff]  ;;  %v214_v54 = vld [vmem:[%s672_s20 + $0x48] sm:$0xff]  ;;  %v215_v55 = vld [vmem:[%s672_s20 + $0x50] sm:$0xff] }
  0x15   : > { %vm338_vm0 = vcmp.ge.f32.partialorder %v306_v29, 0.0  ;;  %v370_v41 = vmul.f32 0.01, %v306_v29  ;;  %vm339_vm1 = vcmp.ge.f32.partialorder %v307_v31, 0.0  ;;  %v371_v42 = vmul.f32 0.01, %v307_v31 }
  0x16   : > { %vm340_vm2 = vcmp.ge.f32.partialorder %v308_v32, 0.0  ;;  %v372_v43 = vmul.f32 0.01, %v308_v32  ;;  %vm341_vm3 = vcmp.ge.f32.partialorder %v309_v33, 0.0  ;;  %v373_v44 = vmul.f32 0.01, %v309_v33 }
  0x17   : > { %v402_v45 = vsel %vm338_vm0, %v306_v29, %v370_v41  ;;  %v403_v46 = vsel %vm339_vm1, %v307_v31, %v371_v42  ;;  %vm342_vm4 = vcmp.ge.f32.partialorder %v310_v37, 0.0  ;;  %v374_v47 = vmul.f32 0.01, %v310_v37  ;;  %v213_v49 = vld [vmem:[%s672_s20 + $0x40] sm:$0xff]  ;;  %v216_v56 = vld [vmem:[%s672_s20 + $0x58] sm:$0xff]  ;;  %v439_v62 = vld [vmem:[%s689_s23 + $0x28] sm:$0xff] }
  0x18   : > { %v466_v50 = vadd.f32 %v434_v30, %v402_v45  ;;  %v467_v51 = vadd.f32 %v435_v34, %v403_v46  ;;  %v404_v52 = vsel %vm340_vm2, %v308_v32, %v372_v43  ;;  %v405_v53 = vsel %vm341_vm3, %v309_v33, %v373_v44  ;;  %v217_v5 = vld [vmem:[%s672_s20 + $0x60] sm:$0xff]  ;;  %v440_v8 = vld [vmem:[%s689_s23 + $0x30] sm:$0xff]  ;;  %v441_v11 = vld [vmem:[%s689_s23 + $0x38] sm:$0xff] }
  0x19   : > { %v468_v57 = vadd.f32 %v436_v35, %v404_v52  ;;  %v469_v58 = vadd.f32 %v437_v36, %v405_v53  ;;  %v406_v59 = vsel %vm342_vm4, %v310_v37, %v374_v47  ;;  %vm343_vm5 = vcmp.ge.f32.partialorder %v311_v38, 0.0  ;;  %v442_v25 = vld [vmem:[%s689_s23 + $0x40] sm:$0xff]  ;;  %v443_v26 = vld [vmem:[%s689_s23 + $0x48] sm:$0xff]  ;;  %v444_v30 = vld [vmem:[%s689_s23 + $0x50] sm:$0xff] }
  0x1a   : > { %498 = vst [vmem:[%s718_s26] sm:$0xff] %v466_v50  ;;  %499 = vst [vmem:[%s718_s26 + $0x8] sm:$0xff] %v467_v51  ;;  %v470_v60 = vadd.f32 %v438_v48, %v406_v59  ;;  %v375_v61 = vmul.f32 0.01, %v311_v38  ;;  %v312_v63 = vadd.f32 %v678_v14, %v262_v39  ;;  %v313_v0 = vadd.f32 %v682_v16, %v263_v40  ;;  %v218_v27 = vld [vmem:[%s672_s20 + $0x68] sm:$0xff]  ;;  %v219_v31 = vld [vmem:[%s672_s20 + $0x70] sm:$0xff] }
  0x1b   : > { %500 = vst [vmem:[%s718_s26 + $0x10] sm:$0xff] %v468_v57  ;;  %501 = vst [vmem:[%s718_s26 + $0x18] sm:$0xff] %v469_v58  ;;  %v264_v1 = vmul.f32 %v676_v13, %v213_v49  ;;  %v265_v2 = vmul.f32 %v680_v15, %v214_v54  ;;  %v266_v3 = vmul.f32 %v676_v13, %v215_v55  ;;  %v445_v35 = vld [vmem:[%s689_s23 + $0x58] sm:$0xff]  ;;  %v221_v41 = vld [vmem:[%s672_s20 + $0x80] sm:$0xff] }
  0x1c   : > { %v267_v4 = vmul.f32 %v680_v15, %v216_v56  ;;  %502 = vst [vmem:[%s718_s26 + $0x20] sm:$0xff] %v470_v60  ;;  %v407_v6 = vsel %vm343_vm5, %v311_v38, %v375_v61  ;;  %vm344_vm6 = vcmp.ge.f32.partialorder %v312_v63, 0.0  ;;  %v376_v7 = vmul.f32 0.01, %v312_v63  ;;  %v220_v40 = vld [vmem:[%s672_s20 + $0x78] sm:$0xff]  ;;  %v222_v46 = vld [vmem:[%s672_s20 + $0x88] sm:$0xff] }
  0x1d   : > { %vm345_vm7 = vcmp.ge.f32.partialorder %v313_v0, 0.0  ;;  %v471_v9 = vadd.f32 %v439_v62, %v407_v6  ;;  %v377_v10 = vmul.f32 0.01, %v313_v0  ;;  %v314_v12 = vadd.f32 %v678_v14, %v264_v1  ;;  %v223_v47 = vld [vmem:[%s672_s20 + $0x90] sm:$0xff]  ;;  %v224_v48 = vld [vmem:[%s672_s20 + $0x98] sm:$0xff]  ;;  %v446_v52 = vld [vmem:[%s689_s23 + $0x60] sm:$0xff] }
  0x1e   : > { %v315_v17 = vadd.f32 %v682_v16, %v265_v2  ;;  %v408_v18 = vsel %vm344_vm6, %v312_v63, %v376_v7  ;;  %v316_v19 = vadd.f32 %v678_v14, %v266_v3  ;;  %v317_v20 = vadd.f32 %v682_v16, %v267_v4  ;;  %v225_v61 = vld [vmem:[%s672_s20 + $0xa0] sm:$0xff]  ;;  %v448_v2 = vld [vmem:[%s689_s23 + $0x70] sm:$0xff] }
  0x1f   : > { %v268_v21 = vmul.f32 %v676_v13, %v217_v5  ;;  %503 = vst [vmem:[%s718_s26 + $0x28] sm:$0xff] %v471_v9  ;;  %v472_v22 = vadd.f32 %v440_v8, %v408_v18  ;;  %v409_v23 = vsel %vm345_vm7, %v313_v0, %v377_v10  ;;  %vm346_vm8 = vcmp.ge.f32.partialorder %v314_v12, 0.0  ;;  %v447_v0 = vld [vmem:[%s689_s23 + $0x68] sm:$0xff]  ;;  %v450_v18 = vld [vmem:[%s689_s23 + $0x80] sm:$0xff] }
  0x20   : > { %v378_v24 = vmul.f32 0.01, %v314_v12  ;;  %v473_v28 = vadd.f32 %v441_v11, %v409_v23  ;;  %vm347_vm9 = vcmp.ge.f32.partialorder %v315_v17, 0.0  ;;  %v379_v29 = vmul.f32 0.01, %v315_v17 }
  0x21   : > { %vm348_vm10 = vcmp.ge.f32.partialorder %v316_v19, 0.0  ;;  %504 = vst [vmem:[%s718_s26 + $0x30] sm:$0xff] %v472_v22  ;;  %v380_v33 = vmul.f32 0.01, %v316_v19  ;;  %vm349_vm11 = vcmp.ge.f32.partialorder %v317_v20, 0.0  ;;  %v318_v38 = vadd.f32 %v678_v14, %v268_v21  ;;  %v451_v21 = vld [vmem:[%s689_s23 + $0x88] sm:$0xff] }
  0x22   : > { %v410_v32 = vsel %vm346_vm8, %v314_v12, %v378_v24  ;;  %v381_v34 = vmul.f32 0.01, %v317_v20  ;;  %505 = vst [vmem:[%s718_s26 + $0x38] sm:$0xff] %v473_v28  ;;  %v411_v37 = vsel %vm347_vm9, %v315_v17, %v379_v29  ;;  %v269_v39 = vmul.f32 %v680_v15, %v218_v27  ;;  %v449_v17 = vld [vmem:[%s689_s23 + $0x78] sm:$0xff]  ;;  %v452_v22 = vld [vmem:[%s689_s23 + $0x90] sm:$0xff] }
  0x23   : > { %v474_v36 = vadd.f32 %v442_v25, %v410_v32  ;;  %v475_v42 = vadd.f32 %v443_v26, %v411_v37  ;;  %v412_v43 = vsel %vm348_vm10, %v316_v19, %v380_v33  ;;  %v270_v45 = vmul.f32 %v676_v13, %v219_v31  ;;  %v226_v26 = vld [vmem:[%s672_s20 + $0xa8] sm:$0xff]  ;;  %v227_v31 = vld [vmem:[%s672_s20 + $0xb0] sm:$0xff]  ;;  %v229_v37 = vld [vmem:[%s672_s20 + $0xc0] sm:$0xff] }
  0x24   : > { %v413_v44 = vsel %vm349_vm11, %v317_v20, %v381_v34  ;;  %v476_v49 = vadd.f32 %v444_v30, %v412_v43  ;;  %vm350_vm12 = vcmp.ge.f32.partialorder %v318_v38, 0.0  ;;  %v382_v51 = vmul.f32 0.01, %v318_v38  ;;  %v453_v30 = vld [vmem:[%s689_s23 + $0x98] sm:$0xff]  ;;  %v231_v43 = vld [vmem:[%s672_s20 + $0xd0] sm:$0xff] }
  0x25   : > { %506 = vst [vmem:[%s718_s26 + $0x40] sm:$0xff] %v474_v36  ;;  %v477_v50 = vadd.f32 %v445_v35, %v413_v44  ;;  %507 = vst [vmem:[%s718_s26 + $0x48] sm:$0xff] %v475_v42  ;;  %v319_v53 = vadd.f32 %v682_v16, %v269_v39  ;;  %v320_v54 = vadd.f32 %v678_v14, %v270_v45  ;;  %v228_v36 = vld [vmem:[%s672_s20 + $0xb8] sm:$0xff] }
  0x26   : > { %v271_v55 = vmul.f32 %v680_v15, %v220_v40  ;;  %v272_v56 = vmul.f32 %v676_v13, %v221_v41  ;;  %508 = vst [vmem:[%s718_s26 + $0x50] sm:$0xff] %v476_v49  ;;  %v414_v57 = vsel %vm350_vm12, %v318_v38, %v382_v51  ;;  %v273_v58 = vmul.f32 %v680_v15, %v222_v46  ;;  %v230_v38 = vld [vmem:[%s672_s20 + $0xc8] sm:$0xff]  ;;  %v232_v44 = vld [vmem:[%s672_s20 + $0xd8] sm:$0xff] }
  0x27   : > { %509 = vst [vmem:[%s718_s26 + $0x58] sm:$0xff] %v477_v50  ;;  %v274_v59 = vmul.f32 %v676_v13, %v223_v47  ;;  %v275_v60 = vmul.f32 %v680_v15, %v224_v48  ;;  %v478_v62 = vadd.f32 %v446_v52, %v414_v57  ;;  %vm351_vm13 = vcmp.ge.f32.partialorder %v319_v53, 0.0  ;;  %v454_v47 = vld [vmem:[%s689_s23 + $0xa0] sm:$0xff] }
  0x28   : > { %v383_v63 = vmul.f32 0.01, %v319_v53  ;;  %vm352_vm14 = vcmp.ge.f32.partialorder %v320_v54, 0.0  ;;  %v384_v1 = vmul.f32 0.01, %v320_v54  ;;  %v321_v3 = vadd.f32 %v682_v16, %v271_v55 }
  0x29   : > { %v322_v4 = vadd.f32 %v678_v14, %v272_v56  ;;  %v323_v5 = vadd.f32 %v682_v16, %v273_v58  ;;  %510 = vst [vmem:[%s718_s26 + $0x60] sm:$0xff] %v478_v62  ;;  %v324_v7 = vadd.f32 %v678_v14, %v274_v59  ;;  %v325_v8 = vadd.f32 %v682_v16, %v275_v60  ;;  %v455_v59 = vld [vmem:[%s689_s23 + $0xa8] sm:$0xff]  ;;  %v456_v62 = vld [vmem:[%s689_s23 + $0xb0] sm:$0xff] }
  0x2a   : > { %v415_v6 = vsel %vm351_vm13, %v319_v53, %v383_v63  ;;  %v276_v9 = vmul.f32 %v676_v13, %v225_v61  ;;  %v416_v11 = vsel %vm352_vm14, %v320_v54, %v384_v1  ;;  %vm353_vm15 = vcmp.ge.f32.partialorder %v321_v3, 0.0 }
  0x2b   : > { %v479_v10 = vadd.f32 %v447_v0, %v415_v6  ;;  %v385_v12 = vmul.f32 0.01, %v321_v3  ;;  %v480_v19 = vadd.f32 %v448_v2, %v416_v11  ;;  %vm354_vm0 = vcmp.ge.f32.partialorder %v322_v4, 0.0 }
  0x2c   : > { %v386_v20 = vmul.f32 0.01, %v322_v4  ;;  %vm355_vm1 = vcmp.ge.f32.partialorder %v323_v5, 0.0  ;;  %v387_v24 = vmul.f32 0.01, %v323_v5  ;;  %vm356_vm2 = vcmp.ge.f32.partialorder %v324_v7, 0.0 }
  0x2d   : > { %511 = vst [vmem:[%s718_s26 + $0x68] sm:$0xff] %v479_v10  ;;  %v417_v23 = vsel %vm353_vm15, %v321_v3, %v385_v12  ;;  %v388_v25 = vmul.f32 0.01, %v324_v7  ;;  %512 = vst [vmem:[%s718_s26 + $0x70] sm:$0xff] %v480_v19  ;;  %vm357_vm3 = vcmp.ge.f32.partialorder %v325_v8, 0.0  ;;  %v326_v35 = vadd.f32 %v678_v14, %v276_v9  ;;  %v457_v3 = vld [vmem:[%s689_s23 + $0xb8] sm:$0xff] }
  0x2e   : > { %v481_v27 = vadd.f32 %v449_v17, %v417_v23  ;;  %v418_v28 = vsel %vm354_vm0, %v322_v4, %v386_v20  ;;  %v389_v29 = vmul.f32 0.01, %v325_v8  ;;  %v419_v33 = vsel %vm355_vm1, %v323_v5, %v387_v24  ;;  %v233_v9 = vld [vmem:[%s672_s20 + $0xe0] sm:$0xff]  ;;  %v459_v17 = vld [vmem:[%s689_s23 + $0xc8] sm:$0xff]  ;;  %v235_v19 = vld [vmem:[%s672_s20 + $0xf0] sm:$0xff] }
  0x2f   : > { %v482_v32 = vadd.f32 %v450_v18, %v418_v28  ;;  %v420_v34 = vsel %vm356_vm2, %v324_v7, %v388_v25  ;;  %v483_v39 = vadd.f32 %v451_v21, %v419_v33  ;;  %v277_v42 = vmul.f32 %v680_v15, %v226_v26  ;;  %v234_v18 = vld [vmem:[%s672_s20 + $0xe8] sm:$0xff]  ;;  %v460_v23 = vld [vmem:[%s689_s23 + $0xd0] sm:$0xff]  ;;  %v236_v28 = vld [vmem:[%s672_s20 + $0xf8] sm:$0xff] }
  0x30   : > { %513 = vst [vmem:[%s718_s26 + $0x78] sm:$0xff] %v481_v27  ;;  %v484_v40 = vadd.f32 %v452_v22, %v420_v34  ;;  %v421_v41 = vsel %vm357_vm3, %v325_v8, %v389_v29  ;;  %vm358_vm4 = vcmp.ge.f32.partialorder %v326_v35, 0.0  ;;  %v390_v46 = vmul.f32 0.01, %v326_v35  ;;  %v458_v8 = vld [vmem:[%s689_s23 + $0xc0] sm:$0xff] }
  0x31   : > { %514 = vst [vmem:[%s718_s26 + $0x80] sm:$0xff] %v482_v32  ;;  %v485_v45 = vadd.f32 %v453_v30, %v421_v41  ;;  %v278_v48 = vmul.f32 %v676_v13, %v227_v31  ;;  %515 = vst [vmem:[%s718_s26 + $0x88] sm:$0xff] %v483_v39  ;;  %v327_v49 = vadd.f32 %v682_v16, %v277_v42  ;;  %v462_v41 = vld [vmem:[%s689_s23 + $0xe0] sm:$0xff] }
  0x32   : > { %516 = vst [vmem:[%s718_s26 + $0x90] sm:$0xff] %v484_v40  ;;  %v279_v50 = vmul.f32 %v680_v15, %v228_v36  ;;  %v280_v51 = vmul.f32 %v676_v13, %v229_v37  ;;  %v281_v52 = vmul.f32 %v680_v15, %v230_v38  ;;  %v422_v53 = vsel %vm358_vm4, %v326_v35, %v390_v46  ;;  %v461_v35 = vld [vmem:[%s689_s23 + $0xd8] sm:$0xff] }
  0x33   : > { %517 = vst [vmem:[%s718_s26 + $0x98] sm:$0xff] %v485_v45  ;;  %v328_v54 = vadd.f32 %v678_v14, %v278_v48  ;;  %v282_v55 = vmul.f32 %v676_v13, %v231_v43  ;;  %v283_v56 = vmul.f32 %v680_v15, %v232_v44  ;;  %v486_v57 = vadd.f32 %v454_v47, %v422_v53  ;;  %v463_v44 = vld [vmem:[%s689_s23 + $0xe8] sm:$0xff] }
  0x34   : > { %vm359_vm5 = vcmp.ge.f32.partialorder %v327_v49, 0.0  ;;  %v391_v58 = vmul.f32 0.01, %v327_v49  ;;  %v329_v60 = vadd.f32 %v682_v16, %v279_v50  ;;  %v330_v63 = vadd.f32 %v678_v14, %v280_v51 }
  0x35   : > { %vm360_vm6 = vcmp.ge.f32.partialorder %v328_v54, 0.0  ;;  %v392_v61 = vmul.f32 0.01, %v328_v54  ;;  %v331_v0 = vadd.f32 %v682_v16, %v281_v52  ;;  %518 = vst [vmem:[%s718_s26 + $0xa0] sm:$0xff] %v486_v57  ;;  %v332_v4 = vadd.f32 %v678_v14, %v282_v55  ;;  %v465_v52 = vld [vmem:[%s689_s23 + $0xf8] sm:$0xff] }
  0x36   : > { %v423_v1 = vsel %vm359_vm5, %v327_v49, %v391_v58  ;;  %vm361_vm7 = vcmp.ge.f32.partialorder %v329_v60, 0.0  ;;  %v393_v2 = vmul.f32 0.01, %v329_v60  ;;  %vm362_vm8 = vcmp.ge.f32.partialorder %v330_v63, 0.0 }
  0x37   : > { %v487_v5 = vadd.f32 %v455_v59, %v423_v1  ;;  %v424_v6 = vsel %vm360_vm6, %v328_v54, %v392_v61  ;;  %v394_v7 = vmul.f32 0.01, %v330_v63  ;;  %vm363_vm9 = vcmp.ge.f32.partialorder %v331_v0, 0.0 }
  0x38   : > { %v488_v10 = vadd.f32 %v456_v62, %v424_v6  ;;  %v425_v11 = vsel %vm361_vm7, %v329_v60, %v393_v2  ;;  %v395_v12 = vmul.f32 0.01, %v331_v0  ;;  %vm364_vm10 = vcmp.ge.f32.partialorder %v332_v4, 0.0 }
  0x39   : > { %519 = vst [vmem:[%s718_s26 + $0xa8] sm:$0xff] %v487_v5  ;;  %v489_v20 = vadd.f32 %v457_v3, %v425_v11  ;;  %v426_v21 = vsel %vm362_vm8, %v330_v63, %v394_v7  ;;  %v396_v22 = vmul.f32 0.01, %v332_v4  ;;  %v333_v26 = vadd.f32 %v682_v16, %v283_v56 }
  0x3a   : > { %520 = vst [vmem:[%s718_s26 + $0xb0] sm:$0xff] %v488_v10  ;;  %v490_v24 = vadd.f32 %v458_v8, %v426_v21  ;;  %v427_v25 = vsel %vm363_vm9, %v331_v0, %v395_v12  ;;  %v284_v27 = vmul.f32 %v676_v13, %v233_v9  ;;  %v285_v31 = vmul.f32 %v680_v15, %v234_v18 }
  0x3b   : > { %521 = vst [vmem:[%s718_s26 + $0xb8] sm:$0xff] %v489_v20  ;;  %v491_v29 = vadd.f32 %v459_v17, %v427_v25  ;;  %v428_v30 = vsel %vm364_vm10, %v332_v4, %v396_v22  ;;  %v286_v32 = vmul.f32 %v676_v13, %v235_v19  ;;  %vm365_vm11 = vcmp.ge.f32.partialorder %v333_v26, 0.0 }
  0x3c   : > { %522 = vst [vmem:[%s718_s26 + $0xc0] sm:$0xff] %v490_v24  ;;  %v492_v33 = vadd.f32 %v460_v23, %v428_v30  ;;  %v397_v34 = vmul.f32 0.01, %v333_v26  ;;  %v334_v36 = vadd.f32 %v678_v14, %v284_v27  ;;  %v335_v37 = vadd.f32 %v682_v16, %v285_v31 }
  0x3d   : > { %523 = vst [vmem:[%s718_s26 + $0xc8] sm:$0xff] %v491_v29  ;;  %v336_v38 = vadd.f32 %v678_v14, %v286_v32  ;;  %v287_v39 = vmul.f32 %v680_v15, %v236_v28  ;;  %v464_v14 = vld [vmem:[%s689_s23 + $0xf0] sm:$0xff] }
  0x3e   : > { %524 = vst [vmem:[%s718_s26 + $0xd0] sm:$0xff] %v492_v33  ;;  %v429_v40 = vsel %vm365_vm11, %v333_v26, %v397_v34  ;;  %vm366_vm12 = vcmp.ge.f32.partialorder %v334_v36, 0.0  ;;  %v398_v13 = vmul.f32 0.01, %v334_v36  ;;  %vm367_vm13 = vcmp.ge.f32.partialorder %v335_v37, 0.0 }
  0x3f   : > { %v493_v42 = vadd.f32 %v461_v35, %v429_v40  ;;  %v399_v43 = vmul.f32 0.01, %v335_v37  ;;  %vm368_vm14 = vcmp.ge.f32.partialorder %v336_v38, 0.0  ;;  %v400_v46 = vmul.f32 0.01, %v336_v38 }
  0x40   : > { %v430_v45 = vsel %vm366_vm12, %v334_v36, %v398_v13  ;;  %v337_v15 = vadd.f32 %v682_v16, %v287_v39 }
  0x41   : > { %525 = vst [vmem:[%s718_s26 + $0xd8] sm:$0xff] %v493_v42  ;;  %v494_v47 = vadd.f32 %v462_v41, %v430_v45  ;;  %v431_v48 = vsel %vm367_vm13, %v335_v37, %v399_v43  ;;  %v432_v50 = vsel %vm368_vm14, %v336_v38, %v400_v46 }
  0x42   : > { %v495_v49 = vadd.f32 %v463_v44, %v431_v48  ;;  %vm369_vm15 = vcmp.ge.f32.partialorder %v337_v15, 0.0  ;;  %v401_v51 = vmul.f32 0.01, %v337_v15  ;;  %v496_v53 = vadd.f32 %v464_v14, %v432_v50 }
  0x43   : > { %526 = vst [vmem:[%s718_s26 + $0xe0] sm:$0xff] %v494_v47 }
  0x44   : > { %527 = vst [vmem:[%s718_s26 + $0xe8] sm:$0xff] %v495_v49  ;;  %v433_v54 = vsel %vm369_vm15, %v337_v15, %v401_v51  ;;  %528 = vst [vmem:[%s718_s26 + $0xf0] sm:$0xff] %v496_v53 }
  0x45   : > { %v497_v55 = vadd.f32 %v465_v52, %v433_v54 }
  0x47   : > { %529 = vst [vmem:[%s718_s26 + $0xf8] sm:$0xff] %v497_v55 }
  0x48 PF: > { %s13_s12 = sadd.s32 1, %s633_s12  }
  0x49   : > { %p10_p4 = scmp.ge.s32.totalorder %s13_s12, 4  }
  0x4b   :  { %12 = sbr.rel (!%p10_p4) target bundleno = 1 (0x1), region = 65 }

// kernel: resgcn_forward.7
= control target key start
LH: loop header
LB: loop body
LE: loop exit
PB: predicated region body
PF: predicated region fallthrough
CT: control target
= control target key end

     0   :  { %s1420_s15 = smov 0   ;;  %s1422_s16 = smov 0   ;;  %s1798_s0 = inlined_call_operand.vmem [shape: s8[256,256], index: 0, kind: input, shape index: {}]   ;;  %s1799_s1 = inlined_call_operand.vmem [shape: f32[256,128], index: 1, kind: input, shape index: {}]   ;;  %s1800_s2 = inlined_call_operand.vmem [shape: f32[128,256], index: 2, kind: input, shape index: {}]   ;;  %s1801_s3 = inlined_call_operand.vmem [shape: f32[256,256], index: 3, kind: output, shape index: {0}]   ;;  %s1802_s4 = inlined_call_operand.vmem [shape: f32[2,2,256], index: 4, kind: output, shape index: {1}]  }
   0x1   :  { %s1424_s17 = smov 0   ;;  %s1426_s18 = smov 0  }
   0x2   :  { %s1428_s19 = smov 0   ;;  %s1430_s20 = smov 0  }
   0x3   :  { %s1432_s21 = smov 0  }
   0x4 LB: > { %s24_s22 = sadd.s32 1, %s1383_s19  ;;  %s27_s23 = sadd.s32 1, %s1387_s20  ;;  %s1391_s21 = sphi %s1432_s21, %s15_s21   ;;  %s1387_s20 = sphi %s1430_s20, %s1808_s20   ;;  %s1383_s19 = sphi %s1428_s19, %s1807_s19   ;;  %s1379_s18 = sphi %s1426_s18, %s1806_s18   ;;  %s1375_s17 = sphi %s1424_s17, %s1805_s17   ;;  %s1371_s16 = sphi %s1422_s16, %s1804_s16   ;;  %s1367_s15 = sphi %s1420_s15, %s1803_s15  }
   0x5   : > { %p25_p0 = scmp.ge.s32.totalorder %s24_s22, 2  ;;  %p43_p1 = scmp.ne.s32.totalorder %s1371_s16, %s1367_s15 }
   0x6   : > { %p44_p2 = scmp.eq.s32.totalorder %s1391_s21, 0  ;;  %s36_s27 = sadd.s32 1, %s1371_s16 }
   0x7   : > { %s1810_s22 = smov (%p25_p0, %s24_s22), 0  ;;  %s1812_s23 = smov (!%p25_p0, %s27_s23), %s1387_s20 }
   0x8   : > { %p45_p3 = por %p44_p2, %p43_p1  ;;  %p29_p4 = scmp.ge.s32.totalorder %s1812_s23, 2 }
   0x9   : > { %s32_s24 = ssub.s32 %s1383_s19, %s1810_s22  ;;  %p1073_p6 = scmp.ge.s32.totalorder %s1391_s21, 4 }
   0xa   : > { %s1814_s23 = smov (%p29_p4, %s1812_s23), 0 }
   0xb   : > { %s31_s25 = ssub.s32 %s1387_s20, %s1814_s23  ;;  %169 = sbr.rel (%p1073_p6) target bundleno = 26 (0x1a), region = 24 }
   0xc   : > { %s33_s26 = sor.u32 %s32_s24, %s31_s25 }
   0xd   : > { %p34_p5 = scmp.eq.s32.totalorder %s33_s26, 0 }
   0xf   : > { %s1471_s28 = scalar_select %p34_p5, %s1371_s16, %s36_s27  }
  0x12   : > { %172 = sbr.rel (!%p45_p3) target bundleno = 26 (0x1a), region = 28  ;;  %s174_s29 = sand.u32 (%p45_p3), 1, %s1371_s16  }
  0x13   : > { %s1092_s30 = sshll.u32 (%p45_p3), %s1387_s20, 3  ;;  %s1074_s5 = sshll.u32 (%p45_p3), %s174_s29, 5 }
  0x14   : > { %s179_s6 = sadd.s32 (%p45_p3), %s1383_s19, %s1092_s30  ;;  %s176_s11 = scalar_lea.vmem (%p45_p3), [#allocation3], %s1074_s5 }
  0x15   : > { %s1077_s7 = sshll.u32 (%p45_p3), %s179_s6, 3 }
  0x16   : > { %s181_s10 = scalar_lea.vmem (%p45_p3), %s1798_s0, %s1077_s7 }
  0x17   : > { %v215_v0 = vld [vmem:[%s181_s10] sm:$0xff] (%p45_p3)  ;;  %v217_v1 = vld [vmem:[%s181_s10 + $0x10] sm:$0xff] (%p45_p3) }
  0x18   : > { %v219_v2 = vld [vmem:[%s181_s10 + $0x20] sm:$0xff] (%p45_p3)  ;;  %216 = vst [vmem:[%s176_s11] sm:$0xff] (%p45_p3), %v215_v0  ;;  %218 = vst [vmem:[%s176_s11 + $0x8] sm:$0xff] (%p45_p3), %v217_v1  ;;  %v221_v3 = vld [vmem:[%s181_s10 + $0x30] sm:$0xff] (%p45_p3) }
  0x19   : > { %220 = vst [vmem:[%s176_s11 + $0x10] sm:$0xff] %v219_v2  ;;  %222 = vst [vmem:[%s176_s11 + $0x18] sm:$0xff] %v221_v3 }
  0x1a PF: > { %p1078_p7 = scmp.ge.s32.totalorder %s1391_s21, 1  ;;  %p227_p8 = scmp.lt.s32.totalorder %s1391_s21, 5 }
  0x1c   : > { %p228_p9 = pnand %p1078_p7, %p227_p8 }
  0x1d   : > { %s234_s12 = sand.u32 (!%p228_p9), 1, %s1367_s15   ;;  %s1080_s13 = sshll.u32 (!%p228_p9), %s1379_s18, 4 }
  0x1e   : > { %231 = sbr.rel (%p228_p9) target bundleno = 600 (0x258), region = 66  ;;  %s1079_s14 = sshll.u32 (!%p228_p9), %s234_s12, 5 }
  0x1f   : > { %p267_p10 = scmp.lt.s32.totalorder (!%p228_p9), %s1080_s13, 31  ;;  %p273_p11 = scmp.lt.s32.totalorder (!%p228_p9), %s1379_s18, 1 }
  0x20   : > { %s1496_s8 = scalar_lea.vmem (!%p228_p9), [#allocation3], %s1079_s14  ;;  %p1085_p12 = scmp.ne.s32.totalorder (!%p228_p9), %s1375_s17, 0 }
  0x25   : > { %s1816_s13 = smov (!%p267_p10, %s1080_s13), 31  ;;  %281 = sbr.rel (%p1085_p12) target bundleno = 48 (0x30), region = 74 }
  0x26   : > { %s274_s24 = scalar_select %p273_p11, %s1379_s18, 1 }
  0x27   : > { %s1093_s25 = sshll.u32 %s1816_s13, 4  ;;  %v1393_v4 = vmov (!%p1085_p12), 0.0  }
  0x28   : > { %s1489_s29 = scalar_lea.vmem %s1801_s3, %s1093_s25  ;;  %s1094_s30 = sshll.u32 %s274_s24, 2  ;;  %282 = vst [vmem:[#allocation2] sm:$0xff] (!%p1085_p12), %v1393_v4  ;;  %283 = vst [vmem:[#allocation2 + $0x8] sm:$0xff] (!%p1085_p12), %v1393_v4 }
  0x29   : > { %s1494_s7 = scalar_lea.vmem %s1802_s4, %s1094_s30  ;;  %284 = vst [vmem:[#allocation2 + $0x10] sm:$0xff] (!%p1085_p12), %v1393_v4  ;;  %285 = vst [vmem:[#allocation2 + $0x18] sm:$0xff] (!%p1085_p12), %v1393_v4 }
  0x2a   : > { %286 = vst [vmem:[#allocation2 + $0x20] sm:$0xff] (!%p1085_p12), %v1393_v4  ;;  %287 = vst [vmem:[#allocation2 + $0x28] sm:$0xff] (!%p1085_p12), %v1393_v4 }
  0x2b   : > { %288 = vst [vmem:[#allocation2 + $0x30] sm:$0xff] (!%p1085_p12), %v1393_v4  ;;  %289 = vst [vmem:[#allocation2 + $0x38] sm:$0xff] (!%p1085_p12), %v1393_v4 }
  0x2c   : > { %290 = vst [vmem:[#allocation2 + $0x40] sm:$0xff] %v1393_v4  ;;  %291 = vst [vmem:[#allocation2 + $0x48] sm:$0xff] %v1393_v4 }
  0x2d   : > { %292 = vst [vmem:[#allocation2 + $0x50] sm:$0xff] %v1393_v4  ;;  %293 = vst [vmem:[#allocation2 + $0x58] sm:$0xff] %v1393_v4 }
  0x2e   : > { %294 = vst [vmem:[#allocation2 + $0x60] sm:$0xff] %v1393_v4  ;;  %295 = vst [vmem:[#allocation2 + $0x68] sm:$0xff] %v1393_v4 }
  0x2f   : > { %296 = vst [vmem:[#allocation2 + $0x70] sm:$0xff] %v1393_v4  ;;  %297 = vst [vmem:[#allocation2 + $0x78] sm:$0xff] %v1393_v4 }
  0x30 PF: > { %s1086_s15 = sshll.u32 %s1375_s17, 7  ;;  %v1501_v5 = vld [vmem:[%s1496_s8] sm:$0xff]  ;;  %v1504_v6 = vld [vmem:[%s1496_s8 + $0x10] sm:$0xff]  ;;  %v333_v39 = vld [vmem:[%s1496_s8 + $0x8] sm:$0xff]  ;;  %p1087_p13 = scmp.ne.s32.totalorder %s1375_s17, 1 }
  0x31   : > { %s1509_s11 = scalar_lea.vmem %s1799_s1, %s1086_s15  ;;  %v336_v7 = vunpack.c.0.s8 %v1501_v5  ;;  %v344_v8 = vunpack.c.0.s8 %v1504_v6  ;;  %v337_v35 = vunpack.c.1.s8 %v1501_v5  ;;  %v345_v36 = vunpack.c.1.s8 %v1504_v6  ;;  %v335_v40 = vld [vmem:[%s1496_s8 + $0x18] sm:$0xff]  ;;  %s1088_s5 = sshll.u32 (!%p1087_p13), %s1379_s18, 7 }
  0x32   : > { %v300_v9 = vld [vmem:[%s1509_s11] sm:$0xff]  ;;  %v301_v10 = vld [vmem:[%s1509_s11 + $0x8] sm:$0xff]  ;;  %v302_v11 = vld [vmem:[%s1509_s11 + $0x10] sm:$0xff]  ;;  %v338_v37 = vunpack.c.2.s8 %v1501_v5  ;;  %v346_v38 = vunpack.c.2.s8 %v1504_v6  ;;  %v339_v43 = vunpack.c.3.s8 %v1501_v5  ;;  %v347_v44 = vunpack.c.3.s8 %v1504_v6 }
  0x33   : > { %v1183_v12 = vpack.c.bf16 %v301_v10, %v300_v9  ;;  %v303_v13 = vld [vmem:[%s1509_s11 + $0x18] sm:$0xff]  ;;  %v304_v15 = vld [vmem:[%s1509_s11 + $0x20] sm:$0xff]  ;;  %v305_v16 = vld [vmem:[%s1509_s11 + $0x28] sm:$0xff]  ;;  %v352_v17 = vcvt.s32.f32 %v336_v7  ;;  %v360_v18 = vcvt.s32.f32 %v344_v8  ;;  %v353_v41 = vcvt.s32.f32 %v337_v35 }
  0x34   : > { %v1187_v14 = vpack.c.bf16 %v303_v13, %v302_v11  ;;  %v1191_v19 = vpack.c.bf16 %v305_v16, %v304_v15  ;;  %v306_v20 = vld [vmem:[%s1509_s11 + $0x30] sm:$0xff]  ;;  %v307_v21 = vld [vmem:[%s1509_s11 + $0x38] sm:$0xff]  ;;  %v308_v23 = vld [vmem:[%s1509_s11 + $0x40] sm:$0xff]  ;;  %v361_v42 = vcvt.s32.f32 %v345_v36  ;;  %v354_v45 = vcvt.s32.f32 %v338_v37 }
  0x35   : > { %1184 = vmatprep.subr.bf16.mxu0 %v1183_v12  ;;  %1247 = vmatprep.subr.bf16.mxu1 %v1183_v12  ;;  %v1195_v22 = vpack.c.bf16 %v307_v21, %v306_v20  ;;  %v309_v24 = vld [vmem:[%s1509_s11 + $0x48] sm:$0xff]  ;;  %v310_v26 = vld [vmem:[%s1509_s11 + $0x50] sm:$0xff]  ;;  %v311_v27 = vld [vmem:[%s1509_s11 + $0x58] sm:$0xff]  ;;  %v362_v46 = vcvt.s32.f32 %v346_v38  ;;  %v340_v47 = vunpack.c.0.s8 %v333_v39  ;;  %v348_v48 = vunpack.c.0.s8 %v335_v40 }
  0x36   : > { %1186 = vmatpush3.bf16.msra.mxu0 %v1183_v12  ;;  %1255 = vmatpush3.bf16.msra.mxu1 %v1183_v12  ;;  %v1199_v25 = vpack.c.bf16 %v309_v24, %v308_v23  ;;  %v1203_v28 = vpack.c.bf16 %v311_v27, %v310_v26  ;;  %v312_v29 = vld [vmem:[%s1509_s11 + $0x60] sm:$0xff]  ;;  %v313_v30 = vld [vmem:[%s1509_s11 + $0x68] sm:$0xff]  ;;  %v314_v32 = vld [vmem:[%s1509_s11 + $0x70] sm:$0xff]  ;;  %v355_v49 = vcvt.s32.f32 %v339_v43  ;;  %v363_v50 = vcvt.s32.f32 %v347_v44 }
  0x37   : > { %1188 = vmatprep.subr.bf16.mxu0 %v1187_v14  ;;  %1248 = vmatprep.subr.bf16.mxu1 %v1187_v14  ;;  %v1207_v31 = vpack.c.bf16 %v313_v30, %v312_v29  ;;  %v315_v33 = vld [vmem:[%s1509_s11 + $0x78] sm:$0xff]  ;;  %v341_v51 = vunpack.c.1.s8 %v333_v39  ;;  %v349_v52 = vunpack.c.1.s8 %v335_v40  ;;  %v356_v53 = vcvt.s32.f32 %v340_v47  ;;  %v317_v1 = vld [vmem:[#allocation2 + $0x8] sm:$0xff]  ;;  %v316_v3 = vld [vmem:[#allocation2] sm:$0xff]  ;;  %s1634_s11 = scalar_lea.vmem (!%p1087_p13), %s1799_s1, %s1088_s5 }
  0x38   : > { %1159 = vmatprep.mubr.f32.mxu0 %v352_v17  ;;  %1171 = vmatprep.mubr.f32.mxu1 %v360_v18  ;;  %v1211_v34 = vpack.c.bf16 %v315_v33, %v314_v32  ;;  %v364_v54 = vcvt.s32.f32 %v348_v48  ;;  %v342_v55 = vunpack.c.2.s8 %v333_v39  ;;  %v350_v56 = vunpack.c.2.s8 %v335_v40  ;;  %v325_v2 = vld [vmem:[#allocation2 + $0x48] sm:$0xff]  ;;  %v324_v4 = vld [vmem:[#allocation2 + $0x40] sm:$0xff]  ;;  %v319_v13 = vld [vmem:[#allocation2 + $0x18] sm:$0xff] }
  0x39   : > { %v357_v57 = vcvt.s32.f32 %v341_v51  ;;  %v365_v58 = vcvt.s32.f32 %v349_v52  ;;  %v343_v59 = vunpack.c.3.s8 %v333_v39  ;;  %v351_v60 = vunpack.c.3.s8 %v335_v40  ;;  %v318_v15 = vld [vmem:[#allocation2 + $0x10] sm:$0xff]  ;;  %v329_v26 = vld [vmem:[#allocation2 + $0x68] sm:$0xff]  ;;  %v320_v27 = vld [vmem:[#allocation2 + $0x20] sm:$0xff] }
  0x3a   : > { %1190 = vmatpush3.bf16.msra.mxu0 %v1187_v14  ;;  %1256 = vmatpush3.bf16.msra.mxu1 %v1187_v14  ;;  %v358_v61 = vcvt.s32.f32 %v342_v55  ;;  %v366_v62 = vcvt.s32.f32 %v350_v56  ;;  %v327_v14 = vld [vmem:[#allocation2 + $0x58] sm:$0xff]  ;;  %v326_v16 = vld [vmem:[#allocation2 + $0x50] sm:$0xff]  ;;  %v599_v51 = vld [vmem:[%s1800_s2] sm:$0xff] (!%p1087_p13)  ;;  %v1394_v56 = vmov (!%p1087_p13), 0.0   ;;  %vm940_vm0 = vcmask (!%p1087_p13), 1040384  }
  0x3b   : > { %1192 = vmatprep.subr.bf16.mxu0 %v1191_v19  ;;  %1249 = vmatprep.subr.bf16.mxu1 %v1191_v19  ;;  %v359_v63 = vcvt.s32.f32 %v343_v59  ;;  %v367_v0 = vcvt.s32.f32 %v351_v60  ;;  %v323_v37 = vld [vmem:[#allocation2 + $0x38] sm:$0xff]  ;;  %v322_v39 = vld [vmem:[#allocation2 + $0x30] sm:$0xff]  ;;  %v603_v59 = vld [vmem:[%s1800_s2 + $0x20] sm:$0xff] (!%p1087_p13) }
  0x3c   : > { %v331_v38 = vld [vmem:[#allocation2 + $0x78] sm:$0xff]  ;;  %v330_v40 = vld [vmem:[#allocation2 + $0x70] sm:$0xff] }
  0x3d   : > { %v606_v55 = vld [vmem:[%s1800_s2 + $0x38] sm:$0xff] (!%p1087_p13)  ;;  %v605_v60 = vld [vmem:[%s1800_s2 + $0x30] sm:$0xff] (!%p1087_p13) }
  0x3e   : > { %1194 = vmatpush3.bf16.msra.mxu0 %v1191_v19  ;;  %1257 = vmatpush3.bf16.msra.mxu1 %v1191_v19 }
  0x3f   : > { %1196 = vmatprep.subr.bf16.mxu0 %v1195_v22  ;;  %1250 = vmatprep.subr.bf16.mxu1 %v1195_v22 }
  0x42   : > { %1198 = vmatpush3.bf16.msra.mxu0 %v1195_v22  ;;  %1258 = vmatpush3.bf16.msra.mxu1 %v1195_v22 }
  0x43   : > { %1200 = vmatprep.subr.bf16.mxu0 %v1199_v25  ;;  %1251 = vmatprep.subr.bf16.mxu1 %v1199_v25 }
  0x46   : > { %1202 = vmatpush3.bf16.msra.mxu0 %v1199_v25  ;;  %1259 = vmatpush3.bf16.msra.mxu1 %v1199_v25  ;;  %v321_v25 = vld [vmem:[#allocation2 + $0x28] sm:$0xff] }
  0x47   : > { %1204 = vmatprep.subr.bf16.mxu0 %v1203_v28  ;;  %1252 = vmatprep.subr.bf16.mxu1 %v1203_v28 }
  0x4a   : > { %1206 = vmatpush3.bf16.msra.mxu0 %v1203_v28  ;;  %1260 = vmatpush3.bf16.msra.mxu1 %v1203_v28  ;;  %v328_v28 = vld [vmem:[#allocation2 + $0x60] sm:$0xff] }
  0x4b   : > { %1208 = vmatprep.subr.bf16.mxu0 %v1207_v31  ;;  %1253 = vmatprep.subr.bf16.mxu1 %v1207_v31 }
  0x4e   : > { %1210 = vmatpush3.bf16.msra.mxu0 %v1207_v31  ;;  %1261 = vmatpush3.bf16.msra.mxu1 %v1207_v31 }
  0x4f   : > { %1212 = vmatprep.subr.bf16.mxu0 %v1211_v34  ;;  %1254 = vmatprep.subr.bf16.mxu1 %v1211_v34 }
  0x52   : > { %1214 = vmatpush3.bf16.msra.mxu0 %v1211_v34  ;;  %1262 = vmatpush3.bf16.msra.mxu1 %v1211_v34 }
  0x55   : > { %1160 = vmatmul.mubr.f32.vlgmr.msra.gmra.mrb[0].mxu0 %v353_v41  ;;  %1172 = vmatmul.mubr.f32.vlgmr.msra.gmra.mrb[0].mxu1 %v361_v42 }
  0x56   : > { %1162 = vmatprep.mubr.f32.mxu0 %v354_v45  ;;  %1174 = vmatprep.mubr.f32.mxu1 %v362_v46 }
  0x59   : > { %1163 = vmatmul.mubr.f32.gmra.mrb[2].mxu0 %v355_v49  ;;  %1175 = vmatmul.mubr.f32.gmra.mrb[2].mxu1 %v363_v50  ;;  %v600_v49 = vld [vmem:[%s1800_s2 + $0x8] sm:$0xff] (!%p1087_p13)  ;;  %v602_v50 = vld [vmem:[%s1800_s2 + $0x18] sm:$0xff] (!%p1087_p13) }
  0x5a   : > { %1165 = vmatprep.mubr.f32.mxu0 %v356_v53  ;;  %1177 = vmatprep.mubr.f32.mxu1 %v364_v54  ;;  %v1215_v52 = vpack.c.bf16 (!%p1087_p13), %v602_v50, %v600_v49  ;;  %v601_v53 = vld [vmem:[%s1800_s2 + $0x10] sm:$0xff] (!%p1087_p13)  ;;  %v604_v54 = vld [vmem:[%s1800_s2 + $0x28] sm:$0xff] (!%p1087_p13) }
  0x5c   : > { %1216 = vmatprep.subr.bf16.mxu0 (!%p1087_p13), %v1215_v52  ;;  %1263 = vmatprep.subr.bf16.mxu1 (!%p1087_p13), %v1215_v52 }
  0x5d   : > { %1166 = vmatmul.mubr.f32.gmra.mrb[4].mxu0 %v357_v57  ;;  %1178 = vmatmul.mubr.f32.gmra.mrb[4].mxu1 %v365_v58  ;;  %v1217_v57 = vpack.c.bf16 (!%p1087_p13), %v601_v53, %v599_v51  ;;  %v1219_v58 = vpack.c.bf16 (!%p1087_p13), %v606_v55, %v604_v54  ;;  %v554_v51 = vld [vmem:[%s1634_s11 + $0x18] sm:$0xff] (!%p1087_p13) }
  0x5e   : > { %1168 = vmatprep.mubr.f32.mxu0 %v358_v61  ;;  %1180 = vmatprep.mubr.f32.mxu1 %v366_v62  ;;  %v608_v61 = vld [vmem:[%s1800_s2 + $0x48] sm:$0xff] (!%p1087_p13)  ;;  %v610_v62 = vld [vmem:[%s1800_s2 + $0x58] sm:$0xff] (!%p1087_p13) }
  0x5f   : > { %1218 = vmatpush1.bf16.msra.mxu0 (!%p1087_p13), %v1217_v57  ;;  %1271 = vmatpush1.bf16.msra.mxu1 (!%p1087_p13), %v1217_v57  ;;  %v562_v54 = vld [vmem:[%s1634_s11 + $0x58] sm:$0xff] (!%p1087_p13) }
  0x60   : > { %1220 = vmatprep.subr.bf16.mxu0 (!%p1087_p13), %v1219_v58  ;;  %1264 = vmatprep.subr.bf16.mxu1 (!%p1087_p13), %v1219_v58  ;;  %v555_v58 = vld [vmem:[%s1634_s11 + $0x20] sm:$0xff] (!%p1087_p13) }
  0x61   : > { %1169 = vmatmul.mubr.f32.gmra.mrb[6].mxu0 %v359_v63  ;;  %1181 = vmatmul.mubr.f32.gmra.mrb[6].mxu1 %v367_v0  ;;  %v1221_v63 = vpack.c.bf16 (!%p1087_p13), %v605_v60, %v603_v59  ;;  %v1223_v0 = vpack.c.bf16 (!%p1087_p13), %v610_v62, %v608_v61  ;;  %v563_v61 = vld [vmem:[%s1634_s11 + $0x60] sm:$0xff] (!%p1087_p13) }
  0x62   : > { %695 = vmatprep.mubr.f32.mxu0 (!%p1087_p13), %v1394_v56  ;;  %743 = vmatprep.mubr.f32.mxu1 (!%p1087_p13), %v1394_v56 }
  0x63   : > { %1222 = vmatpush1.bf16.msra.mxu0 (!%p1087_p13), %v1221_v63  ;;  %1272 = vmatpush1.bf16.msra.mxu1 (!%p1087_p13), %v1221_v63 }
  0x64   : > { %1224 = vmatprep.subr.bf16.mxu0 (!%p1087_p13), %v1223_v0  ;;  %1265 = vmatprep.subr.bf16.mxu1 (!%p1087_p13), %v1223_v0  ;;  %v556_v0 = vld [vmem:[%s1634_s11 + $0x28] sm:$0xff] (!%p1087_p13) }
 0x128   : > { %v1161_v5 = vpop.f32.mrb[0].mxu0  ;;  %v1173_v6 = vpop.f32.mrb[0].mxu1 }
 0x129   : > { %v514_v7 = vadd.f32 %v1161_v5, %v317_v1  ;;  %v522_v8 = vadd.f32 %v1173_v6, %v325_v2  ;;  %v434_v9 = vpop.f32.mrb[1].mxu0  ;;  %v474_v10 = vpop.f32.mrb[1].mxu1  ;;  %v607_v1 = vld [vmem:[%s1800_s2 + $0x40] sm:$0xff] (!%p1087_p13)  ;;  %v609_v2 = vld [vmem:[%s1800_s2 + $0x50] sm:$0xff] (!%p1087_p13) }
 0x12a   : > { %v513_v11 = vadd.f32 %v434_v9, %v316_v3  ;;  %v521_v12 = vadd.f32 %v474_v10, %v324_v4  ;;  %v612_v3 = vld [vmem:[%s1800_s2 + $0x68] sm:$0xff] (!%p1087_p13)  ;;  %v614_v4 = vld [vmem:[%s1800_s2 + $0x78] sm:$0xff] (!%p1087_p13)  ;;  %v1225_v5 = vpack.c.bf16 (!%p1087_p13), %v609_v2, %v607_v1 }
 0x12b   : > { %530 = vst [vmem:[#allocation2 + $0x8] sm:$0xff] %v514_v7  ;;  %538 = vst [vmem:[#allocation2 + $0x48] sm:$0xff] %v522_v8  ;;  %v1227_v6 = vpack.c.bf16 (!%p1087_p13), %v614_v4, %v612_v3  ;;  %v611_v7 = vld [vmem:[%s1800_s2 + $0x60] sm:$0xff] (!%p1087_p13)  ;;  %v613_v8 = vld [vmem:[%s1800_s2 + $0x70] sm:$0xff] (!%p1087_p13) }
 0x12c   : > { %529 = vst [vmem:[#allocation2] sm:$0xff] %v513_v11  ;;  %537 = vst [vmem:[#allocation2 + $0x40] sm:$0xff] %v521_v12  ;;  %v1164_v17 = vpop.f32.mrb[2].mxu0  ;;  %v1176_v18 = vpop.f32.mrb[2].mxu1  ;;  %v616_v9 = vld [vmem:[%s1800_s2 + $0x88] sm:$0xff] (!%p1087_p13)  ;;  %v618_v10 = vld [vmem:[%s1800_s2 + $0x98] sm:$0xff] (!%p1087_p13)  ;;  %1226 = vmatpush1.bf16.msra.mxu0 (!%p1087_p13), %v1225_v5  ;;  %v1229_v11 = vpack.c.bf16 (!%p1087_p13), %v613_v8, %v611_v7  ;;  %1273 = vmatpush1.bf16.msra.mxu1 (!%p1087_p13), %v1225_v5 }
 0x12d   : > { %v516_v19 = vadd.f32 %v1164_v17, %v319_v13  ;;  %v524_v20 = vadd.f32 %v1176_v18, %v327_v14  ;;  %v444_v21 = vpop.f32.mrb[3].mxu0  ;;  %v484_v22 = vpop.f32.mrb[3].mxu1  ;;  %1228 = vmatprep.subr.bf16.mxu0 (!%p1087_p13), %v1227_v6  ;;  %v1231_v12 = vpack.c.bf16 (!%p1087_p13), %v618_v10, %v616_v9  ;;  %v615_v13 = vld [vmem:[%s1800_s2 + $0x80] sm:$0xff] (!%p1087_p13)  ;;  %v617_v14 = vld [vmem:[%s1800_s2 + $0x90] sm:$0xff] (!%p1087_p13)  ;;  %1266 = vmatprep.subr.bf16.mxu1 (!%p1087_p13), %v1227_v6  ;;  %v564_v3 = vld [vmem:[%s1634_s11 + $0x68] sm:$0xff] (!%p1087_p13) }
 0x12e   : > { %v515_v23 = vadd.f32 %v444_v21, %v318_v15  ;;  %v523_v24 = vadd.f32 %v484_v22, %v326_v16  ;;  %v620_v15 = vld [vmem:[%s1800_s2 + $0xa8] sm:$0xff] (!%p1087_p13)  ;;  %v622_v16 = vld [vmem:[%s1800_s2 + $0xb8] sm:$0xff] (!%p1087_p13)  ;;  %v1233_v17 = vpack.c.bf16 (!%p1087_p13), %v617_v14, %v615_v13  ;;  %v557_v6 = vld [vmem:[%s1634_s11 + $0x30] sm:$0xff] (!%p1087_p13) }
 0x12f   : > { %532 = vst [vmem:[#allocation2 + $0x18] sm:$0xff] %v516_v19  ;;  %540 = vst [vmem:[#allocation2 + $0x58] sm:$0xff] %v524_v20  ;;  %v1235_v18 = vpack.c.bf16 (!%p1087_p13), %v622_v16, %v620_v15  ;;  %v619_v19 = vld [vmem:[%s1800_s2 + $0xa0] sm:$0xff] (!%p1087_p13)  ;;  %v621_v20 = vld [vmem:[%s1800_s2 + $0xb0] sm:$0xff] (!%p1087_p13) }
 0x130   : > { %531 = vst [vmem:[#allocation2 + $0x10] sm:$0xff] %v515_v23  ;;  %539 = vst [vmem:[#allocation2 + $0x50] sm:$0xff] %v523_v24  ;;  %v1167_v29 = vpop.f32.mrb[4].mxu0  ;;  %v1179_v30 = vpop.f32.mrb[4].mxu1  ;;  %1230 = vmatpush1.bf16.msra.mxu0 (!%p1087_p13), %v1229_v11  ;;  %1274 = vmatpush1.bf16.msra.mxu1 (!%p1087_p13), %v1229_v11  ;;  %v624_v21 = vld [vmem:[%s1800_s2 + $0xc8] sm:$0xff] (!%p1087_p13)  ;;  %v626_v22 = vld [vmem:[%s1800_s2 + $0xd8] sm:$0xff] (!%p1087_p13)  ;;  %v1237_v23 = vpack.c.bf16 (!%p1087_p13), %v621_v20, %v619_v19 }
 0x131   : > { %v518_v31 = vadd.f32 %v1167_v29, %v321_v25  ;;  %v526_v32 = vadd.f32 %v1179_v30, %v329_v26  ;;  %v454_v33 = vpop.f32.mrb[5].mxu0  ;;  %v494_v34 = vpop.f32.mrb[5].mxu1  ;;  %1232 = vmatprep.subr.bf16.mxu0 (!%p1087_p13), %v1231_v12  ;;  %1267 = vmatprep.subr.bf16.mxu1 (!%p1087_p13), %v1231_v12  ;;  %v1239_v24 = vpack.c.bf16 (!%p1087_p13), %v626_v22, %v624_v21  ;;  %v623_v25 = vld [vmem:[%s1800_s2 + $0xc0] sm:$0xff] (!%p1087_p13)  ;;  %v625_v26 = vld [vmem:[%s1800_s2 + $0xd0] sm:$0xff] (!%p1087_p13)  ;;  %v558_v12 = vld [vmem:[%s1634_s11 + $0x38] sm:$0xff] (!%p1087_p13) }
 0x132   : > { %v517_v35 = vadd.f32 %v454_v33, %v320_v27  ;;  %v525_v36 = vadd.f32 %v494_v34, %v328_v28  ;;  %548 = sbr.rel (%p1087_p13) target bundleno = 600 (0x258), region = 78  ;;  %v628_v27 = vld [vmem:[%s1800_s2 + $0xe8] sm:$0xff] (!%p1087_p13)  ;;  %v630_v28 = vld [vmem:[%s1800_s2 + $0xf8] sm:$0xff] (!%p1087_p13)  ;;  %v1241_v29 = vpack.c.bf16 (!%p1087_p13), %v625_v26, %v623_v25  ;;  %v551_v33 = vld [vmem:[%s1634_s11] sm:$0xff] (!%p1087_p13) }
 0x133   : > { %534 = vst [vmem:[#allocation2 + $0x28] sm:$0xff] %v518_v31  ;;  %542 = vst [vmem:[#allocation2 + $0x68] sm:$0xff] %v526_v32  ;;  %v1243_v30 = vpack.c.bf16 (!%p1087_p13), %v630_v28, %v628_v27  ;;  %v627_v31 = vld [vmem:[%s1800_s2 + $0xe0] sm:$0xff] (!%p1087_p13)  ;;  %v629_v32 = vld [vmem:[%s1800_s2 + $0xf0] sm:$0xff] (!%p1087_p13) }
 0x134   : > { %533 = vst [vmem:[#allocation2 + $0x20] sm:$0xff] %v517_v35  ;;  %541 = vst [vmem:[#allocation2 + $0x60] sm:$0xff] %v525_v36  ;;  %v1170_v41 = vpop.f32.mrb[6].mxu0  ;;  %v1182_v42 = vpop.f32.mrb[6].mxu1  ;;  %1234 = vmatpush1.bf16.msra.mxu0 (!%p1087_p13), %v1233_v17  ;;  %1275 = vmatpush1.bf16.msra.mxu1 (!%p1087_p13), %v1233_v17  ;;  %v1245_v34 = vpack.c.bf16 (!%p1087_p13), %v629_v32, %v627_v31  ;;  %v567_v35 = vld [vmem:[#allocation2] sm:$0xff] (!%p1087_p13)  ;;  %v565_v9 = vld [vmem:[%s1634_s11 + $0x70] sm:$0xff] (!%p1087_p13) }
 0x135   : > { %v520_v43 = vadd.f32 %v1170_v41, %v323_v37  ;;  %v528_v44 = vadd.f32 %v1182_v42, %v331_v38  ;;  %v464_v45 = vpop.f32.mrb[7].mxu0  ;;  %v504_v46 = vpop.f32.mrb[7].mxu1  ;;  %1236 = vmatprep.subr.bf16.mxu0 (!%p1087_p13), %v1235_v18  ;;  %1268 = vmatprep.subr.bf16.mxu1 (!%p1087_p13), %v1235_v18  ;;  %v559_v36 = vld [vmem:[%s1634_s11 + $0x40] sm:$0xff] (!%p1087_p13)  ;;  %v583_v38 = vadd.f32 (!%p1087_p13), %v567_v35, %v551_v33  ;;  %v568_v41 = vld [vmem:[#allocation2 + $0x8] sm:$0xff] (!%p1087_p13)  ;;  %v566_v15 = vld [vmem:[%s1634_s11 + $0x78] sm:$0xff] (!%p1087_p13) }
 0x136   : > { %v519_v47 = vadd.f32 %v464_v45, %v322_v39  ;;  %v527_v48 = vadd.f32 %v504_v46, %v330_v40  ;;  %v575_v37 = vld [vmem:[#allocation2 + $0x40] sm:$0xff] (!%p1087_p13)  ;;  %v552_v39 = vld [vmem:[%s1634_s11 + $0x8] sm:$0xff] (!%p1087_p13)  ;;  %v553_v45 = vld [vmem:[%s1634_s11 + $0x10] sm:$0xff] (!%p1087_p13) }
 0x137   : > { %536 = vst [vmem:[#allocation2 + $0x38] sm:$0xff] %v520_v43  ;;  %544 = vst [vmem:[#allocation2 + $0x78] sm:$0xff] %v528_v44  ;;  %v591_v40 = vadd.f32 (!%p1087_p13), %v575_v37, %v559_v36  ;;  %v560_v42 = vld [vmem:[%s1634_s11 + $0x48] sm:$0xff] (!%p1087_p13)  ;;  %v584_v44 = vadd.f32 (!%p1087_p13), %v568_v41, %v552_v39  ;;  %v577_v49 = vld [vmem:[#allocation2 + $0x50] sm:$0xff] (!%p1087_p13) }
 0x138   : > { %535 = vst [vmem:[#allocation2 + $0x30] sm:$0xff] %v519_v47  ;;  %543 = vst [vmem:[#allocation2 + $0x70] sm:$0xff] %v527_v48  ;;  %1238 = vmatpush1.bf16.msra.mxu0 (!%p1087_p13), %v1237_v23  ;;  %1276 = vmatpush1.bf16.msra.mxu1 (!%p1087_p13), %v1237_v23  ;;  %v576_v43 = vld [vmem:[#allocation2 + $0x48] sm:$0xff] (!%p1087_p13)  ;;  %v569_v47 = vld [vmem:[#allocation2 + $0x10] sm:$0xff] (!%p1087_p13) }
 0x139   : > { %1240 = vmatprep.subr.bf16.mxu0 %v1239_v24  ;;  %1269 = vmatprep.subr.bf16.mxu1 %v1239_v24  ;;  %v592_v46 = vadd.f32 %v576_v43, %v560_v42  ;;  %v561_v48 = vld [vmem:[%s1634_s11 + $0x50] sm:$0xff]  ;;  %v585_v50 = vadd.f32 %v569_v47, %v553_v45  ;;  %v570_v53 = vld [vmem:[#allocation2 + $0x18] sm:$0xff] }
 0x13a   : > { %v593_v52 = vadd.f32 %v577_v49, %v561_v48  ;;  %v578_v55 = vld [vmem:[#allocation2 + $0x58] sm:$0xff]  ;;  %v586_v57 = vadd.f32 %v570_v53, %v554_v51  ;;  %v572_v2 = vld [vmem:[#allocation2 + $0x28] sm:$0xff] }
 0x13b   : > { %v594_v59 = vadd.f32 %v578_v55, %v562_v54  ;;  %v571_v60 = vld [vmem:[#allocation2 + $0x20] sm:$0xff]  ;;  %v580_v4 = vld [vmem:[#allocation2 + $0x68] sm:$0xff]  ;;  %v588_v5 = vadd.f32 %v572_v2, %v556_v0 }
 0x13c   : > { %1242 = vmatpush1.bf16.msra.mxu0 %v1241_v29  ;;  %1277 = vmatpush1.bf16.msra.mxu1 %v1241_v29  ;;  %v579_v62 = vld [vmem:[#allocation2 + $0x60] sm:$0xff]  ;;  %v587_v63 = vadd.f32 %v571_v60, %v555_v58  ;;  %v596_v7 = vadd.f32 %v580_v4, %v564_v3 }
 0x13d   : > { %1244 = vmatprep.subr.bf16.mxu0 %v1243_v30  ;;  %1270 = vmatprep.subr.bf16.mxu1 %v1243_v30  ;;  %v595_v1 = vadd.f32 %v579_v62, %v563_v61 }
 0x13e   : > { %v574_v14 = vld [vmem:[#allocation2 + $0x38] sm:$0xff] }
 0x13f   : > { %v573_v8 = vld [vmem:[#allocation2 + $0x30] sm:$0xff]  ;;  %v582_v16 = vld [vmem:[#allocation2 + $0x78] sm:$0xff]  ;;  %v590_v17 = vadd.f32 %v574_v14, %v558_v12 }
 0x140   : > { %1246 = vmatpush1.bf16.msra.mxu0 %v1245_v34  ;;  %1278 = vmatpush1.bf16.msra.mxu1 %v1245_v34  ;;  %v581_v10 = vld [vmem:[#allocation2 + $0x70] sm:$0xff]  ;;  %v589_v11 = vadd.f32 %v573_v8, %v557_v6  ;;  %v598_v18 = vadd.f32 %v582_v16, %v566_v15 }
 0x141   : > { %v597_v13 = vadd.f32 %v581_v10, %v565_v9 }
 0x143   : > { %696 = vmatmul.mubr.f32.vlgmr.msra.gmra.mrb[0].mxu0 %v583_v38  ;;  %744 = vmatmul.mubr.f32.vlgmr.msra.gmra.mrb[0].mxu1 %v591_v40 }
 0x144   : > { %701 = vmatprep.mubr.f32.mxu0 %v1394_v56  ;;  %749 = vmatprep.mubr.f32.mxu1 %v1394_v56 }
 0x147   : > { %702 = vmatmul.mubr.f32.gmra.mrb[2].mxu0 %v584_v44  ;;  %750 = vmatmul.mubr.f32.gmra.mrb[2].mxu1 %v592_v46 }
 0x148   : > { %707 = vmatprep.mubr.f32.mxu0 %v1394_v56  ;;  %755 = vmatprep.mubr.f32.mxu1 %v1394_v56 }
 0x14b   : > { %708 = vmatmul.mubr.f32.gmra.mrb[4].mxu0 %v585_v50  ;;  %756 = vmatmul.mubr.f32.gmra.mrb[4].mxu1 %v593_v52 }
 0x14c   : > { %713 = vmatprep.mubr.f32.mxu0 %v1394_v56  ;;  %761 = vmatprep.mubr.f32.mxu1 %v1394_v56 }
 0x14f   : > { %714 = vmatmul.mubr.f32.gmra.mrb[6].mxu0 %v586_v57  ;;  %762 = vmatmul.mubr.f32.gmra.mrb[6].mxu1 %v594_v59 }
 0x150   : > { %719 = vmatprep.mubr.f32.mxu0 %v1394_v56  ;;  %767 = vmatprep.mubr.f32.mxu1 %v1394_v56 }
 0x153   : > { %720 = vmatmul.mubr.f32.gmra.mrb[8].mxu0 %v587_v63  ;;  %768 = vmatmul.mubr.f32.gmra.mrb[8].mxu1 %v595_v1 }
 0x154   : > { %725 = vmatprep.mubr.f32.mxu0 %v1394_v56  ;;  %773 = vmatprep.mubr.f32.mxu1 %v1394_v56 }
 0x157   : > { %726 = vmatmul.mubr.f32.gmra.mrb[10].mxu0 %v588_v5  ;;  %774 = vmatmul.mubr.f32.gmra.mrb[10].mxu1 %v596_v7 }
 0x158   : > { %731 = vmatprep.mubr.f32.mxu0 %v1394_v56  ;;  %779 = vmatprep.mubr.f32.mxu1 %v1394_v56 }
 0x15b   : > { %732 = vmatmul.mubr.f32.gmra.mrb[12].mxu0 %v589_v11  ;;  %780 = vmatmul.mubr.f32.gmra.mrb[12].mxu1 %v597_v13 }
 0x15c   : > { %737 = vmatprep.mubr.f32.mxu0 %v1394_v56  ;;  %785 = vmatprep.mubr.f32.mxu1 %v1394_v56 }
 0x15f   : > { %738 = vmatmul.mubr.f32.gmra.mrb[14].mxu0 %v590_v17  ;;  %786 = vmatmul.mubr.f32.gmra.mrb[14].mxu1 %v598_v18 }
 0x216   : > { %v697_v19 = vpop.f32.mrb[0].mxu0  ;;  %v1672_v20 = vpop.f32.mrb[0].mxu1 }
 0x217   : > { %792 = vst [vmem:[%s1489_s29] sm:$0xff] %v697_v19  ;;  %v699_v21 = vpop.f32.mrb[1].mxu0  ;;  %808 = vst [vmem:[%s1489_s29 + $0x80] sm:$0xff] %v1672_v20  ;;  %v1677_v22 = vpop.f32.mrb[1].mxu1  ;;  %v866_v56 = vmul.f32 %v697_v19, %v697_v19 }
 0x218   : > { %793 = vst [vmem:[%s1489_s29 + $0x8] sm:$0xff] %v699_v21  ;;  %809 = vst [vmem:[%s1489_s29 + $0x88] sm:$0xff] %v1677_v22  ;;  %v867_v29 = vmul.f32 %v699_v21, %v699_v21 }
 0x21a   : > { %v703_v23 = vpop.f32.mrb[2].mxu0  ;;  %v1682_v24 = vpop.f32.mrb[2].mxu1 }
 0x21b   : > { %794 = vst [vmem:[%s1489_s29 + $0x10] sm:$0xff] %v703_v23  ;;  %v824_v25 = vadd.f32 %v703_v23, %v697_v19  ;;  %v868_v26 = vmul.f32 %v703_v23, %v703_v23  ;;  %v705_v27 = vpop.f32.mrb[3].mxu0  ;;  %810 = vst [vmem:[%s1489_s29 + $0x90] sm:$0xff] %v1682_v24  ;;  %v1687_v28 = vpop.f32.mrb[3].mxu1 }
 0x21c   : > { %795 = vst [vmem:[%s1489_s29 + $0x18] sm:$0xff] %v705_v27  ;;  %v845_v30 = vadd.f32 %v705_v27, %v699_v21  ;;  %v869_v31 = vmul.f32 %v705_v27, %v705_v27  ;;  %811 = vst [vmem:[%s1489_s29 + $0x98] sm:$0xff] %v1687_v28 }
 0x21d   : > { %v898_v32 = vadd.f32 %v868_v26, %v866_v56 }
 0x21e   : > { %v919_v33 = vadd.f32 %v869_v31, %v867_v29  ;;  %v709_v34 = vpop.f32.mrb[4].mxu0  ;;  %v1692_v35 = vpop.f32.mrb[4].mxu1 }
 0x21f   : > { %796 = vst [vmem:[%s1489_s29 + $0x20] sm:$0xff] %v709_v34  ;;  %v825_v36 = vadd.f32 %v824_v25, %v709_v34  ;;  %v870_v37 = vmul.f32 %v709_v34, %v709_v34  ;;  %v711_v38 = vpop.f32.mrb[5].mxu0  ;;  %812 = vst [vmem:[%s1489_s29 + $0xa0] sm:$0xff] %v1692_v35  ;;  %v1697_v39 = vpop.f32.mrb[5].mxu1 }
 0x220   : > { %797 = vst [vmem:[%s1489_s29 + $0x28] sm:$0xff] %v711_v38  ;;  %v846_v40 = vadd.f32 %v845_v30, %v711_v38  ;;  %v871_v41 = vmul.f32 %v711_v38, %v711_v38  ;;  %813 = vst [vmem:[%s1489_s29 + $0xa8] sm:$0xff] %v1697_v39 }
 0x221   : > { %v899_v42 = vadd.f32 %v898_v32, %v870_v37  ;;  %v882_v32 = vmul.f32 %v1672_v20, %v1672_v20 }
 0x222   : > { %v920_v43 = vadd.f32 %v919_v33, %v871_v41  ;;  %v715_v44 = vpop.f32.mrb[6].mxu0  ;;  %v1702_v45 = vpop.f32.mrb[6].mxu1 }
 0x223   : > { %798 = vst [vmem:[%s1489_s29 + $0x30] sm:$0xff] %v715_v44  ;;  %v826_v46 = vadd.f32 %v825_v36, %v715_v44  ;;  %v872_v47 = vmul.f32 %v715_v44, %v715_v44  ;;  %v717_v48 = vpop.f32.mrb[7].mxu0  ;;  %814 = vst [vmem:[%s1489_s29 + $0xb0] sm:$0xff] %v1702_v45  ;;  %v1707_v49 = vpop.f32.mrb[7].mxu1  ;;  %v883_v36 = vmul.f32 %v1677_v22, %v1677_v22 }
 0x224   : > { %799 = vst [vmem:[%s1489_s29 + $0x38] sm:$0xff] %v717_v48  ;;  %v847_v50 = vadd.f32 %v846_v40, %v717_v48  ;;  %v873_v51 = vmul.f32 %v717_v48, %v717_v48  ;;  %815 = vst [vmem:[%s1489_s29 + $0xb8] sm:$0xff] %v1707_v49  ;;  %v884_v40 = vmul.f32 %v1682_v24, %v1682_v24 }
 0x225   : > { %v900_v52 = vadd.f32 %v899_v42, %v872_v47 }
 0x226   : > { %v921_v53 = vadd.f32 %v920_v43, %v873_v51  ;;  %v721_v54 = vpop.f32.mrb[8].mxu0  ;;  %v1712_v55 = vpop.f32.mrb[8].mxu1  ;;  %v885_v43 = vmul.f32 %v1687_v28, %v1687_v28 }
 0x227   : > { %800 = vst [vmem:[%s1489_s29 + $0x40] sm:$0xff] %v721_v54  ;;  %v827_v57 = vadd.f32 %v826_v46, %v721_v54  ;;  %v874_v58 = vmul.f32 %v721_v54, %v721_v54  ;;  %v723_v59 = vpop.f32.mrb[9].mxu0  ;;  %816 = vst [vmem:[%s1489_s29 + $0xc0] sm:$0xff] %v1712_v55  ;;  %v1717_v60 = vpop.f32.mrb[9].mxu1 }
 0x228   : > { %801 = vst [vmem:[%s1489_s29 + $0x48] sm:$0xff] %v723_v59  ;;  %v848_v61 = vadd.f32 %v847_v50, %v723_v59  ;;  %v875_v62 = vmul.f32 %v723_v59, %v723_v59  ;;  %817 = vst [vmem:[%s1489_s29 + $0xc8] sm:$0xff] %v1717_v60 }
 0x229   : > { %v901_v63 = vadd.f32 %v900_v52, %v874_v58  ;;  %v890_v58 = vmul.f32 %v1712_v55, %v1712_v55 }
 0x22a   : > { %v922_v0 = vadd.f32 %v921_v53, %v875_v62  ;;  %v727_v1 = vpop.f32.mrb[10].mxu0  ;;  %v1722_v2 = vpop.f32.mrb[10].mxu1 }
 0x22b   : > { %802 = vst [vmem:[%s1489_s29 + $0x50] sm:$0xff] %v727_v1  ;;  %v828_v3 = vadd.f32 %v827_v57, %v727_v1  ;;  %v876_v4 = vmul.f32 %v727_v1, %v727_v1  ;;  %v729_v5 = vpop.f32.mrb[11].mxu0  ;;  %818 = vst [vmem:[%s1489_s29 + $0xd0] sm:$0xff] %v1722_v2  ;;  %v1727_v6 = vpop.f32.mrb[11].mxu1 }
 0x22c   : > { %803 = vst [vmem:[%s1489_s29 + $0x58] sm:$0xff] %v729_v5  ;;  %v849_v7 = vadd.f32 %v848_v61, %v729_v5  ;;  %v877_v8 = vmul.f32 %v729_v5, %v729_v5  ;;  %819 = vst [vmem:[%s1489_s29 + $0xd8] sm:$0xff] %v1727_v6  ;;  %v891_v61 = vmul.f32 %v1717_v60, %v1717_v60 }
 0x22d   : > { %v902_v9 = vadd.f32 %v901_v63, %v876_v4 }
 0x22e   : > { %v923_v10 = vadd.f32 %v922_v0, %v877_v8  ;;  %v733_v11 = vpop.f32.mrb[12].mxu0  ;;  %v781_v12 = vpop.f32.mrb[12].mxu1  ;;  %v892_v0 = vmul.f32 %v1722_v2, %v1722_v2 }
 0x22f   : > { %804 = vst [vmem:[%s1489_s29 + $0x60] sm:$0xff] %v733_v11  ;;  %v829_v13 = vadd.f32 %v828_v3, %v733_v11  ;;  %v878_v14 = vmul.f32 %v733_v11, %v733_v11  ;;  %v735_v15 = vpop.f32.mrb[13].mxu0  ;;  %820 = vst [vmem:[%s1489_s29 + $0xe0] sm:$0xff] %v781_v12  ;;  %v783_v16 = vpop.f32.mrb[13].mxu1  ;;  %v893_v3 = vmul.f32 %v1727_v6, %v1727_v6 }
 0x230   : > { %805 = vst [vmem:[%s1489_s29 + $0x68] sm:$0xff] %v735_v15  ;;  %v850_v17 = vadd.f32 %v849_v7, %v735_v15  ;;  %v879_v18 = vmul.f32 %v735_v15, %v735_v15  ;;  %821 = vst [vmem:[%s1489_s29 + $0xe8] sm:$0xff] %v783_v16  ;;  %v894_v5 = vmul.f32 %v781_v12, %v781_v12 }
 0x231   : > { %v903_v19 = vadd.f32 %v902_v9, %v878_v14 }
 0x232   : > { %v924_v21 = vadd.f32 %v923_v10, %v879_v18  ;;  %v739_v23 = vpop.f32.mrb[14].mxu0  ;;  %v787_v56 = vpop.f32.mrb[14].mxu1 }
 0x233   : > { %806 = vst [vmem:[%s1489_s29 + $0x70] sm:$0xff] %v739_v23  ;;  %v830_v25 = vadd.f32 %v829_v13, %v739_v23  ;;  %v880_v26 = vmul.f32 %v739_v23, %v739_v23  ;;  %v741_v27 = vpop.f32.mrb[15].mxu0  ;;  %822 = vst [vmem:[%s1489_s29 + $0xf0] sm:$0xff] %v787_v56  ;;  %v789_v29 = vpop.f32.mrb[15].mxu1  ;;  %v896_v7 = vmul.f32 %v787_v56, %v787_v56 }
 0x234   : > { %807 = vst [vmem:[%s1489_s29 + $0x78] sm:$0xff] %v741_v27  ;;  %v851_v30 = vadd.f32 %v850_v17, %v741_v27  ;;  %v881_v31 = vmul.f32 %v741_v27, %v741_v27  ;;  %823 = vst [vmem:[%s1489_s29 + $0xf8] sm:$0xff] %v789_v29  ;;  %v897_v10 = vmul.f32 %v789_v29, %v789_v29 }
 0x235   : > { %v831_v33 = vadd.f32 %v830_v25, %v1672_v20  ;;  %v904_v34 = vadd.f32 %v903_v19, %v880_v26  ;;  %v886_v20 = vmul.f32 %v1692_v35, %v1692_v35 }
 0x236   : > { %v852_v37 = vadd.f32 %v851_v30, %v1677_v22  ;;  %v925_v38 = vadd.f32 %v924_v21, %v881_v31  ;;  %v887_v22 = vmul.f32 %v1697_v39, %v1697_v39 }
 0x237   : > { %v832_v41 = vadd.f32 %v831_v33, %v1682_v24  ;;  %v905_v42 = vadd.f32 %v904_v34, %v882_v32  ;;  %v888_v24 = vmul.f32 %v1702_v45, %v1702_v45 }
 0x238   : > { %v853_v44 = vadd.f32 %v852_v37, %v1687_v28  ;;  %v926_v46 = vadd.f32 %v925_v38, %v883_v36  ;;  %v889_v28 = vmul.f32 %v1707_v49, %v1707_v49 }
 0x239   : > { %v906_v47 = vadd.f32 %v905_v42, %v884_v40  ;;  %v833_v48 = vadd.f32 %v832_v41, %v1692_v35 }
 0x23a   : > { %v927_v50 = vadd.f32 %v926_v46, %v885_v43  ;;  %v854_v51 = vadd.f32 %v853_v44, %v1697_v39 }
 0x23b   : > { %v834_v52 = vadd.f32 %v833_v48, %v1702_v45  ;;  %v907_v53 = vadd.f32 %v906_v47, %v886_v20 }
 0x23c   : > { %v855_v54 = vadd.f32 %v854_v51, %v1707_v49  ;;  %v928_v57 = vadd.f32 %v927_v50, %v887_v22 }
 0x23d   : > { %v835_v35 = vadd.f32 %v834_v52, %v1712_v55  ;;  %v908_v59 = vadd.f32 %v907_v53, %v888_v24 }
 0x23e   : > { %v856_v39 = vadd.f32 %v855_v54, %v1717_v60  ;;  %v929_v62 = vadd.f32 %v928_v57, %v889_v28  ;;  %v895_v60 = vmul.f32 %v783_v16, %v783_v16 }
 0x23f   : > { %v909_v45 = vadd.f32 %v908_v59, %v890_v58  ;;  %v836_v63 = vadd.f32 %v835_v35, %v1722_v2 }
 0x240   : > { %v930_v49 = vadd.f32 %v929_v62, %v891_v61  ;;  %v857_v1 = vadd.f32 %v856_v39, %v1727_v6 }
 0x241   : > { %v910_v55 = vadd.f32 %v909_v45, %v892_v0  ;;  %v837_v4 = vadd.f32 %v836_v63, %v781_v12 }
 0x242   : > { %v931_v8 = vadd.f32 %v930_v49, %v893_v3  ;;  %v858_v9 = vadd.f32 %v857_v1, %v783_v16 }
 0x243   : > { %v911_v11 = vadd.f32 %v910_v55, %v894_v5  ;;  %v838_v13 = vadd.f32 %v837_v4, %v787_v56 }
 0x244   : > { %v932_v14 = vadd.f32 %v931_v8, %v895_v60  ;;  %v859_v15 = vadd.f32 %v858_v9, %v789_v29 }
 0x245   : > { %v839_v17 = vrot.slane %v838_v13, 4  ;;  %v912_v2 = vadd.f32 %v911_v11, %v896_v7 }
 0x246   : > { %v860_v18 = vrot.slane %v859_v15, 4  ;;  %v933_v19 = vadd.f32 %v932_v14, %v897_v10 }
 0x247   : > { %v840_v21 = vadd.f32 %v839_v17, %v838_v13  ;;  %v913_v23 = vrot.slane %v912_v2, 4 }
 0x248   : > { %v861_v25 = vadd.f32 %v860_v18, %v859_v15  ;;  %v934_v6 = vrot.slane %v933_v19, 4 }
 0x249   : > { %v841_v26 = vrot.slane %v840_v21, 2  ;;  %v914_v27 = vadd.f32 %v913_v23, %v912_v2 }
 0x24a   : > { %v862_v12 = vrot.slane %v861_v25, 2  ;;  %v935_v30 = vadd.f32 %v934_v6, %v933_v19 }
 0x24b   : > { %v842_v31 = vadd.f32 %v841_v26, %v840_v21  ;;  %v915_v32 = vrot.slane %v914_v27, 2 }
 0x24c   : > { %v863_v16 = vadd.f32 %v862_v12, %v861_v25  ;;  %v936_v33 = vrot.slane %v935_v30, 2 }
 0x24d   : > { %v843_v56 = vrot.slane %v842_v31, 1  ;;  %v916_v34 = vadd.f32 %v915_v32, %v914_v27 }
 0x24e   : > { %v864_v29 = vrot.slane %v863_v16, 1  ;;  %v937_v36 = vadd.f32 %v936_v33, %v935_v30 }
 0x24f   : > { %v917_v37 = vrot.slane %v916_v34, 1  ;;  %v844_v40 = vadd.f32 %v843_v56, %v842_v31 }
 0x250   : > { %v938_v38 = vrot.slane %v937_v36, 1  ;;  %v865_v42 = vadd.f32 %v864_v29, %v863_v16 }
 0x251   : > { %v918_v41 = vadd.f32 %v917_v37, %v916_v34 }
 0x252   : > { %v939_v43 = vadd.f32 %v938_v38, %v937_v36 }
 0x253   : > { %v941_v44 = vsel %vm940_vm0, %v844_v40, %v918_v41 }
 0x254   : > { %v942_v46 = vsel %vm940_vm0, %v865_v42, %v939_v43 }
 0x255   : > { %v945_v20 = vcombine.low %v941_v44, %v942_v46 }
 0x257   : > { %1089 = vst.sshfl [vmem:[%s1494_s7] sm:$0x33 pattern:$0x76325410] %v945_v20 }
 0x258 PF: > { %s15_s21 = sadd.s32 1, %s1391_s21   ;;  %s1803_s15 = smov %s1371_s16 }
 0x259   : > { %p12_p0 = scmp.ge.s32.totalorder %s15_s21, 6   ;;  %s1804_s16 = smov %s1471_s28 }
 0x25a   : > { %s1805_s17 = smov %s1383_s19  ;;  %s1806_s18 = smov %s1387_s20 }
 0x25b   : > { %s1807_s19 = smov %s1810_s22  ;;  %s1808_s20 = smov %s1814_s23 }
 0x25c   :  { %14 = sbr.rel (!%p12_p0) target bundleno = 4 (0x4), region = 127 }

// kernel: resgcn_forward.8
= control target key start
LH: loop header
LB: loop body
LE: loop exit
PB: predicated region body
PF: predicated region fallthrough
CT: control target
= control target key end

     0   :  { %s953_s18 = smov 0   ;;  %s1396_s0 = inlined_call_operand.vmem [shape: f32[256,256], index: 0, kind: input, shape index: {}]   ;;  %s1397_s1 = inlined_call_operand.vmem [shape: f32[2,256], index: 1, kind: input, shape index: {}]   ;;  %s1398_s2 = inlined_call_operand.vmem [shape: f32[256,128], index: 2, kind: input, shape index: {}]   ;;  %s1399_s3 = inlined_call_operand.vmem [shape: f32[128,256], index: 3, kind: input, shape index: {}]   ;;  %s1400_s4 = inlined_call_operand.vmem [shape: f32[1,256], index: 4, kind: input, shape index: {}]   ;;  %s1401_s5 = inlined_call_operand.vmem [shape: f32[256,256], index: 5, kind: output, shape index: {}]  }
   0x1 LB: > { %s840_s19 = sadd.s32 4294967295, %s920_s18   ;;  %p844_p0 = scmp.ge.s32.totalorder %s920_s18, 1  ;;  %s920_s18 = sphi %s953_s18, %s15_s18  }
   0x2   : > { %p200_p1 = scmp.lt.s32.totalorder %s920_s18, 3 }
   0x4   : > { %p201_p2 = pnand %p844_p0, %p200_p1 }
   0x5   : > { %v502_v0 = vld [vmem:[%s1399_s3 + $0x8] sm:$0xff] (!%p201_p2)  ;;  %v504_v1 = vld [vmem:[%s1399_s3 + $0x18] sm:$0xff] (!%p201_p2)  ;;  %v501_v2 = vld [vmem:[%s1399_s3] sm:$0xff] (!%p201_p2)  ;;  %v922_v7 = vmov (!%p201_p2), 0.0   ;;  %s845_s16 = sshll.u32 (!%p201_p2), %s840_s19, 4 }
   0x6   : > { %204 = sbr.rel (%p201_p2) target bundleno = 286 (0x11e), region = 40  ;;  %v857_v3 = vpack.c.bf16 (!%p201_p2), %v504_v1, %v502_v0  ;;  %v503_v4 = vld [vmem:[%s1399_s3 + $0x10] sm:$0xff] (!%p201_p2)  ;;  %v506_v5 = vld [vmem:[%s1399_s3 + $0x28] sm:$0xff] (!%p201_p2)  ;;  %v508_v6 = vld [vmem:[%s1399_s3 + $0x38] sm:$0xff] (!%p201_p2)  ;;  %609 = vmatprep.mubr.f32.mxu0 (!%p201_p2), %v922_v7  ;;  %657 = vmatprep.mubr.f32.mxu1 (!%p201_p2), %v922_v7  ;;  %p236_p3 = scmp.lt.s32.totalorder (!%p201_p2), %s845_s16, 31  ;;  %v289_v1 = vlaneseq (!%p201_p2) }
   0x7   : > { %v859_v8 = vpack.c.bf16 (!%p201_p2), %v503_v4, %v501_v2  ;;  %v861_v9 = vpack.c.bf16 (!%p201_p2), %v508_v6, %v506_v5  ;;  %v505_v10 = vld [vmem:[%s1399_s3 + $0x20] sm:$0xff] (!%p201_p2)  ;;  %v507_v11 = vld [vmem:[%s1399_s3 + $0x30] sm:$0xff] (!%p201_p2)  ;;  %v510_v12 = vld [vmem:[%s1399_s3 + $0x48] sm:$0xff] (!%p201_p2) }
   0x8   : > { %858 = vmatprep.subr.bf16.mxu0 (!%p201_p2), %v857_v3  ;;  %889 = vmatprep.subr.bf16.mxu1 (!%p201_p2), %v857_v3  ;;  %v512_v13 = vld [vmem:[%s1399_s3 + $0x58] sm:$0xff] (!%p201_p2)  ;;  %v863_v14 = vpack.c.bf16 (!%p201_p2), %v507_v11, %v505_v10  ;;  %v509_v16 = vld [vmem:[%s1399_s3 + $0x40] sm:$0xff] (!%p201_p2)  ;;  %v511_v17 = vld [vmem:[%s1399_s3 + $0x50] sm:$0xff] (!%p201_p2)  ;;  %v290_v2 = vshrl.u32 (!%p201_p2), %v289_v1, 7 }
   0x9   : > { %860 = vmatpush1.bf16.msra.mxu0 (!%p201_p2), %v859_v8  ;;  %897 = vmatpush1.bf16.msra.mxu1 (!%p201_p2), %v859_v8  ;;  %v865_v15 = vpack.c.bf16 (!%p201_p2), %v512_v13, %v510_v12  ;;  %v514_v18 = vld [vmem:[%s1399_s3 + $0x68] sm:$0xff] (!%p201_p2)  ;;  %v516_v19 = vld [vmem:[%s1399_s3 + $0x78] sm:$0xff] (!%p201_p2)  ;;  %v867_v20 = vpack.c.bf16 (!%p201_p2), %v511_v17, %v509_v16  ;;  %v513_v22 = vld [vmem:[%s1399_s3 + $0x60] sm:$0xff] (!%p201_p2) }
   0xa   : > { %862 = vmatprep.subr.bf16.mxu0 (!%p201_p2), %v861_v9  ;;  %890 = vmatprep.subr.bf16.mxu1 (!%p201_p2), %v861_v9  ;;  %v869_v21 = vpack.c.bf16 (!%p201_p2), %v516_v19, %v514_v18  ;;  %v515_v23 = vld [vmem:[%s1399_s3 + $0x70] sm:$0xff] (!%p201_p2)  ;;  %v518_v24 = vld [vmem:[%s1399_s3 + $0x88] sm:$0xff] (!%p201_p2)  ;;  %v520_v25 = vld [vmem:[%s1399_s3 + $0x98] sm:$0xff] (!%p201_p2)  ;;  %v291_v3 = vsub.s32 (!%p201_p2), 0, %v290_v2  ;;  %v295_v5 = vsub.s32 (!%p201_p2), 2, %v290_v2  ;;  %v341_v8 = vsub.s32 (!%p201_p2), 1, %v290_v2 }
   0xb   : > { %v871_v26 = vpack.c.bf16 (!%p201_p2), %v515_v23, %v513_v22  ;;  %v873_v27 = vpack.c.bf16 (!%p201_p2), %v520_v25, %v518_v24  ;;  %v517_v28 = vld [vmem:[%s1399_s3 + $0x80] sm:$0xff] (!%p201_p2)  ;;  %v519_v29 = vld [vmem:[%s1399_s3 + $0x90] sm:$0xff] (!%p201_p2)  ;;  %v522_v30 = vld [vmem:[%s1399_s3 + $0xa8] sm:$0xff] (!%p201_p2)  ;;  %v345_v10 = vsub.s32 (!%p201_p2), 3, %v290_v2 }
   0xc   : > { %v524_v31 = vld [vmem:[%s1399_s3 + $0xb8] sm:$0xff] (!%p201_p2)  ;;  %v875_v32 = vpack.c.bf16 (!%p201_p2), %v519_v29, %v517_v28  ;;  %v521_v34 = vld [vmem:[%s1399_s3 + $0xa0] sm:$0xff] (!%p201_p2)  ;;  %v523_v35 = vld [vmem:[%s1399_s3 + $0xb0] sm:$0xff] (!%p201_p2) }
   0xd   : > { %864 = vmatpush1.bf16.msra.mxu0 %v863_v14  ;;  %898 = vmatpush1.bf16.msra.mxu1 %v863_v14  ;;  %v877_v33 = vpack.c.bf16 %v524_v31, %v522_v30  ;;  %v526_v36 = vld [vmem:[%s1399_s3 + $0xc8] sm:$0xff]  ;;  %v528_v37 = vld [vmem:[%s1399_s3 + $0xd8] sm:$0xff]  ;;  %v879_v38 = vpack.c.bf16 %v523_v35, %v521_v34  ;;  %v525_v40 = vld [vmem:[%s1399_s3 + $0xc0] sm:$0xff]  ;;  %s1403_s16 = smov (!%p236_p3, %s845_s16), 31 }
   0xe   : > { %866 = vmatprep.subr.bf16.mxu0 %v865_v15  ;;  %891 = vmatprep.subr.bf16.mxu1 %v865_v15  ;;  %v881_v39 = vpack.c.bf16 %v528_v37, %v526_v36  ;;  %v527_v41 = vld [vmem:[%s1399_s3 + $0xd0] sm:$0xff]  ;;  %v530_v42 = vld [vmem:[%s1399_s3 + $0xe8] sm:$0xff]  ;;  %v532_v43 = vld [vmem:[%s1399_s3 + $0xf8] sm:$0xff]  ;;  %s849_s13 = sshll.u32 %s1403_s16, 3  ;;  %s855_s22 = sshll.u32 %s1403_s16, 4 }
   0xf   : > { %v883_v44 = vpack.c.bf16 %v527_v41, %v525_v40  ;;  %v885_v45 = vpack.c.bf16 %v532_v43, %v530_v42  ;;  %v529_v46 = vld [vmem:[%s1399_s3 + $0xe0] sm:$0xff]  ;;  %v531_v47 = vld [vmem:[%s1399_s3 + $0xf0] sm:$0xff]  ;;  %s1067_s17 = scalar_lea.vmem %s1398_s2, %s849_s13  ;;  %s1108_s25 = scalar_lea.vmem %s1396_s0, %s855_s22 }
  0x10   : > { %v887_v48 = vpack.c.bf16 %v531_v47, %v529_v46  ;;  %v485_v49 = vld [vmem:[%s1067_s17] sm:$0xff]  ;;  %v486_v51 = vld [vmem:[%s1067_s17 + $0x8] sm:$0xff]  ;;  %v487_v53 = vld [vmem:[%s1067_s17 + $0x10] sm:$0xff]  ;;  %s1247_s29 = scalar_lea.vmem %s1401_s5, %s855_s22 }
  0x11   : > { %868 = vmatpush1.bf16.msra.mxu0 %v867_v20  ;;  %899 = vmatpush1.bf16.msra.mxu1 %v867_v20  ;;  %v493_v50 = vld [vmem:[%s1067_s17 + $0x40] sm:$0xff]  ;;  %v494_v52 = vld [vmem:[%s1067_s17 + $0x48] sm:$0xff]  ;;  %v495_v54 = vld [vmem:[%s1067_s17 + $0x50] sm:$0xff] }
  0x12   : > { %870 = vmatprep.subr.bf16.mxu0 %v869_v21  ;;  %892 = vmatprep.subr.bf16.mxu1 %v869_v21  ;;  %v488_v55 = vld [vmem:[%s1067_s17 + $0x18] sm:$0xff]  ;;  %v489_v57 = vld [vmem:[%s1067_s17 + $0x20] sm:$0xff]  ;;  %v490_v59 = vld [vmem:[%s1067_s17 + $0x28] sm:$0xff] }
  0x13   : > { %v496_v56 = vld [vmem:[%s1067_s17 + $0x58] sm:$0xff]  ;;  %v497_v58 = vld [vmem:[%s1067_s17 + $0x60] sm:$0xff]  ;;  %v498_v60 = vld [vmem:[%s1067_s17 + $0x68] sm:$0xff] }
  0x14   : > { %v491_v61 = vld [vmem:[%s1067_s17 + $0x30] sm:$0xff]  ;;  %v492_v63 = vld [vmem:[%s1067_s17 + $0x38] sm:$0xff]  ;;  %v255_v4 = vld [vmem:[%s1397_s1] sm:$0xf] }
  0x15   : > { %872 = vmatpush1.bf16.msra.mxu0 %v871_v26  ;;  %900 = vmatpush1.bf16.msra.mxu1 %v871_v26  ;;  %v499_v62 = vld [vmem:[%s1067_s17 + $0x70] sm:$0xff]  ;;  %v500_v0 = vld [vmem:[%s1067_s17 + $0x78] sm:$0xff]  ;;  %v292_v6 = vrot.slane %v255_v4, %v291_v3  ;;  %v296_v9 = vrot.slane %v255_v4, %v295_v5  ;;  %v342_v11 = vrot.slane %v255_v4, %v341_v8  ;;  %v256_v12 = vld [vmem:[%s1108_s25] sm:$0xff] }
  0x16   : > { %874 = vmatprep.subr.bf16.mxu0 %v873_v27  ;;  %893 = vmatprep.subr.bf16.mxu1 %v873_v27  ;;  %v272_v13 = vld [vmem:[%s1108_s25 + $0x80] sm:$0xff]  ;;  %v346_v15 = vrot.slane %v255_v4, %v345_v10  ;;  %v257_v16 = vld [vmem:[%s1108_s25 + $0x8] sm:$0xff]  ;;  %v258_v18 = vld [vmem:[%s1108_s25 + $0x10] sm:$0xff] }
  0x17   : > { %v1114_v14 = vrot.slane %v296_v9, %v291_v3  ;;  %v273_v17 = vld [vmem:[%s1108_s25 + $0x88] sm:$0xff]  ;;  %v1120_v20 = vrot.slane %v342_v11, %v341_v8  ;;  %v274_v24 = vld [vmem:[%s1108_s25 + $0x90] sm:$0xff]  ;;  %v259_v27 = vld [vmem:[%s1108_s25 + $0x18] sm:$0xff] }
  0x18   : > { %v1124_v23 = vrot.slane %v346_v15, %v341_v8  ;;  %v533_v29 = vld [vmem:[%s1400_s4] sm:$0x3]  ;;  %v279_v4 = vld [vmem:[%s1108_s25 + $0xb8] sm:$0xff] }
  0x19   : > { %876 = vmatpush1.bf16.msra.mxu0 %v875_v32  ;;  %901 = vmatpush1.bf16.msra.mxu1 %v875_v32  ;;  %v308_v22 = vmul.f32 %v1114_v14, %v257_v16  ;;  %v324_v25 = vmul.f32 %v1114_v14, %v273_v17  ;;  %v275_v32 = vld [vmem:[%s1108_s25 + $0x98] sm:$0xff]  ;;  %v310_v36 = vmul.f32 %v1114_v14, %v259_v27  ;;  %v260_v37 = vld [vmem:[%s1108_s25 + $0x20] sm:$0xff] }
  0x1a   : > { %878 = vmatprep.subr.bf16.mxu0 %v877_v33  ;;  %894 = vmatprep.subr.bf16.mxu1 %v877_v33  ;;  %v326_v40 = vmul.f32 %v1114_v14, %v275_v32  ;;  %v264_v5 = vld [vmem:[%s1108_s25 + $0x40] sm:$0xff]  ;;  %v330_v17 = vmul.f32 %v1114_v14, %v279_v4  ;;  %v266_v32 = vld [vmem:[%s1108_s25 + $0x50] sm:$0xff] }
  0x1b   : > { %v358_v33 = vadd.f32 %v1124_v23, %v308_v22  ;;  %v374_v34 = vadd.f32 %v1124_v23, %v324_v25  ;;  %v280_v10 = vld [vmem:[%s1108_s25 + $0xc0] sm:$0xff] }
  0x1d   : > { %880 = vmatpush1.bf16.msra.mxu0 %v879_v38  ;;  %902 = vmatpush1.bf16.msra.mxu1 %v879_v38  ;;  %v276_v38 = vld [vmem:[%s1108_s25 + $0xa0] sm:$0xff]  ;;  %vm390_vm2 = vcmp.ge.f32.partialorder %v358_v33, 0.0  ;;  %vm406_vm3 = vcmp.ge.f32.partialorder %v374_v34, 0.0 }
  0x1e   : > { %882 = vmatprep.subr.bf16.mxu0 %v881_v39  ;;  %895 = vmatprep.subr.bf16.mxu1 %v881_v39  ;;  %v1143_v39 = vrot.slane %v533_v29, %v291_v3 }
  0x21   : > { %884 = vmatpush1.bf16.msra.mxu0 %v883_v44  ;;  %903 = vmatpush1.bf16.msra.mxu1 %v883_v44  ;;  %v261_v44 = vld [vmem:[%s1108_s25 + $0x28] sm:$0xff] }
  0x22   : > { %886 = vmatprep.subr.bf16.mxu0 %v885_v45  ;;  %896 = vmatprep.subr.bf16.mxu1 %v885_v45  ;;  %v422_v45 = vmul.f32 0.01, %v358_v33 }
  0x25   : > { %888 = vmatpush1.bf16.msra.mxu0 %v887_v48  ;;  %904 = vmatpush1.bf16.msra.mxu1 %v887_v48  ;;  %v438_v48 = vmul.f32 0.01, %v374_v34 }
  0x28   : > { %610 = vmatmul.mubr.f32.vlgmr.msra.gmra.mrb[0].mxu0 %v485_v49  ;;  %658 = vmatmul.mubr.f32.vlgmr.msra.gmra.mrb[0].mxu1 %v493_v50  ;;  %v360_v50 = vadd.f32 %v1124_v23, %v310_v36 }
  0x29   : > { %615 = vmatprep.mubr.f32.mxu0 %v922_v7  ;;  %663 = vmatprep.mubr.f32.mxu1 %v922_v7 }
  0x2a   : > { %v424_v2 = vmul.f32 0.01, %v360_v50  ;;  %vm392_vm6 = vcmp.ge.f32.partialorder %v360_v50, 0.0 }
  0x2c   : > { %616 = vmatmul.mubr.f32.gmra.mrb[2].mxu0 %v486_v51  ;;  %664 = vmatmul.mubr.f32.gmra.mrb[2].mxu1 %v494_v52  ;;  %v376_v51 = vadd.f32 %v1124_v23, %v326_v40  ;;  %v312_v52 = vmul.f32 %v1114_v14, %v261_v44 }
  0x2d   : > { %621 = vmatprep.mubr.f32.mxu0 %v922_v7  ;;  %669 = vmatprep.mubr.f32.mxu1 %v922_v7 }
  0x2e   : > { %vm408_vm7 = vcmp.ge.f32.partialorder %v376_v51, 0.0 }
  0x30   : > { %622 = vmatmul.mubr.f32.gmra.mrb[4].mxu0 %v487_v53  ;;  %670 = vmatmul.mubr.f32.gmra.mrb[4].mxu1 %v495_v54  ;;  %v277_v53 = vld [vmem:[%s1108_s25 + $0xa8] sm:$0xff] }
  0x31   : > { %627 = vmatprep.mubr.f32.mxu0 %v922_v7  ;;  %675 = vmatprep.mubr.f32.mxu1 %v922_v7 }
  0x34   : > { %628 = vmatmul.mubr.f32.gmra.mrb[6].mxu0 %v488_v55  ;;  %676 = vmatmul.mubr.f32.gmra.mrb[6].mxu1 %v496_v56  ;;  %v1159_v56 = vrot.slane %v533_v29, %v341_v8  ;;  %v362_v8 = vadd.f32 %v1124_v23, %v312_v52 }
  0x35   : > { %633 = vmatprep.mubr.f32.mxu0 %v922_v7  ;;  %681 = vmatprep.mubr.f32.mxu1 %v922_v7 }
  0x36   : > { %vm394_vm10 = vcmp.ge.f32.partialorder %v362_v8, 0.0 }
  0x38   : > { %634 = vmatmul.mubr.f32.gmra.mrb[8].mxu0 %v489_v57  ;;  %682 = vmatmul.mubr.f32.gmra.mrb[8].mxu1 %v497_v58  ;;  %v262_v58 = vld [vmem:[%s1108_s25 + $0x30] sm:$0xff] }
  0x39   : > { %639 = vmatprep.mubr.f32.mxu0 %v922_v7  ;;  %687 = vmatprep.mubr.f32.mxu1 %v922_v7 }
  0x3c   : > { %640 = vmatmul.mubr.f32.gmra.mrb[10].mxu0 %v490_v59  ;;  %688 = vmatmul.mubr.f32.gmra.mrb[10].mxu1 %v498_v60  ;;  %v1162_v59 = vsel %vm390_vm2, %v358_v33, %v422_v45 }
  0x3d   : > { %645 = vmatprep.mubr.f32.mxu0 %v922_v7  ;;  %693 = vmatprep.mubr.f32.mxu1 %v922_v7 }
  0x40   : > { %646 = vmatmul.mubr.f32.gmra.mrb[12].mxu0 %v491_v61  ;;  %694 = vmatmul.mubr.f32.gmra.mrb[12].mxu1 %v499_v62  ;;  %v278_v62 = vld [vmem:[%s1108_s25 + $0xb0] sm:$0xff] }
  0x41   : > { %651 = vmatprep.mubr.f32.mxu0 %v922_v7  ;;  %699 = vmatprep.mubr.f32.mxu1 %v922_v7  ;;  %v1110_v7 = vrot.slane %v292_v6, %v291_v3  ;;  %v328_v3 = vmul.f32 %v1114_v14, %v277_v53  ;;  %v440_v6 = vmul.f32 0.01, %v376_v51 }
  0x43   : > { %v307_v19 = vmul.f32 %v1110_v7, %v256_v12  ;;  %v323_v21 = vmul.f32 %v1110_v7, %v272_v13  ;;  %v309_v26 = vmul.f32 %v1110_v7, %v258_v18  ;;  %v325_v31 = vmul.f32 %v1110_v7, %v274_v24 }
  0x44   : > { %652 = vmatmul.mubr.f32.gmra.mrb[14].mxu0 %v492_v63  ;;  %700 = vmatmul.mubr.f32.gmra.mrb[14].mxu1 %v500_v0  ;;  %v311_v46 = vmul.f32 %v1110_v7, %v260_v37  ;;  %v327_v47 = vmul.f32 %v1110_v7, %v276_v38  ;;  %v263_v63 = vld [vmem:[%s1108_s25 + $0x38] sm:$0xff]  ;;  %v1169_v0 = vsel %vm406_vm3, %v374_v34, %v438_v48 }
  0x45   : > { %v357_v28 = vadd.f32 %v1120_v20, %v307_v19  ;;  %v373_v30 = vadd.f32 %v1120_v20, %v323_v21  ;;  %v359_v35 = vadd.f32 %v1120_v20, %v309_v26  ;;  %v375_v43 = vadd.f32 %v1120_v20, %v325_v31  ;;  %v265_v19 = vld [vmem:[%s1108_s25 + $0x48] sm:$0xff] }
  0x46   : > { %v361_v60 = vadd.f32 %v1120_v20, %v311_v46  ;;  %v377_v61 = vadd.f32 %v1120_v20, %v327_v47  ;;  %v313_v9 = vmul.f32 %v1110_v7, %v262_v58  ;;  %v329_v12 = vmul.f32 %v1110_v7, %v278_v62 }
  0x47   : > { %vm389_vm0 = vcmp.ge.f32.partialorder %v357_v28, 0.0  ;;  %v421_v41 = vmul.f32 0.01, %v357_v28  ;;  %v437_v42 = vmul.f32 0.01, %v373_v30  ;;  %vm405_vm1 = vcmp.ge.f32.partialorder %v373_v30, 0.0 }
  0x48   : > { %v423_v49 = vmul.f32 0.01, %v359_v35  ;;  %vm391_vm4 = vcmp.ge.f32.partialorder %v359_v35, 0.0  ;;  %v439_v57 = vmul.f32 0.01, %v375_v43  ;;  %vm407_vm5 = vcmp.ge.f32.partialorder %v375_v43, 0.0 }
  0x49   : > { %v1155_v54 = vsel %vm389_vm0, %v357_v28, %v421_v41  ;;  %v1157_v55 = vsel %vm405_vm1, %v373_v30, %v437_v42  ;;  %v314_v13 = vmul.f32 %v1114_v14, %v263_v63  ;;  %v425_v15 = vmul.f32 0.01, %v361_v60  ;;  %v281_v28 = vld [vmem:[%s1108_s25 + $0xc8] sm:$0xff]  ;;  %v282_v41 = vld [vmem:[%s1108_s25 + $0xd0] sm:$0xff] }
  0x4a   : > { %v1172_v1 = vsel %vm391_vm4, %v359_v35, %v423_v49  ;;  %v1181_v11 = vsel %vm407_vm5, %v375_v43, %v439_v57  ;;  %v441_v16 = vmul.f32 0.01, %v377_v61  ;;  %v315_v18 = vmul.f32 %v1110_v7, %v264_v5 }
  0x4b   : > { %vm393_vm8 = vcmp.ge.f32.partialorder %v361_v60, 0.0  ;;  %vm409_vm9 = vcmp.ge.f32.partialorder %v377_v61, 0.0  ;;  %v378_v21 = vadd.f32 %v1124_v23, %v328_v3  ;;  %v331_v22 = vmul.f32 %v1110_v7, %v280_v10 }
  0x4c   : > { %v1191_v24 = vsel %vm392_vm6, %v360_v50, %v424_v2  ;;  %v1193_v25 = vsel %vm408_vm7, %v376_v51, %v440_v6  ;;  %v426_v26 = vmul.f32 0.01, %v362_v8  ;;  %v363_v27 = vadd.f32 %v1120_v20, %v313_v9  ;;  %v267_v51 = vld [vmem:[%s1108_s25 + $0x58] sm:$0xff] }
  0x4d   : > { %v379_v29 = vadd.f32 %v1120_v20, %v329_v12  ;;  %v364_v30 = vadd.f32 %v1124_v23, %v314_v13  ;;  %v316_v31 = vmul.f32 %v1114_v14, %v265_v19  ;;  %v1201_v33 = vsel %vm393_vm8, %v361_v60, %v425_v15 }
  0x4e   : > { %v1203_v34 = vsel %vm409_vm9, %v377_v61, %v441_v16  ;;  %v380_v35 = vadd.f32 %v1124_v23, %v330_v17  ;;  %v365_v36 = vadd.f32 %v1120_v20, %v315_v18  ;;  %vm410_vm11 = vcmp.ge.f32.partialorder %v378_v21, 0.0  ;;  %v283_v61 = vld [vmem:[%s1108_s25 + $0xd8] sm:$0xff] }
  0x4f   : > { %v442_v37 = vmul.f32 0.01, %v378_v21  ;;  %v381_v38 = vadd.f32 %v1120_v20, %v331_v22  ;;  %v332_v40 = vmul.f32 %v1114_v14, %v281_v28  ;;  %v1210_v42 = vsel %vm394_vm10, %v362_v8, %v426_v26 }
  0x50   : > { %vm395_vm12 = vcmp.ge.f32.partialorder %v363_v27, 0.0  ;;  %v427_v43 = vmul.f32 0.01, %v363_v27  ;;  %v317_v44 = vmul.f32 %v1110_v7, %v266_v32  ;;  %vm411_vm13 = vcmp.ge.f32.partialorder %v379_v29, 0.0  ;;  %v284_v32 = vld [vmem:[%s1108_s25 + $0xe0] sm:$0xff] }
  0x51   : > { %v443_v45 = vmul.f32 0.01, %v379_v29  ;;  %v428_v46 = vmul.f32 0.01, %v364_v30  ;;  %v366_v47 = vadd.f32 %v1124_v23, %v316_v31  ;;  %vm396_vm14 = vcmp.ge.f32.partialorder %v364_v30, 0.0 }
  0x52   : > { %v444_v48 = vmul.f32 0.01, %v380_v35  ;;  %v429_v49 = vmul.f32 0.01, %v365_v36  ;;  %v333_v50 = vmul.f32 %v1110_v7, %v282_v41  ;;  %vm412_vm15 = vcmp.ge.f32.partialorder %v380_v35, 0.0 }
  0x53   : > { %vm397_vm0 = vcmp.ge.f32.partialorder %v365_v36, 0.0  ;;  %v445_v52 = vmul.f32 0.01, %v381_v38  ;;  %v382_v53 = vadd.f32 %v1124_v23, %v332_v40  ;;  %v1218_v57 = vsel %vm410_vm11, %v378_v21, %v442_v37  ;;  %v268_v21 = vld [vmem:[%s1108_s25 + $0x60] sm:$0xff] }
  0x54   : > { %v1221_v58 = vsel %vm395_vm12, %v363_v27, %v427_v43  ;;  %vm413_vm1 = vcmp.ge.f32.partialorder %v381_v38, 0.0  ;;  %v367_v60 = vadd.f32 %v1120_v20, %v317_v44  ;;  %v1226_v62 = vsel %vm411_vm13, %v379_v29, %v443_v45 }
  0x55   : > { %v1228_v63 = vsel %vm396_vm14, %v364_v30, %v428_v46  ;;  %v430_v2 = vmul.f32 0.01, %v366_v47  ;;  %v318_v3 = vmul.f32 %v1114_v14, %v267_v51  ;;  %v1231_v4 = vsel %vm412_vm15, %v380_v35, %v444_v48 }
  0x56   : > { %v1233_v5 = vsel %vm397_vm0, %v365_v36, %v429_v49  ;;  %vm398_vm2 = vcmp.ge.f32.partialorder %v366_v47, 0.0  ;;  %v383_v6 = vadd.f32 %v1120_v20, %v333_v50  ;;  %v1236_v10 = vsel %vm413_vm1, %v381_v38, %v445_v52  ;;  %v269_v49 = vld [vmem:[%s1108_s25 + $0x68] sm:$0xff] }
  0x57   : > { %vm414_vm3 = vcmp.ge.f32.partialorder %v382_v53, 0.0  ;;  %v446_v12 = vmul.f32 0.01, %v382_v53  ;;  %v334_v13 = vmul.f32 %v1114_v14, %v283_v61  ;;  %vm399_vm4 = vcmp.ge.f32.partialorder %v367_v60, 0.0 }
  0x58   : > { %v431_v19 = vmul.f32 0.01, %v367_v60  ;;  %v1252_v27 = vsel %vm398_vm2, %v366_v47, %v430_v2  ;;  %v368_v28 = vadd.f32 %v1124_v23, %v318_v3  ;;  %vm415_vm5 = vcmp.ge.f32.partialorder %v383_v6, 0.0 }
  0x59   : > { %v447_v31 = vmul.f32 0.01, %v383_v6  ;;  %v384_v40 = vadd.f32 %v1124_v23, %v334_v13  ;;  %v319_v41 = vmul.f32 %v1110_v7, %v268_v21  ;;  %v1267_v45 = vsel %vm414_vm3, %v382_v53, %v446_v12  ;;  %v270_v12 = vld [vmem:[%s1108_s25 + $0x70] sm:$0xff] }
  0x5a   : > { %v432_v47 = vmul.f32 0.01, %v368_v28  ;;  %v335_v48 = vmul.f32 %v1110_v7, %v284_v32  ;;  %vm400_vm6 = vcmp.ge.f32.partialorder %v368_v28, 0.0 }
  0x5b   : > { %v1281_v52 = vsel %vm415_vm5, %v383_v6, %v447_v31  ;;  %v448_v3 = vmul.f32 0.01, %v384_v40  ;;  %vm416_vm7 = vcmp.ge.f32.partialorder %v384_v40, 0.0 }
  0x5d   : > { %v1308_v31 = vsel %vm416_vm7, %v384_v40, %v448_v3 }
  0xfb   : > { %v611_v8 = vpop.f32.mrb[0].mxu0  ;;  %v659_v9 = vpop.f32.mrb[0].mxu1 }
  0xfc   : > { %v612_v15 = vadd.f32 %v611_v8, %v1143_v39  ;;  %v660_v16 = vadd.f32 %v659_v9, %v1143_v39  ;;  %v613_v17 = vpop.f32.mrb[1].mxu0  ;;  %v661_v18 = vpop.f32.mrb[1].mxu1  ;;  %v369_v8 = vadd.f32 %v1120_v20, %v319_v41  ;;  %v285_v9 = vld [vmem:[%s1108_s25 + $0xe8] sm:$0xff]  ;;  %v271_v41 = vld [vmem:[%s1108_s25 + $0x78] sm:$0xff] }
  0xfd   : > { %v614_v22 = vadd.f32 %v613_v17, %v1159_v56  ;;  %v662_v26 = vadd.f32 %v661_v18, %v1159_v56  ;;  %v385_v17 = vadd.f32 %v1120_v20, %v335_v48  ;;  %v336_v21 = vmul.f32 %v1114_v14, %v285_v9 }
  0xfe   : > { %v706_v29 = vadd.f32 %v612_v15, %v1155_v54  ;;  %v722_v30 = vadd.f32 %v660_v16, %v1157_v55  ;;  %v1298_v16 = vsel %vm400_vm6, %v368_v28, %v432_v47  ;;  %v433_v32 = vmul.f32 0.01, %v369_v8 }
  0xff   : > { %v707_v35 = vadd.f32 %v614_v22, %v1162_v59  ;;  %v723_v36 = vadd.f32 %v662_v26, %v1169_v0  ;;  %v617_v37 = vpop.f32.mrb[2].mxu0  ;;  %v665_v38 = vpop.f32.mrb[2].mxu1  ;;  %v1270_v59 = vsel %vm399_vm4, %v367_v60, %v431_v19  ;;  %v321_v22 = vmul.f32 %v1110_v7, %v270_v12 }
 0x100   : > { %738 = vst [vmem:[%s1247_s29] sm:$0xff] %v706_v29  ;;  %754 = vst [vmem:[%s1247_s29 + $0x80] sm:$0xff] %v722_v30  ;;  %v618_v54 = vadd.f32 %v617_v37, %v1143_v39  ;;  %v666_v55 = vadd.f32 %v665_v38, %v1143_v39  ;;  %v619_v43 = vpop.f32.mrb[3].mxu0  ;;  %v667_v44 = vpop.f32.mrb[3].mxu1  ;;  %vm401_vm8 = vcmp.ge.f32.partialorder %v369_v8, 0.0  ;;  %vm417_vm9 = vcmp.ge.f32.partialorder %v385_v17, 0.0 }
 0x101   : > { %739 = vst [vmem:[%s1247_s29 + $0x8] sm:$0xff] %v707_v35  ;;  %755 = vst [vmem:[%s1247_s29 + $0x88] sm:$0xff] %v723_v36  ;;  %v620_v0 = vadd.f32 %v619_v43, %v1159_v56  ;;  %v668_v46 = vadd.f32 %v667_v44, %v1159_v56  ;;  %v449_v40 = vmul.f32 0.01, %v385_v17  ;;  %v386_v44 = vadd.f32 %v1124_v23, %v336_v21 }
 0x102   : > { %v708_v50 = vadd.f32 %v618_v54, %v1172_v1  ;;  %v724_v51 = vadd.f32 %v666_v55, %v1181_v11  ;;  %v287_v54 = vld [vmem:[%s1108_s25 + $0xf8] sm:$0xff] }
 0x103   : > { %v709_v53 = vadd.f32 %v620_v0, %v1191_v24  ;;  %v725_v60 = vadd.f32 %v668_v46, %v1193_v25  ;;  %v623_v61 = vpop.f32.mrb[4].mxu0  ;;  %v671_v2 = vpop.f32.mrb[4].mxu1  ;;  %v320_v24 = vmul.f32 %v1114_v14, %v269_v49  ;;  %v1326_v0 = vadd.f32 %v1120_v20, %v321_v22 }
 0x104   : > { %740 = vst [vmem:[%s1247_s29 + $0x10] sm:$0xff] %v708_v50  ;;  %756 = vst [vmem:[%s1247_s29 + $0x90] sm:$0xff] %v724_v51  ;;  %v624_v1 = vadd.f32 %v623_v61, %v1143_v39  ;;  %v672_v11 = vadd.f32 %v671_v2, %v1143_v39  ;;  %v625_v6 = vpop.f32.mrb[5].mxu0  ;;  %v673_v13 = vpop.f32.mrb[5].mxu1  ;;  %v1331_v50 = vsel %vm401_vm8, %v369_v8, %v433_v32  ;;  %v450_v12 = vmul.f32 0.01, %v386_v44 }
 0x105   : > { %741 = vst [vmem:[%s1247_s29 + $0x18] sm:$0xff] %v709_v53  ;;  %757 = vst [vmem:[%s1247_s29 + $0x98] sm:$0xff] %v725_v60  ;;  %v626_v25 = vadd.f32 %v625_v6, %v1159_v56  ;;  %v674_v15 = vadd.f32 %v673_v13, %v1159_v56  ;;  %v322_v61 = vmul.f32 %v1114_v14, %v271_v41  ;;  %vm418_vm11 = vcmp.ge.f32.partialorder %v386_v44, 0.0 }
 0x106   : > { %v710_v18 = vadd.f32 %v624_v1, %v1201_v33  ;;  %v726_v19 = vadd.f32 %v672_v11, %v1203_v34  ;;  %v481_v9 = vsel %vm417_vm9, %v385_v17, %v449_v40  ;;  %vm403_vm12 = vcmp.ge.f32.partialorder %v1326_v0, 0.0 }
 0x107   : > { %v711_v26 = vadd.f32 %v626_v25, %v1210_v42  ;;  %v727_v29 = vadd.f32 %v674_v15, %v1218_v57  ;;  %v629_v30 = vpop.f32.mrb[6].mxu0  ;;  %v677_v28 = vpop.f32.mrb[6].mxu1  ;;  %v370_v42 = vadd.f32 %v1124_v23, %v320_v24  ;;  %v286_v57 = vld [vmem:[%s1108_s25 + $0xf0] sm:$0xff]  ;;  %v372_v15 = vadd.f32 %v1124_v23, %v322_v61 }
 0x108   : > { %742 = vst [vmem:[%s1247_s29 + $0x20] sm:$0xff] %v710_v18  ;;  %758 = vst [vmem:[%s1247_s29 + $0xa0] sm:$0xff] %v726_v19  ;;  %v630_v33 = vadd.f32 %v629_v30, %v1143_v39  ;;  %v678_v34 = vadd.f32 %v677_v28, %v1143_v39  ;;  %v631_v35 = vpop.f32.mrb[7].mxu0  ;;  %v679_v36 = vpop.f32.mrb[7].mxu1  ;;  %v482_v21 = vsel %vm418_vm11, %v386_v44, %v450_v12 }
 0x109   : > { %743 = vst [vmem:[%s1247_s29 + $0x28] sm:$0xff] %v711_v26  ;;  %759 = vst [vmem:[%s1247_s29 + $0xa8] sm:$0xff] %v727_v29  ;;  %v632_v37 = vadd.f32 %v631_v35, %v1159_v56  ;;  %v680_v38 = vadd.f32 %v679_v36, %v1159_v56  ;;  %vm402_vm10 = vcmp.ge.f32.partialorder %v370_v42, 0.0  ;;  %v434_v2 = vmul.f32 0.01, %v370_v42 }
 0x10a   : > { %v712_v55 = vadd.f32 %v630_v33, %v1221_v58  ;;  %v728_v43 = vadd.f32 %v678_v34, %v1226_v62  ;;  %v337_v58 = vmul.f32 %v1110_v7, %v286_v57  ;;  %v436_v34 = vmul.f32 0.01, %v372_v15 }
 0x10b   : > { %v713_v46 = vadd.f32 %v632_v37, %v1228_v63  ;;  %v729_v47 = vadd.f32 %v680_v38, %v1231_v4  ;;  %v635_v48 = vpop.f32.mrb[8].mxu0  ;;  %v683_v49 = vpop.f32.mrb[8].mxu1  ;;  %v338_v63 = vmul.f32 %v1114_v14, %v287_v54  ;;  %vm404_vm14 = vcmp.ge.f32.partialorder %v372_v15, 0.0 }
 0x10c   : > { %744 = vst [vmem:[%s1247_s29 + $0x30] sm:$0xff] %v712_v55  ;;  %760 = vst [vmem:[%s1247_s29 + $0xb0] sm:$0xff] %v728_v43  ;;  %v636_v62 = vadd.f32 %v635_v48, %v1143_v39  ;;  %v684_v51 = vadd.f32 %v683_v49, %v1143_v39  ;;  %v637_v53 = vpop.f32.mrb[9].mxu0  ;;  %v685_v60 = vpop.f32.mrb[9].mxu1  ;;  %v387_v13 = vadd.f32 %v1120_v20, %v337_v58 }
 0x10d   : > { %745 = vst [vmem:[%s1247_s29 + $0x38] sm:$0xff] %v713_v46  ;;  %761 = vst [vmem:[%s1247_s29 + $0xb8] sm:$0xff] %v729_v47  ;;  %v638_v4 = vadd.f32 %v637_v53, %v1159_v56  ;;  %v686_v7 = vadd.f32 %v685_v60, %v1159_v56  ;;  %v388_v17 = vadd.f32 %v1124_v23, %v338_v63  ;;  %v435_v23 = vmul.f32 0.01, %v1326_v0 }
 0x10e   : > { %v714_v3 = vadd.f32 %v636_v62, %v1233_v5  ;;  %v730_v8 = vadd.f32 %v684_v51, %v1236_v10  ;;  %vm419_vm13 = vcmp.ge.f32.partialorder %v387_v13, 0.0  ;;  %v451_v28 = vmul.f32 0.01, %v387_v13 }
 0x10f   : > { %v715_v14 = vadd.f32 %v638_v4, %v1252_v27  ;;  %v731_v1 = vadd.f32 %v686_v7, %v1267_v45  ;;  %v641_v11 = vpop.f32.mrb[10].mxu0  ;;  %v689_v6 = vpop.f32.mrb[10].mxu1  ;;  %v466_v45 = vsel %vm402_vm10, %v370_v42, %v434_v2  ;;  %v452_v35 = vmul.f32 0.01, %v388_v17 }
 0x110   : > { %746 = vst [vmem:[%s1247_s29 + $0x40] sm:$0xff] %v714_v3  ;;  %762 = vst [vmem:[%s1247_s29 + $0xc0] sm:$0xff] %v730_v8  ;;  %v642_v5 = vadd.f32 %v641_v11, %v1143_v39  ;;  %v690_v10 = vadd.f32 %v689_v6, %v1143_v39  ;;  %v643_v24 = vpop.f32.mrb[11].mxu0  ;;  %v691_v25 = vpop.f32.mrb[11].mxu1  ;;  %vm420_vm15 = vcmp.ge.f32.partialorder %v388_v17, 0.0  ;;  %v467_v38 = vsel %vm403_vm12, %v1326_v0, %v435_v23 }
 0x111   : > { %747 = vst [vmem:[%s1247_s29 + $0x48] sm:$0xff] %v715_v14  ;;  %763 = vst [vmem:[%s1247_s29 + $0xc8] sm:$0xff] %v731_v1  ;;  %v644_v27 = vadd.f32 %v643_v24, %v1159_v56  ;;  %v692_v20 = vadd.f32 %v691_v25, %v1159_v56  ;;  %v483_v41 = vsel %vm419_vm13, %v387_v13, %v451_v28 }
 0x112   : > { %v716_v18 = vadd.f32 %v642_v5, %v1270_v59  ;;  %v732_v19 = vadd.f32 %v690_v10, %v1281_v52  ;;  %v468_v44 = vsel %vm404_vm14, %v372_v15, %v436_v34  ;;  %v484_v47 = vsel %vm420_vm15, %v388_v17, %v452_v35 }
 0x113   : > { %v717_v22 = vadd.f32 %v644_v27, %v1298_v16  ;;  %v733_v26 = vadd.f32 %v692_v20, %v1308_v31  ;;  %v647_v29 = vpop.f32.mrb[12].mxu0  ;;  %v695_v30 = vpop.f32.mrb[12].mxu1 }
 0x114   : > { %748 = vst [vmem:[%s1247_s29 + $0x50] sm:$0xff] %v716_v18  ;;  %764 = vst [vmem:[%s1247_s29 + $0xd0] sm:$0xff] %v732_v19  ;;  %v648_v59 = vadd.f32 %v647_v29, %v1143_v39  ;;  %v696_v52 = vadd.f32 %v695_v30, %v1143_v39  ;;  %v649_v32 = vpop.f32.mrb[13].mxu0  ;;  %v697_v33 = vpop.f32.mrb[13].mxu1 }
 0x115   : > { %749 = vst [vmem:[%s1247_s29 + $0x58] sm:$0xff] %v717_v22  ;;  %765 = vst [vmem:[%s1247_s29 + $0xd8] sm:$0xff] %v733_v26  ;;  %v650_v16 = vadd.f32 %v649_v32, %v1159_v56  ;;  %v698_v31 = vadd.f32 %v697_v33, %v1159_v56 }
 0x116   : > { %v718_v36 = vadd.f32 %v648_v59, %v1331_v50  ;;  %v734_v42 = vadd.f32 %v696_v52, %v481_v9 }
 0x117   : > { %v719_v57 = vadd.f32 %v650_v16, %v466_v45  ;;  %v735_v37 = vadd.f32 %v698_v31, %v482_v21  ;;  %v653_v40 = vpop.f32.mrb[14].mxu0  ;;  %v701_v54 = vpop.f32.mrb[14].mxu1 }
 0x118   : > { %750 = vst [vmem:[%s1247_s29 + $0x60] sm:$0xff] %v718_v36  ;;  %766 = vst [vmem:[%s1247_s29 + $0xe0] sm:$0xff] %v734_v42  ;;  %v654_v55 = vadd.f32 %v653_v40, %v1143_v39  ;;  %v702_v43 = vadd.f32 %v701_v54, %v1143_v39  ;;  %v655_v46 = vpop.f32.mrb[15].mxu0  ;;  %v703_v48 = vpop.f32.mrb[15].mxu1 }
 0x119   : > { %751 = vst [vmem:[%s1247_s29 + $0x68] sm:$0xff] %v719_v57  ;;  %767 = vst [vmem:[%s1247_s29 + $0xe8] sm:$0xff] %v735_v37  ;;  %v656_v0 = vadd.f32 %v655_v46, %v1159_v56  ;;  %v704_v49 = vadd.f32 %v703_v48, %v1159_v56 }
 0x11a   : > { %v720_v50 = vadd.f32 %v654_v55, %v467_v38  ;;  %v736_v58 = vadd.f32 %v702_v43, %v483_v41 }
 0x11b   : > { %v721_v62 = vadd.f32 %v656_v0, %v468_v44  ;;  %v737_v51 = vadd.f32 %v704_v49, %v484_v47 }
 0x11c   : > { %752 = vst [vmem:[%s1247_s29 + $0x70] sm:$0xff] %v720_v50  ;;  %768 = vst [vmem:[%s1247_s29 + $0xf0] sm:$0xff] %v736_v58 }
 0x11d   : > { %753 = vst [vmem:[%s1247_s29 + $0x78] sm:$0xff] %v721_v62  ;;  %769 = vst [vmem:[%s1247_s29 + $0xf8] sm:$0xff] %v737_v51 }
 0x11e PF: > { %s15_s18 = sadd.s32 1, %s920_s18  }
 0x11f   : > { %p12_p4 = scmp.ge.s32.totalorder %s15_s18, 4  }
 0x121   :  { %14 = sbr.rel (!%p12_p4) target bundleno = 1 (0x1), region = 73 }

// kernel: resgcn_forward.9
= control target key start
LH: loop header
LB: loop body
LE: loop exit
PB: predicated region body
PF: predicated region fallthrough
CT: control target
= control target key end

     0   :  { %s1570_s15 = smov 0   ;;  %s1572_s16 = smov 0   ;;  %s2064_s0 = inlined_call_operand.vmem [shape: s8[256,256], index: 0, kind: input, shape index: {}]   ;;  %s2065_s1 = inlined_call_operand.vmem [shape: f32[256,256], index: 1, kind: input, shape index: {}]   ;;  %s2066_s2 = inlined_call_operand.vmem [shape: f32[256,256], index: 2, kind: input, shape index: {}]   ;;  %s2067_s3 = inlined_call_operand.vmem [shape: f32[256,256], index: 3, kind: output, shape index: {0}]   ;;  %s2068_s4 = inlined_call_operand.vmem [shape: f32[2,2,256], index: 4, kind: output, shape index: {1}]  }
   0x1   :  { %s1574_s17 = smov 0   ;;  %s1576_s18 = smov 0  }
   0x2   :  { %s1578_s19 = smov 0   ;;  %s1580_s20 = smov 0  }
   0x3   :  { %s1582_s21 = smov 0  }
   0x4 LB: > { %s24_s22 = sadd.s32 1, %s1533_s19  ;;  %s27_s23 = sadd.s32 1, %s1537_s20  ;;  %s1541_s21 = sphi %s1582_s21, %s15_s21   ;;  %s1537_s20 = sphi %s1580_s20, %s2074_s20   ;;  %s1533_s19 = sphi %s1578_s19, %s2073_s19   ;;  %s1529_s18 = sphi %s1576_s18, %s2072_s18   ;;  %s1525_s17 = sphi %s1574_s17, %s2071_s17   ;;  %s1521_s16 = sphi %s1572_s16, %s2070_s16   ;;  %s1517_s15 = sphi %s1570_s15, %s2069_s15  }
   0x5   : > { %p25_p0 = scmp.ge.s32.totalorder %s24_s22, 2  ;;  %p43_p1 = scmp.ne.s32.totalorder %s1521_s16, %s1517_s15 }
   0x6   : > { %p44_p2 = scmp.eq.s32.totalorder %s1541_s21, 0  ;;  %s36_s27 = sadd.s32 1, %s1521_s16 }
   0x7   : > { %s2076_s22 = smov (%p25_p0, %s24_s22), 0  ;;  %s2078_s23 = smov (!%p25_p0, %s27_s23), %s1537_s20 }
   0x8   : > { %p45_p3 = por %p44_p2, %p43_p1  ;;  %p29_p4 = scmp.ge.s32.totalorder %s2078_s23, 2 }
   0x9   : > { %s32_s24 = ssub.s32 %s1533_s19, %s2076_s22  ;;  %p1257_p6 = scmp.ge.s32.totalorder %s1541_s21, 4 }
   0xa   : > { %s2080_s23 = smov (%p29_p4, %s2078_s23), 0 }
   0xb   : > { %s31_s25 = ssub.s32 %s1537_s20, %s2080_s23  ;;  %169 = sbr.rel (%p1257_p6) target bundleno = 26 (0x1a), region = 24 }
   0xc   : > { %s33_s26 = sor.u32 %s32_s24, %s31_s25 }
   0xd   : > { %p34_p5 = scmp.eq.s32.totalorder %s33_s26, 0 }
   0xf   : > { %s1621_s28 = scalar_select %p34_p5, %s1521_s16, %s36_s27  }
  0x12   : > { %172 = sbr.rel (!%p45_p3) target bundleno = 26 (0x1a), region = 28  ;;  %s174_s29 = sand.u32 (%p45_p3), 1, %s1521_s16  }
  0x13   : > { %s1280_s30 = sshll.u32 (%p45_p3), %s1537_s20, 3  ;;  %s1258_s5 = sshll.u32 (%p45_p3), %s174_s29, 5 }
  0x14   : > { %s179_s6 = sadd.s32 (%p45_p3), %s1533_s19, %s1280_s30  ;;  %s176_s11 = scalar_lea.vmem (%p45_p3), [#allocation3], %s1258_s5 }
  0x15   : > { %s1261_s7 = sshll.u32 (%p45_p3), %s179_s6, 3 }
  0x16   : > { %s181_s10 = scalar_lea.vmem (%p45_p3), %s2064_s0, %s1261_s7 }
  0x17   : > { %v215_v0 = vld [vmem:[%s181_s10] sm:$0xff] (%p45_p3)  ;;  %v217_v1 = vld [vmem:[%s181_s10 + $0x10] sm:$0xff] (%p45_p3) }
  0x18   : > { %v219_v2 = vld [vmem:[%s181_s10 + $0x20] sm:$0xff] (%p45_p3)  ;;  %216 = vst [vmem:[%s176_s11] sm:$0xff] (%p45_p3), %v215_v0  ;;  %218 = vst [vmem:[%s176_s11 + $0x8] sm:$0xff] (%p45_p3), %v217_v1  ;;  %v221_v3 = vld [vmem:[%s181_s10 + $0x30] sm:$0xff] (%p45_p3) }
  0x19   : > { %220 = vst [vmem:[%s176_s11 + $0x10] sm:$0xff] %v219_v2  ;;  %222 = vst [vmem:[%s176_s11 + $0x18] sm:$0xff] %v221_v3 }
  0x1a PF: > { %p1262_p7 = scmp.ge.s32.totalorder %s1541_s21, 1  ;;  %p227_p8 = scmp.lt.s32.totalorder %s1541_s21, 5 }
  0x1c   : > { %p228_p9 = pnand %p1262_p7, %p227_p8 }
  0x1d   : > { %s234_s12 = sand.u32 (!%p228_p9), 1, %s1517_s15   ;;  %s1264_s13 = sshll.u32 (!%p228_p9), %s1529_s18, 4 }
  0x1e   : > { %231 = sbr.rel (%p228_p9) target bundleno = 662 (0x296), region = 66  ;;  %s1263_s14 = sshll.u32 (!%p228_p9), %s234_s12, 5 }
  0x1f   : > { %p267_p10 = scmp.lt.s32.totalorder (!%p228_p9), %s1264_s13, 31  ;;  %p273_p11 = scmp.lt.s32.totalorder (!%p228_p9), %s1529_s18, 1 }
  0x20   : > { %s1646_s8 = scalar_lea.vmem (!%p228_p9), [#allocation3], %s1263_s14  ;;  %p1269_p12 = scmp.ne.s32.totalorder (!%p228_p9), %s1525_s17, 0 }
  0x25   : > { %s2082_s13 = smov (!%p267_p10, %s1264_s13), 31  ;;  %281 = sbr.rel (%p1269_p12) target bundleno = 56 (0x38), region = 74 }
  0x26   : > { %s274_s24 = scalar_select %p273_p11, %s1529_s18, 1 }
  0x27   : > { %s1281_s25 = sshll.u32 %s2082_s13, 4  ;;  %v1543_v4 = vmov (!%p1269_p12), 0.0  }
  0x28   : > { %s1639_s29 = scalar_lea.vmem %s2067_s3, %s1281_s25  ;;  %s1282_s30 = sshll.u32 %s274_s24, 2  ;;  %282 = vst [vmem:[#allocation2] sm:$0xff] (!%p1269_p12), %v1543_v4  ;;  %283 = vst [vmem:[#allocation2 + $0x8] sm:$0xff] (!%p1269_p12), %v1543_v4 }
  0x29   : > { %s1644_s7 = scalar_lea.vmem %s2068_s4, %s1282_s30  ;;  %284 = vst [vmem:[#allocation2 + $0x10] sm:$0xff] (!%p1269_p12), %v1543_v4  ;;  %285 = vst [vmem:[#allocation2 + $0x18] sm:$0xff] (!%p1269_p12), %v1543_v4 }
  0x2a   : > { %286 = vst [vmem:[#allocation2 + $0x20] sm:$0xff] (!%p1269_p12), %v1543_v4  ;;  %287 = vst [vmem:[#allocation2 + $0x28] sm:$0xff] (!%p1269_p12), %v1543_v4 }
  0x2b   : > { %288 = vst [vmem:[#allocation2 + $0x30] sm:$0xff] (!%p1269_p12), %v1543_v4  ;;  %289 = vst [vmem:[#allocation2 + $0x38] sm:$0xff] (!%p1269_p12), %v1543_v4 }
  0x2c   : > { %290 = vst [vmem:[#allocation2 + $0x40] sm:$0xff] %v1543_v4  ;;  %291 = vst [vmem:[#allocation2 + $0x48] sm:$0xff] %v1543_v4 }
  0x2d   : > { %292 = vst [vmem:[#allocation2 + $0x50] sm:$0xff] %v1543_v4  ;;  %293 = vst [vmem:[#allocation2 + $0x58] sm:$0xff] %v1543_v4 }
  0x2e   : > { %294 = vst [vmem:[#allocation2 + $0x60] sm:$0xff] %v1543_v4  ;;  %295 = vst [vmem:[#allocation2 + $0x68] sm:$0xff] %v1543_v4 }
  0x2f   : > { %296 = vst [vmem:[#allocation2 + $0x70] sm:$0xff] %v1543_v4  ;;  %297 = vst [vmem:[#allocation2 + $0x78] sm:$0xff] %v1543_v4 }
  0x30   : > { %298 = vst [vmem:[#allocation2 + $0x80] sm:$0xff] %v1543_v4  ;;  %299 = vst [vmem:[#allocation2 + $0x88] sm:$0xff] %v1543_v4 }
  0x31   : > { %300 = vst [vmem:[#allocation2 + $0x90] sm:$0xff] %v1543_v4  ;;  %301 = vst [vmem:[#allocation2 + $0x98] sm:$0xff] %v1543_v4 }
  0x32   : > { %302 = vst [vmem:[#allocation2 + $0xa0] sm:$0xff] %v1543_v4  ;;  %303 = vst [vmem:[#allocation2 + $0xa8] sm:$0xff] %v1543_v4 }
  0x33   : > { %304 = vst [vmem:[#allocation2 + $0xb0] sm:$0xff] %v1543_v4  ;;  %305 = vst [vmem:[#allocation2 + $0xb8] sm:$0xff] %v1543_v4 }
  0x34   : > { %306 = vst [vmem:[#allocation2 + $0xc0] sm:$0xff] %v1543_v4  ;;  %307 = vst [vmem:[#allocation2 + $0xc8] sm:$0xff] %v1543_v4 }
  0x35   : > { %308 = vst [vmem:[#allocation2 + $0xd0] sm:$0xff] %v1543_v4  ;;  %309 = vst [vmem:[#allocation2 + $0xd8] sm:$0xff] %v1543_v4 }
  0x36   : > { %310 = vst [vmem:[#allocation2 + $0xe0] sm:$0xff] %v1543_v4  ;;  %311 = vst [vmem:[#allocation2 + $0xe8] sm:$0xff] %v1543_v4 }
  0x37   : > { %312 = vst [vmem:[#allocation2 + $0xf0] sm:$0xff] %v1543_v4  ;;  %313 = vst [vmem:[#allocation2 + $0xf8] sm:$0xff] %v1543_v4 }
  0x38 PF: > { %s1270_s15 = sshll.u32 %s1525_s17, 7  ;;  %v1544_v5 = vmov 0.0   ;;  %v384_v50 = vld [vmem:[%s1646_s8] sm:$0xff]  ;;  %v386_v51 = vld [vmem:[%s1646_s8 + $0x10] sm:$0xff]  ;;  %p1273_p13 = scmp.ne.s32.totalorder %s1525_s17, 1 }
  0x39   : > { %s315_s9 = sshra.s32 %s1270_s15, 3  ;;  %484 = vmatprep.mubr.f32.mxu0 %v1544_v5  ;;  %532 = vmatprep.mubr.f32.mxu1 %v1544_v5  ;;  %v388_v55 = vunpack.c.0.s8 %v384_v50  ;;  %v396_v56 = vunpack.c.0.s8 %v386_v51  ;;  %v389_v60 = vunpack.c.1.s8 %v384_v50  ;;  %v397_v61 = vunpack.c.1.s8 %v386_v51  ;;  %s1274_s14 = sshll.u32 (!%p1273_p13), %s1529_s18, 7 }
  0x3a   : > { %s1283_s10 = sshll.u32 %s315_s9, 4  ;;  %v390_v0 = vunpack.c.2.s8 %v384_v50  ;;  %v398_v1 = vunpack.c.2.s8 %v386_v51  ;;  %v391_v4 = vunpack.c.3.s8 %v384_v50  ;;  %s650_s30 = sshra.s32 (!%p1273_p13), %s1274_s14, 3  ;;  %vm1124_vm0 = vcmask (!%p1273_p13), 1040384  }
  0x3b   : > { %s1655_s13 = scalar_lea.vmem %s2065_s1, %s1283_s10  ;;  %v404_v58 = vcvt.s32.f32 %v388_v55  ;;  %v412_v59 = vcvt.s32.f32 %v396_v56  ;;  %v405_v62 = vcvt.s32.f32 %v389_v60  ;;  %v413_v63 = vcvt.s32.f32 %v397_v61  ;;  %s1284_s11 = sshll.u32 (!%p1273_p13), %s650_s30, 4 }
  0x3c   : > { %v321_v6 = vld [vmem:[%s1655_s13 + $0x8] sm:$0xff]  ;;  %v323_v7 = vld [vmem:[%s1655_s13 + $0x18] sm:$0xff]  ;;  %v320_v8 = vld [vmem:[%s1655_s13] sm:$0xff]  ;;  %v406_v2 = vcvt.s32.f32 %v390_v0  ;;  %v414_v3 = vcvt.s32.f32 %v398_v1 }
  0x3d   : > { %v1285_v9 = vpack.c.bf16 %v323_v7, %v321_v6  ;;  %v322_v10 = vld [vmem:[%s1655_s13 + $0x10] sm:$0xff]  ;;  %v325_v11 = vld [vmem:[%s1655_s13 + $0x28] sm:$0xff]  ;;  %v327_v12 = vld [vmem:[%s1655_s13 + $0x38] sm:$0xff]  ;;  %v399_v6 = vunpack.c.3.s8 %v386_v51 }
  0x3e   : > { %v1287_v13 = vpack.c.bf16 %v322_v10, %v320_v8  ;;  %v1289_v14 = vpack.c.bf16 %v327_v12, %v325_v11  ;;  %v324_v15 = vld [vmem:[%s1655_s13 + $0x20] sm:$0xff]  ;;  %v326_v16 = vld [vmem:[%s1655_s13 + $0x30] sm:$0xff]  ;;  %v329_v17 = vld [vmem:[%s1655_s13 + $0x48] sm:$0xff] }
  0x3f   : > { %1286 = vmatprep.subr.bf16.mxu0 %v1285_v9  ;;  %1381 = vmatprep.subr.bf16.mxu1 %v1285_v9  ;;  %v331_v18 = vld [vmem:[%s1655_s13 + $0x58] sm:$0xff]  ;;  %v1291_v19 = vpack.c.bf16 %v326_v16, %v324_v15  ;;  %v328_v21 = vld [vmem:[%s1655_s13 + $0x40] sm:$0xff]  ;;  %v330_v22 = vld [vmem:[%s1655_s13 + $0x50] sm:$0xff]  ;;  %v407_v9 = vcvt.s32.f32 %v391_v4  ;;  %v415_v10 = vcvt.s32.f32 %v399_v6 }
  0x40   : > { %1288 = vmatpush1.bf16.msra.mxu0 %v1287_v13  ;;  %1389 = vmatpush1.bf16.msra.mxu1 %v1287_v13  ;;  %v1293_v20 = vpack.c.bf16 %v331_v18, %v329_v17  ;;  %v333_v23 = vld [vmem:[%s1655_s13 + $0x68] sm:$0xff]  ;;  %v335_v24 = vld [vmem:[%s1655_s13 + $0x78] sm:$0xff]  ;;  %v1295_v25 = vpack.c.bf16 %v330_v22, %v328_v21  ;;  %v332_v27 = vld [vmem:[%s1655_s13 + $0x60] sm:$0xff] }
  0x41   : > { %1290 = vmatprep.subr.bf16.mxu0 %v1289_v14  ;;  %1382 = vmatprep.subr.bf16.mxu1 %v1289_v14  ;;  %v1297_v26 = vpack.c.bf16 %v335_v24, %v333_v23  ;;  %v334_v28 = vld [vmem:[%s1655_s13 + $0x70] sm:$0xff]  ;;  %v337_v29 = vld [vmem:[%s1655_s13 + $0x88] sm:$0xff]  ;;  %v339_v30 = vld [vmem:[%s1655_s13 + $0x98] sm:$0xff] }
  0x42   : > { %v1299_v31 = vpack.c.bf16 %v334_v28, %v332_v27  ;;  %v1301_v32 = vpack.c.bf16 %v339_v30, %v337_v29  ;;  %v336_v33 = vld [vmem:[%s1655_s13 + $0x80] sm:$0xff]  ;;  %v338_v34 = vld [vmem:[%s1655_s13 + $0x90] sm:$0xff]  ;;  %v341_v35 = vld [vmem:[%s1655_s13 + $0xa8] sm:$0xff] }
  0x43   : > { %v343_v36 = vld [vmem:[%s1655_s13 + $0xb8] sm:$0xff]  ;;  %v1303_v37 = vpack.c.bf16 %v338_v34, %v336_v33  ;;  %v340_v39 = vld [vmem:[%s1655_s13 + $0xa0] sm:$0xff]  ;;  %v342_v40 = vld [vmem:[%s1655_s13 + $0xb0] sm:$0xff] }
  0x44   : > { %1292 = vmatpush1.bf16.msra.mxu0 %v1291_v19  ;;  %1390 = vmatpush1.bf16.msra.mxu1 %v1291_v19  ;;  %v1305_v38 = vpack.c.bf16 %v343_v36, %v341_v35  ;;  %v345_v41 = vld [vmem:[%s1655_s13 + $0xc8] sm:$0xff]  ;;  %v347_v42 = vld [vmem:[%s1655_s13 + $0xd8] sm:$0xff]  ;;  %v1307_v43 = vpack.c.bf16 %v342_v40, %v340_v39  ;;  %v344_v45 = vld [vmem:[%s1655_s13 + $0xc0] sm:$0xff] }
  0x45   : > { %1294 = vmatprep.subr.bf16.mxu0 %v1293_v20  ;;  %1383 = vmatprep.subr.bf16.mxu1 %v1293_v20  ;;  %v1309_v44 = vpack.c.bf16 %v347_v42, %v345_v41  ;;  %v346_v46 = vld [vmem:[%s1655_s13 + $0xd0] sm:$0xff]  ;;  %v349_v47 = vld [vmem:[%s1655_s13 + $0xe8] sm:$0xff]  ;;  %v351_v48 = vld [vmem:[%s1655_s13 + $0xf8] sm:$0xff] }
  0x46   : > { %v1311_v49 = vpack.c.bf16 %v346_v46, %v344_v45  ;;  %v1313_v52 = vpack.c.bf16 %v351_v48, %v349_v47  ;;  %v348_v53 = vld [vmem:[%s1655_s13 + $0xe0] sm:$0xff]  ;;  %v350_v54 = vld [vmem:[%s1655_s13 + $0xf0] sm:$0xff]  ;;  %v385_v7 = vld [vmem:[%s1646_s8 + $0x8] sm:$0xff] }
  0x47   : > { %v1315_v57 = vpack.c.bf16 %v350_v54, %v348_v53  ;;  %v387_v8 = vld [vmem:[%s1646_s8 + $0x18] sm:$0xff]  ;;  %v392_v11 = vunpack.c.0.s8 %v385_v7  ;;  %v393_v15 = vunpack.c.1.s8 %v385_v7  ;;  %v394_v19 = vunpack.c.2.s8 %v385_v7  ;;  %v352_v27 = vld [vmem:[#allocation2] sm:$0xff]  ;;  %v353_v29 = vld [vmem:[#allocation2 + $0x8] sm:$0xff]  ;;  %s1790_s8 = scalar_lea.vmem (!%p1273_p13), %s2065_s1, %s1284_s11 }
  0x48   : > { %1296 = vmatpush1.bf16.msra.mxu0 %v1295_v25  ;;  %1391 = vmatpush1.bf16.msra.mxu1 %v1295_v25  ;;  %v400_v12 = vunpack.c.0.s8 %v387_v8  ;;  %v401_v16 = vunpack.c.1.s8 %v387_v8  ;;  %v402_v20 = vunpack.c.2.s8 %v387_v8  ;;  %v395_v23 = vunpack.c.3.s8 %v385_v7  ;;  %v368_v28 = vld [vmem:[#allocation2 + $0x80] sm:$0xff]  ;;  %v369_v30 = vld [vmem:[#allocation2 + $0x88] sm:$0xff]  ;;  %v354_v39 = vld [vmem:[#allocation2 + $0x10] sm:$0xff] }
  0x49   : > { %1298 = vmatprep.subr.bf16.mxu0 %v1297_v26  ;;  %1384 = vmatprep.subr.bf16.mxu1 %v1297_v26  ;;  %v408_v13 = vcvt.s32.f32 %v392_v11  ;;  %v409_v17 = vcvt.s32.f32 %v393_v15  ;;  %v410_v21 = vcvt.s32.f32 %v394_v19  ;;  %v403_v24 = vunpack.c.3.s8 %v387_v8  ;;  %v370_v40 = vld [vmem:[#allocation2 + $0x90] sm:$0xff]  ;;  %v355_v41 = vld [vmem:[#allocation2 + $0x18] sm:$0xff]  ;;  %v356_v50 = vld [vmem:[#allocation2 + $0x20] sm:$0xff] }
  0x4a   : > { %v416_v14 = vcvt.s32.f32 %v400_v12  ;;  %v417_v18 = vcvt.s32.f32 %v401_v16  ;;  %v418_v22 = vcvt.s32.f32 %v402_v20  ;;  %v411_v25 = vcvt.s32.f32 %v395_v23  ;;  %v372_v51 = vld [vmem:[#allocation2 + $0xa0] sm:$0xff]  ;;  %v373_v53 = vld [vmem:[#allocation2 + $0xa8] sm:$0xff]  ;;  %v359_v0 = vld [vmem:[#allocation2 + $0x38] sm:$0xff] }
  0x4b   : > { %v419_v26 = vcvt.s32.f32 %v403_v24  ;;  %v375_v1 = vld [vmem:[#allocation2 + $0xb8] sm:$0xff]  ;;  %v360_v11 = vld [vmem:[#allocation2 + $0x40] sm:$0xff]  ;;  %v362_v23 = vld [vmem:[#allocation2 + $0x50] sm:$0xff] }
  0x4c   : > { %1300 = vmatpush1.bf16.msra.mxu0 %v1299_v31  ;;  %1392 = vmatpush1.bf16.msra.mxu1 %v1299_v31  ;;  %v376_v12 = vld [vmem:[#allocation2 + $0xc0] sm:$0xff]  ;;  %v378_v24 = vld [vmem:[#allocation2 + $0xd0] sm:$0xff] }
  0x4d   : > { %1302 = vmatprep.subr.bf16.mxu0 %v1301_v32  ;;  %1385 = vmatprep.subr.bf16.mxu1 %v1301_v32 }
  0x50   : > { %1304 = vmatpush1.bf16.msra.mxu0 %v1303_v37  ;;  %1393 = vmatpush1.bf16.msra.mxu1 %v1303_v37 }
  0x51   : > { %1306 = vmatprep.subr.bf16.mxu0 %v1305_v38  ;;  %1386 = vmatprep.subr.bf16.mxu1 %v1305_v38 }
  0x54   : > { %1308 = vmatpush1.bf16.msra.mxu0 %v1307_v43  ;;  %1394 = vmatpush1.bf16.msra.mxu1 %v1307_v43 }
  0x55   : > { %1310 = vmatprep.subr.bf16.mxu0 %v1309_v44  ;;  %1387 = vmatprep.subr.bf16.mxu1 %v1309_v44 }
  0x58   : > { %1312 = vmatpush1.bf16.msra.mxu0 %v1311_v49  ;;  %1395 = vmatpush1.bf16.msra.mxu1 %v1311_v49 }
  0x59   : > { %1314 = vmatprep.subr.bf16.mxu0 %v1313_v52  ;;  %1388 = vmatprep.subr.bf16.mxu1 %v1313_v52  ;;  %v357_v52 = vld [vmem:[#allocation2 + $0x28] sm:$0xff] }
  0x5c   : > { %1316 = vmatpush1.bf16.msra.mxu0 %v1315_v57  ;;  %1396 = vmatpush1.bf16.msra.mxu1 %v1315_v57 }
  0x5f   : > { %485 = vmatmul.mubr.f32.vlgmr.msra.gmra.mrb[0].mxu0 %v404_v58  ;;  %533 = vmatmul.mubr.f32.vlgmr.msra.gmra.mrb[0].mxu1 %v412_v59 }
  0x60   : > { %490 = vmatprep.mubr.f32.mxu0 %v1544_v5  ;;  %538 = vmatprep.mubr.f32.mxu1 %v1544_v5 }
  0x63   : > { %491 = vmatmul.mubr.f32.gmra.mrb[2].mxu0 %v405_v62  ;;  %539 = vmatmul.mubr.f32.gmra.mrb[2].mxu1 %v413_v63  ;;  %v358_v62 = vld [vmem:[#allocation2 + $0x30] sm:$0xff] }
  0x64   : > { %496 = vmatprep.mubr.f32.mxu0 %v1544_v5  ;;  %544 = vmatprep.mubr.f32.mxu1 %v1544_v5  ;;  %v374_v63 = vld [vmem:[#allocation2 + $0xb0] sm:$0xff] }
  0x67   : > { %497 = vmatmul.mubr.f32.gmra.mrb[4].mxu0 %v406_v2  ;;  %545 = vmatmul.mubr.f32.gmra.mrb[4].mxu1 %v414_v3 }
  0x68   : > { %502 = vmatprep.mubr.f32.mxu0 %v1544_v5  ;;  %550 = vmatprep.mubr.f32.mxu1 %v1544_v5 }
  0x6b   : > { %503 = vmatmul.mubr.f32.gmra.mrb[6].mxu0 %v407_v9  ;;  %551 = vmatmul.mubr.f32.gmra.mrb[6].mxu1 %v415_v10 }
  0x6c   : > { %508 = vmatprep.mubr.f32.mxu0 %v1544_v5  ;;  %556 = vmatprep.mubr.f32.mxu1 %v1544_v5 }
  0x6f   : > { %509 = vmatmul.mubr.f32.gmra.mrb[8].mxu0 %v408_v13  ;;  %557 = vmatmul.mubr.f32.gmra.mrb[8].mxu1 %v416_v14  ;;  %v361_v13 = vld [vmem:[#allocation2 + $0x48] sm:$0xff] }
  0x70   : > { %514 = vmatprep.mubr.f32.mxu0 %v1544_v5  ;;  %562 = vmatprep.mubr.f32.mxu1 %v1544_v5  ;;  %v377_v14 = vld [vmem:[#allocation2 + $0xc8] sm:$0xff] }
  0x73   : > { %515 = vmatmul.mubr.f32.gmra.mrb[10].mxu0 %v409_v17  ;;  %563 = vmatmul.mubr.f32.gmra.mrb[10].mxu1 %v417_v18 }
  0x74   : > { %520 = vmatprep.mubr.f32.mxu0 %v1544_v5  ;;  %568 = vmatprep.mubr.f32.mxu1 %v1544_v5 }
  0x77   : > { %521 = vmatmul.mubr.f32.gmra.mrb[12].mxu0 %v410_v21  ;;  %569 = vmatmul.mubr.f32.gmra.mrb[12].mxu1 %v418_v22 }
  0x78   : > { %526 = vmatprep.mubr.f32.mxu0 %v1544_v5  ;;  %574 = vmatprep.mubr.f32.mxu1 %v1544_v5  ;;  %v371_v5 = vld [vmem:[#allocation2 + $0x98] sm:$0xff] }
  0x7b   : > { %527 = vmatmul.mubr.f32.gmra.mrb[14].mxu0 %v411_v25  ;;  %575 = vmatmul.mubr.f32.gmra.mrb[14].mxu1 %v419_v26  ;;  %v363_v25 = vld [vmem:[#allocation2 + $0x58] sm:$0xff] }
  0x7c   : > { %v379_v26 = vld [vmem:[#allocation2 + $0xd8] sm:$0xff] }
 0x132   : > { %v486_v31 = vpop.f32.mrb[0].mxu0  ;;  %v534_v32 = vpop.f32.mrb[0].mxu1 }
 0x133   : > { %v581_v33 = vadd.f32 %v486_v31, %v352_v27  ;;  %v597_v34 = vadd.f32 %v534_v32, %v368_v28  ;;  %v488_v35 = vpop.f32.mrb[1].mxu0  ;;  %v536_v36 = vpop.f32.mrb[1].mxu1 }
 0x134   : > { %v582_v37 = vadd.f32 %v488_v35, %v353_v29  ;;  %v598_v38 = vadd.f32 %v536_v36, %v369_v30  ;;  %v364_v35 = vld [vmem:[#allocation2 + $0x60] sm:$0xff] }
 0x135   : > { %613 = vst [vmem:[#allocation2] sm:$0xff] %v581_v33  ;;  %629 = vst [vmem:[#allocation2 + $0x80] sm:$0xff] %v597_v34  ;;  %v380_v36 = vld [vmem:[#allocation2 + $0xe0] sm:$0xff] }
 0x136   : > { %614 = vst [vmem:[#allocation2 + $0x8] sm:$0xff] %v582_v37  ;;  %630 = vst [vmem:[#allocation2 + $0x88] sm:$0xff] %v598_v38  ;;  %v492_v42 = vpop.f32.mrb[2].mxu0  ;;  %v540_v43 = vpop.f32.mrb[2].mxu1  ;;  %v365_v37 = vld [vmem:[#allocation2 + $0x68] sm:$0xff] }
 0x137   : > { %v583_v44 = vadd.f32 %v492_v42, %v354_v39  ;;  %v599_v45 = vadd.f32 %v540_v43, %v370_v40  ;;  %v494_v46 = vpop.f32.mrb[3].mxu0  ;;  %v542_v47 = vpop.f32.mrb[3].mxu1  ;;  %v381_v38 = vld [vmem:[#allocation2 + $0xe8] sm:$0xff] }
 0x138   : > { %v584_v48 = vadd.f32 %v494_v46, %v355_v41  ;;  %v600_v49 = vadd.f32 %v542_v47, %v371_v5  ;;  %v366_v46 = vld [vmem:[#allocation2 + $0x70] sm:$0xff] }
 0x139   : > { %615 = vst [vmem:[#allocation2 + $0x10] sm:$0xff] %v583_v44  ;;  %631 = vst [vmem:[#allocation2 + $0x90] sm:$0xff] %v599_v45  ;;  %v382_v47 = vld [vmem:[#allocation2 + $0xf0] sm:$0xff] }
 0x13a   : > { %616 = vst [vmem:[#allocation2 + $0x18] sm:$0xff] %v584_v48  ;;  %632 = vst [vmem:[#allocation2 + $0x98] sm:$0xff] %v600_v49  ;;  %v498_v54 = vpop.f32.mrb[4].mxu0  ;;  %v546_v55 = vpop.f32.mrb[4].mxu1  ;;  %v367_v48 = vld [vmem:[#allocation2 + $0x78] sm:$0xff] }
 0x13b   : > { %v585_v56 = vadd.f32 %v498_v54, %v356_v50  ;;  %v601_v57 = vadd.f32 %v546_v55, %v372_v51  ;;  %v500_v58 = vpop.f32.mrb[5].mxu0  ;;  %v548_v59 = vpop.f32.mrb[5].mxu1  ;;  %v383_v49 = vld [vmem:[#allocation2 + $0xf8] sm:$0xff] }
 0x13c   : > { %v586_v60 = vadd.f32 %v500_v58, %v357_v52  ;;  %v602_v61 = vadd.f32 %v548_v59, %v373_v53  ;;  %v752_v58 = vld [vmem:[%s2066_s2 + $0x8] sm:$0xff] (!%p1273_p13)  ;;  %v754_v59 = vld [vmem:[%s2066_s2 + $0x18] sm:$0xff] (!%p1273_p13) }
 0x13d   : > { %617 = vst [vmem:[#allocation2 + $0x20] sm:$0xff] %v585_v56  ;;  %633 = vst [vmem:[#allocation2 + $0xa0] sm:$0xff] %v601_v57 }
 0x13e   : > { %618 = vst [vmem:[#allocation2 + $0x28] sm:$0xff] %v586_v60  ;;  %634 = vst [vmem:[#allocation2 + $0xa8] sm:$0xff] %v602_v61  ;;  %v504_v2 = vpop.f32.mrb[6].mxu0  ;;  %v552_v3 = vpop.f32.mrb[6].mxu1  ;;  %v751_v60 = vld [vmem:[%s2066_s2] sm:$0xff] (!%p1273_p13)  ;;  %v1317_v61 = vpack.c.bf16 (!%p1273_p13), %v754_v59, %v752_v58  ;;  %v789_v58 = vld [vmem:[%s2066_s2 + $0x130] sm:$0xff] (!%p1273_p13) }
 0x13f   : > { %v587_v4 = vadd.f32 %v504_v2, %v358_v62  ;;  %v603_v6 = vadd.f32 %v552_v3, %v374_v63  ;;  %v506_v7 = vpop.f32.mrb[7].mxu0  ;;  %v554_v8 = vpop.f32.mrb[7].mxu1  ;;  %v753_v62 = vld [vmem:[%s2066_s2 + $0x10] sm:$0xff] (!%p1273_p13)  ;;  %v756_v63 = vld [vmem:[%s2066_s2 + $0x28] sm:$0xff] (!%p1273_p13)  ;;  %v755_v3 = vld [vmem:[%s2066_s2 + $0x20] sm:$0xff] (!%p1273_p13) }
 0x140   : > { %v588_v9 = vadd.f32 %v506_v7, %v359_v0  ;;  %v604_v10 = vadd.f32 %v554_v8, %v375_v1  ;;  %v758_v0 = vld [vmem:[%s2066_s2 + $0x38] sm:$0xff] (!%p1273_p13)  ;;  %v1319_v1 = vpack.c.bf16 (!%p1273_p13), %v753_v62, %v751_v60  ;;  %1318 = vmatprep.subr.bf16.mxu0 (!%p1273_p13), %v1317_v61  ;;  %1397 = vmatprep.subr.bf16.mxu1 (!%p1273_p13), %v1317_v61  ;;  %v792_v59 = vld [vmem:[%s2066_s2 + $0x148] sm:$0xff] (!%p1273_p13) }
 0x141   : > { %619 = vst [vmem:[#allocation2 + $0x30] sm:$0xff] %v587_v4  ;;  %635 = vst [vmem:[#allocation2 + $0xb0] sm:$0xff] %v603_v6  ;;  %v1321_v2 = vpack.c.bf16 (!%p1273_p13), %v758_v0, %v756_v63  ;;  %v757_v4 = vld [vmem:[%s2066_s2 + $0x30] sm:$0xff] (!%p1273_p13)  ;;  %v760_v6 = vld [vmem:[%s2066_s2 + $0x48] sm:$0xff] (!%p1273_p13) }
 0x142   : > { %620 = vst [vmem:[#allocation2 + $0x38] sm:$0xff] %v588_v9  ;;  %636 = vst [vmem:[#allocation2 + $0xb8] sm:$0xff] %v604_v10  ;;  %v510_v15 = vpop.f32.mrb[8].mxu0  ;;  %v558_v16 = vpop.f32.mrb[8].mxu1  ;;  %v762_v7 = vld [vmem:[%s2066_s2 + $0x58] sm:$0xff] (!%p1273_p13)  ;;  %1320 = vmatpush1.bf16.msra.mxu0 (!%p1273_p13), %v1319_v1  ;;  %v1323_v8 = vpack.c.bf16 (!%p1273_p13), %v757_v4, %v755_v3  ;;  %1413 = vmatpush1.bf16.msra.mxu1 (!%p1273_p13), %v1319_v1  ;;  %v759_v10 = vld [vmem:[%s2066_s2 + $0x40] sm:$0xff] (!%p1273_p13) }
 0x143   : > { %v589_v17 = vadd.f32 %v510_v15, %v360_v11  ;;  %v605_v18 = vadd.f32 %v558_v16, %v376_v12  ;;  %v512_v19 = vpop.f32.mrb[9].mxu0  ;;  %v560_v20 = vpop.f32.mrb[9].mxu1  ;;  %1322 = vmatprep.subr.bf16.mxu0 (!%p1273_p13), %v1321_v2  ;;  %v1325_v9 = vpack.c.bf16 (!%p1273_p13), %v762_v7, %v760_v6  ;;  %v761_v11 = vld [vmem:[%s2066_s2 + $0x50] sm:$0xff] (!%p1273_p13)  ;;  %1398 = vmatprep.subr.bf16.mxu1 (!%p1273_p13), %v1321_v2  ;;  %v764_v12 = vld [vmem:[%s2066_s2 + $0x68] sm:$0xff] (!%p1273_p13)  ;;  %v763_v16 = vld [vmem:[%s2066_s2 + $0x60] sm:$0xff] (!%p1273_p13) }
 0x144   : > { %v590_v21 = vadd.f32 %v512_v19, %v361_v13  ;;  %v606_v22 = vadd.f32 %v560_v20, %v377_v14  ;;  %v766_v13 = vld [vmem:[%s2066_s2 + $0x78] sm:$0xff] (!%p1273_p13)  ;;  %v1327_v14 = vpack.c.bf16 (!%p1273_p13), %v761_v11, %v759_v10  ;;  %v791_v63 = vld [vmem:[%s2066_s2 + $0x140] sm:$0xff] (!%p1273_p13)  ;;  %v793_v0 = vld [vmem:[%s2066_s2 + $0x150] sm:$0xff] (!%p1273_p13) }
 0x145   : > { %621 = vst [vmem:[#allocation2 + $0x40] sm:$0xff] %v589_v17  ;;  %637 = vst [vmem:[#allocation2 + $0xc0] sm:$0xff] %v605_v18  ;;  %v1329_v15 = vpack.c.bf16 (!%p1273_p13), %v766_v13, %v764_v12  ;;  %v765_v17 = vld [vmem:[%s2066_s2 + $0x70] sm:$0xff] (!%p1273_p13)  ;;  %v768_v18 = vld [vmem:[%s2066_s2 + $0x88] sm:$0xff] (!%p1273_p13)  ;;  %v1359_v3 = vpack.c.bf16 (!%p1273_p13), %v793_v0, %v791_v63 }
 0x146   : > { %622 = vst [vmem:[#allocation2 + $0x48] sm:$0xff] %v590_v21  ;;  %638 = vst [vmem:[#allocation2 + $0xc8] sm:$0xff] %v606_v22  ;;  %v516_v27 = vpop.f32.mrb[10].mxu0  ;;  %v564_v28 = vpop.f32.mrb[10].mxu1  ;;  %1324 = vmatpush1.bf16.msra.mxu0 (!%p1273_p13), %v1323_v8  ;;  %1414 = vmatpush1.bf16.msra.mxu1 (!%p1273_p13), %v1323_v8  ;;  %v770_v19 = vld [vmem:[%s2066_s2 + $0x98] sm:$0xff] (!%p1273_p13)  ;;  %v1331_v20 = vpack.c.bf16 (!%p1273_p13), %v765_v17, %v763_v16  ;;  %v767_v22 = vld [vmem:[%s2066_s2 + $0x80] sm:$0xff] (!%p1273_p13) }
 0x147   : > { %v591_v29 = vadd.f32 %v516_v27, %v362_v23  ;;  %v607_v30 = vadd.f32 %v564_v28, %v378_v24  ;;  %v518_v31 = vpop.f32.mrb[11].mxu0  ;;  %v566_v32 = vpop.f32.mrb[11].mxu1  ;;  %1326 = vmatprep.subr.bf16.mxu0 (!%p1273_p13), %v1325_v9  ;;  %1399 = vmatprep.subr.bf16.mxu1 (!%p1273_p13), %v1325_v9  ;;  %v1333_v21 = vpack.c.bf16 (!%p1273_p13), %v770_v19, %v768_v18  ;;  %v769_v23 = vld [vmem:[%s2066_s2 + $0x90] sm:$0xff] (!%p1273_p13)  ;;  %v772_v24 = vld [vmem:[%s2066_s2 + $0xa8] sm:$0xff] (!%p1273_p13)  ;;  %v771_v28 = vld [vmem:[%s2066_s2 + $0xa0] sm:$0xff] (!%p1273_p13) }
 0x148   : > { %v592_v33 = vadd.f32 %v518_v31, %v363_v25  ;;  %v608_v34 = vadd.f32 %v566_v32, %v379_v26  ;;  %v774_v25 = vld [vmem:[%s2066_s2 + $0xb8] sm:$0xff] (!%p1273_p13)  ;;  %v1335_v26 = vpack.c.bf16 (!%p1273_p13), %v769_v23, %v767_v22  ;;  %v796_v1 = vld [vmem:[%s2066_s2 + $0x168] sm:$0xff] (!%p1273_p13)  ;;  %v795_v6 = vld [vmem:[%s2066_s2 + $0x160] sm:$0xff] (!%p1273_p13) }
 0x149   : > { %623 = vst [vmem:[#allocation2 + $0x50] sm:$0xff] %v591_v29  ;;  %639 = vst [vmem:[#allocation2 + $0xd0] sm:$0xff] %v607_v30  ;;  %v1337_v27 = vpack.c.bf16 (!%p1273_p13), %v774_v25, %v772_v24  ;;  %v773_v29 = vld [vmem:[%s2066_s2 + $0xb0] sm:$0xff] (!%p1273_p13)  ;;  %v776_v30 = vld [vmem:[%s2066_s2 + $0xc8] sm:$0xff] (!%p1273_p13) }
 0x14a   : > { %624 = vst [vmem:[#allocation2 + $0x58] sm:$0xff] %v592_v33  ;;  %640 = vst [vmem:[#allocation2 + $0xd8] sm:$0xff] %v608_v34  ;;  %v522_v39 = vpop.f32.mrb[12].mxu0  ;;  %v570_v40 = vpop.f32.mrb[12].mxu1  ;;  %1328 = vmatpush1.bf16.msra.mxu0 (!%p1273_p13), %v1327_v14  ;;  %1415 = vmatpush1.bf16.msra.mxu1 (!%p1273_p13), %v1327_v14  ;;  %v778_v31 = vld [vmem:[%s2066_s2 + $0xd8] sm:$0xff] (!%p1273_p13)  ;;  %v1339_v32 = vpack.c.bf16 (!%p1273_p13), %v773_v29, %v771_v28  ;;  %v775_v33 = vld [vmem:[%s2066_s2 + $0xc0] sm:$0xff] (!%p1273_p13) }
 0x14b   : > { %v593_v41 = vadd.f32 %v522_v39, %v364_v35  ;;  %v609_v5 = vadd.f32 %v570_v40, %v380_v36  ;;  %v524_v42 = vpop.f32.mrb[13].mxu0  ;;  %v572_v43 = vpop.f32.mrb[13].mxu1  ;;  %1330 = vmatprep.subr.bf16.mxu0 (!%p1273_p13), %v1329_v15  ;;  %1400 = vmatprep.subr.bf16.mxu1 (!%p1273_p13), %v1329_v15  ;;  %v1341_v34 = vpack.c.bf16 (!%p1273_p13), %v778_v31, %v776_v30  ;;  %v777_v35 = vld [vmem:[%s2066_s2 + $0xd0] sm:$0xff] (!%p1273_p13)  ;;  %v656_v36 = vld [vmem:[%s1790_s8 + $0x8] sm:$0xff] (!%p1273_p13)  ;;  %v782_v39 = vld [vmem:[%s2066_s2 + $0xf8] sm:$0xff] (!%p1273_p13) }
 0x14c   : > { %v594_v44 = vadd.f32 %v524_v42, %v365_v37  ;;  %v610_v45 = vadd.f32 %v572_v43, %v381_v38  ;;  %648 = sbr.rel (%p1273_p13) target bundleno = 662 (0x296), region = 78  ;;  %v688_v37 = vld [vmem:[#allocation2 + $0x8] sm:$0xff] (!%p1273_p13)  ;;  %v779_v42 = vld [vmem:[%s2066_s2 + $0xe0] sm:$0xff] (!%p1273_p13)  ;;  %v781_v43 = vld [vmem:[%s2066_s2 + $0xf0] sm:$0xff] (!%p1273_p13) }
 0x14d   : > { %625 = vst [vmem:[#allocation2 + $0x60] sm:$0xff] %v593_v41  ;;  %641 = vst [vmem:[#allocation2 + $0xe0] sm:$0xff] %v609_v5  ;;  %v780_v38 = vld [vmem:[%s2066_s2 + $0xe8] sm:$0xff] (!%p1273_p13)  ;;  %v720_v40 = vadd.f32 (!%p1273_p13), %v688_v37, %v656_v36  ;;  %v1343_v41 = vpack.c.bf16 (!%p1273_p13), %v777_v35, %v775_v33  ;;  %v794_v60 = vld [vmem:[%s2066_s2 + $0x158] sm:$0xff] (!%p1273_p13) }
 0x14e   : > { %626 = vst [vmem:[#allocation2 + $0x68] sm:$0xff] %v594_v44  ;;  %642 = vst [vmem:[#allocation2 + $0xe8] sm:$0xff] %v610_v45  ;;  %v528_v50 = vpop.f32.mrb[14].mxu0  ;;  %v576_v51 = vpop.f32.mrb[14].mxu1  ;;  %1332 = vmatpush1.bf16.msra.mxu0 (!%p1273_p13), %v1331_v20  ;;  %1416 = vmatpush1.bf16.msra.mxu1 (!%p1273_p13), %v1331_v20  ;;  %v1345_v5 = vpack.c.bf16 (!%p1273_p13), %v782_v39, %v780_v38  ;;  %v784_v44 = vld [vmem:[%s2066_s2 + $0x108] sm:$0xff] (!%p1273_p13)  ;;  %v786_v45 = vld [vmem:[%s2066_s2 + $0x118] sm:$0xff] (!%p1273_p13)  ;;  %v1357_v62 = vpack.c.bf16 (!%p1273_p13), %v794_v60, %v792_v59 }
 0x14f   : > { %v595_v52 = vadd.f32 %v528_v50, %v366_v46  ;;  %v611_v53 = vadd.f32 %v576_v51, %v382_v47  ;;  %v530_v54 = vpop.f32.mrb[15].mxu0  ;;  %v578_v55 = vpop.f32.mrb[15].mxu1  ;;  %1334 = vmatprep.subr.bf16.mxu0 (!%p1273_p13), %v1333_v21  ;;  %1401 = vmatprep.subr.bf16.mxu1 (!%p1273_p13), %v1333_v21  ;;  %v672_v46 = vld [vmem:[%s1790_s8 + $0x88] sm:$0xff] (!%p1273_p13)  ;;  %v1349_v50 = vpack.c.bf16 (!%p1273_p13), %v786_v45, %v784_v44  ;;  %v783_v51 = vld [vmem:[%s2066_s2 + $0x100] sm:$0xff] (!%p1273_p13)  ;;  %v798_v2 = vld [vmem:[%s2066_s2 + $0x178] sm:$0xff] (!%p1273_p13) }
 0x150   : > { %v596_v56 = vadd.f32 %v530_v54, %v367_v48  ;;  %v612_v57 = vadd.f32 %v578_v55, %v383_v49  ;;  %879 = vmatprep.mubr.f32.mxu0 (!%p1273_p13), %v720_v40  ;;  %v704_v47 = vld [vmem:[#allocation2 + $0x88] sm:$0xff] (!%p1273_p13)  ;;  %v1347_v48 = vpack.c.bf16 (!%p1273_p13), %v781_v43, %v779_v42  ;;  %v790_v54 = vld [vmem:[%s2066_s2 + $0x138] sm:$0xff] (!%p1273_p13)  ;;  %v1361_v4 = vpack.c.bf16 (!%p1273_p13), %v798_v2, %v796_v1  ;;  %v797_v7 = vld [vmem:[%s2066_s2 + $0x170] sm:$0xff] (!%p1273_p13) }
 0x151   : > { %627 = vst [vmem:[#allocation2 + $0x70] sm:$0xff] %v595_v52  ;;  %643 = vst [vmem:[#allocation2 + $0xf0] sm:$0xff] %v611_v53  ;;  %v736_v49 = vadd.f32 (!%p1273_p13), %v704_v47, %v672_v46  ;;  %v785_v52 = vld [vmem:[%s2066_s2 + $0x110] sm:$0xff] (!%p1273_p13)  ;;  %v788_v53 = vld [vmem:[%s2066_s2 + $0x128] sm:$0xff] (!%p1273_p13)  ;;  %v1363_v10 = vpack.c.bf16 (!%p1273_p13), %v797_v7, %v795_v6 }
 0x152   : > { %628 = vst [vmem:[#allocation2 + $0x78] sm:$0xff] %v596_v56  ;;  %644 = vst [vmem:[#allocation2 + $0xf8] sm:$0xff] %v612_v57  ;;  %1336 = vmatpush1.bf16.msra.mxu0 (!%p1273_p13), %v1335_v26  ;;  %1417 = vmatpush1.bf16.msra.mxu1 (!%p1273_p13), %v1335_v26  ;;  %v1351_v55 = vpack.c.bf16 (!%p1273_p13), %v785_v52, %v783_v51  ;;  %v1353_v56 = vpack.c.bf16 (!%p1273_p13), %v790_v54, %v788_v53  ;;  %v787_v57 = vld [vmem:[%s2066_s2 + $0x120] sm:$0xff] (!%p1273_p13)  ;;  %v800_v8 = vld [vmem:[%s2066_s2 + $0x188] sm:$0xff] (!%p1273_p13) }
 0x153   : > { %1338 = vmatprep.subr.bf16.mxu0 %v1337_v27  ;;  %1402 = vmatprep.subr.bf16.mxu1 %v1337_v27  ;;  %v1355_v61 = vpack.c.bf16 %v789_v58, %v787_v57  ;;  %v802_v9 = vld [vmem:[%s2066_s2 + $0x198] sm:$0xff]  ;;  %v799_v12 = vld [vmem:[%s2066_s2 + $0x180] sm:$0xff]  ;;  %v801_v13 = vld [vmem:[%s2066_s2 + $0x190] sm:$0xff] }
 0x154   : > { %927 = vmatprep.mubr.f32.mxu1 %v736_v49  ;;  %v1365_v11 = vpack.c.bf16 %v802_v9, %v800_v8  ;;  %v804_v14 = vld [vmem:[%s2066_s2 + $0x1a8] sm:$0xff]  ;;  %v806_v15 = vld [vmem:[%s2066_s2 + $0x1b8] sm:$0xff]  ;;  %v1367_v16 = vpack.c.bf16 %v801_v13, %v799_v12  ;;  %v803_v18 = vld [vmem:[%s2066_s2 + $0x1a0] sm:$0xff] }
 0x155   : > { %v1369_v17 = vpack.c.bf16 %v806_v15, %v804_v14  ;;  %v805_v19 = vld [vmem:[%s2066_s2 + $0x1b0] sm:$0xff]  ;;  %v808_v20 = vld [vmem:[%s2066_s2 + $0x1c8] sm:$0xff]  ;;  %v810_v21 = vld [vmem:[%s2066_s2 + $0x1d8] sm:$0xff] }
 0x156   : > { %1340 = vmatpush1.bf16.msra.mxu0 %v1339_v32  ;;  %1418 = vmatpush1.bf16.msra.mxu1 %v1339_v32  ;;  %v1371_v22 = vpack.c.bf16 %v805_v19, %v803_v18  ;;  %v1373_v23 = vpack.c.bf16 %v810_v21, %v808_v20  ;;  %v807_v24 = vld [vmem:[%s2066_s2 + $0x1c0] sm:$0xff]  ;;  %v809_v25 = vld [vmem:[%s2066_s2 + $0x1d0] sm:$0xff]  ;;  %v812_v26 = vld [vmem:[%s2066_s2 + $0x1e8] sm:$0xff] }
 0x157   : > { %1342 = vmatprep.subr.bf16.mxu0 %v1341_v34  ;;  %1403 = vmatprep.subr.bf16.mxu1 %v1341_v34  ;;  %v814_v27 = vld [vmem:[%s2066_s2 + $0x1f8] sm:$0xff]  ;;  %v1375_v28 = vpack.c.bf16 %v809_v25, %v807_v24  ;;  %v811_v30 = vld [vmem:[%s2066_s2 + $0x1e0] sm:$0xff]  ;;  %v813_v31 = vld [vmem:[%s2066_s2 + $0x1f0] sm:$0xff] }
 0x158   : > { %v1377_v29 = vpack.c.bf16 %v814_v27, %v812_v26  ;;  %v655_v32 = vld [vmem:[%s1790_s8] sm:$0xff]  ;;  %v1379_v34 = vpack.c.bf16 %v813_v31, %v811_v30  ;;  %v658_v35 = vld [vmem:[%s1790_s8 + $0x18] sm:$0xff]  ;;  %v689_v42 = vld [vmem:[#allocation2 + $0x10] sm:$0xff] }
 0x159   : > { %v687_v33 = vld [vmem:[#allocation2] sm:$0xff]  ;;  %v690_v38 = vld [vmem:[#allocation2 + $0x18] sm:$0xff]  ;;  %v660_v45 = vld [vmem:[%s1790_s8 + $0x28] sm:$0xff] }
 0x15a   : > { %1344 = vmatpush1.bf16.msra.mxu0 %v1343_v41  ;;  %1419 = vmatpush1.bf16.msra.mxu1 %v1343_v41  ;;  %v671_v36 = vld [vmem:[%s1790_s8 + $0x80] sm:$0xff]  ;;  %v674_v39 = vld [vmem:[%s1790_s8 + $0x98] sm:$0xff]  ;;  %v719_v41 = vadd.f32 %v687_v33, %v655_v32  ;;  %v722_v44 = vadd.f32 %v690_v38, %v658_v35  ;;  %v673_v47 = vld [vmem:[%s1790_s8 + $0x90] sm:$0xff] }
 0x15b   : > { %1346 = vmatprep.subr.bf16.mxu0 %v1345_v5  ;;  %1404 = vmatprep.subr.bf16.mxu1 %v1345_v5  ;;  %v703_v37 = vld [vmem:[#allocation2 + $0x80] sm:$0xff]  ;;  %v706_v40 = vld [vmem:[#allocation2 + $0x98] sm:$0xff]  ;;  %v657_v5 = vld [vmem:[%s1790_s8 + $0x10] sm:$0xff] }
 0x15c   : > { %v735_v43 = vadd.f32 %v703_v37, %v671_v36  ;;  %v738_v46 = vadd.f32 %v706_v40, %v674_v39  ;;  %v692_v49 = vld [vmem:[#allocation2 + $0x28] sm:$0xff]  ;;  %v721_v52 = vadd.f32 %v689_v42, %v657_v5  ;;  %v659_v53 = vld [vmem:[%s1790_s8 + $0x20] sm:$0xff]  ;;  %v662_v57 = vld [vmem:[%s1790_s8 + $0x38] sm:$0xff] }
 0x15d   : > { %v708_v51 = vld [vmem:[#allocation2 + $0xa8] sm:$0xff]  ;;  %v691_v54 = vld [vmem:[#allocation2 + $0x20] sm:$0xff]  ;;  %v710_v63 = vld [vmem:[#allocation2 + $0xb8] sm:$0xff] }
 0x15e   : > { %1348 = vmatpush1.bf16.msra.mxu0 %v1347_v48  ;;  %1420 = vmatpush1.bf16.msra.mxu1 %v1347_v48  ;;  %v705_v48 = vld [vmem:[#allocation2 + $0x90] sm:$0xff]  ;;  %v675_v59 = vld [vmem:[%s1790_s8 + $0xa0] sm:$0xff]  ;;  %v723_v0 = vadd.f32 %v691_v54, %v659_v53  ;;  %v664_v6 = vld [vmem:[%s1790_s8 + $0x48] sm:$0xff] }
 0x15f   : > { %1350 = vmatprep.subr.bf16.mxu0 %v1349_v50  ;;  %1405 = vmatprep.subr.bf16.mxu1 %v1349_v50  ;;  %v676_v50 = vld [vmem:[%s1790_s8 + $0xa8] sm:$0xff]  ;;  %v707_v60 = vld [vmem:[#allocation2 + $0xa0] sm:$0xff]  ;;  %v661_v1 = vld [vmem:[%s1790_s8 + $0x30] sm:$0xff] }
 0x160   : > { %v740_v58 = vadd.f32 %v708_v51, %v676_v50  ;;  %v693_v2 = vld [vmem:[#allocation2 + $0x30] sm:$0xff]  ;;  %v712_v12 = vld [vmem:[#allocation2 + $0xc8] sm:$0xff]  ;;  %v663_v14 = vld [vmem:[%s1790_s8 + $0x40] sm:$0xff] }
 0x161   : > { %v677_v8 = vld [vmem:[%s1790_s8 + $0xb0] sm:$0xff]  ;;  %v725_v13 = vadd.f32 %v693_v2, %v661_v1  ;;  %v695_v15 = vld [vmem:[#allocation2 + $0x40] sm:$0xff]  ;;  %v666_v18 = vld [vmem:[%s1790_s8 + $0x58] sm:$0xff] }
 0x162   : > { %1352 = vmatpush1.bf16.msra.mxu0 %v1351_v55  ;;  %1421 = vmatpush1.bf16.msra.mxu1 %v1351_v55  ;;  %v737_v55 = vadd.f32 %v705_v48, %v673_v47  ;;  %v709_v9 = vld [vmem:[#allocation2 + $0xb0] sm:$0xff]  ;;  %v679_v20 = vld [vmem:[%s1790_s8 + $0xc0] sm:$0xff]  ;;  %v714_v24 = vld [vmem:[#allocation2 + $0xd8] sm:$0xff]  ;;  %v727_v25 = vadd.f32 %v695_v15, %v663_v14 }
 0x163   : > { %1354 = vmatprep.subr.bf16.mxu0 %v1353_v56  ;;  %1406 = vmatprep.subr.bf16.mxu1 %v1353_v56  ;;  %v724_v56 = vadd.f32 %v692_v49, %v660_v45  ;;  %v711_v21 = vld [vmem:[#allocation2 + $0xc0] sm:$0xff]  ;;  %v665_v26 = vld [vmem:[%s1790_s8 + $0x50] sm:$0xff]  ;;  %v668_v30 = vld [vmem:[%s1790_s8 + $0x68] sm:$0xff] }
 0x164   : > { %v697_v27 = vld [vmem:[#allocation2 + $0x50] sm:$0xff]  ;;  %v684_v35 = vld [vmem:[%s1790_s8 + $0xe8] sm:$0xff]  ;;  %v667_v38 = vld [vmem:[%s1790_s8 + $0x60] sm:$0xff] }
 0x165   : > { %v681_v32 = vld [vmem:[%s1790_s8 + $0xd0] sm:$0xff]  ;;  %v716_v36 = vld [vmem:[#allocation2 + $0xe8] sm:$0xff]  ;;  %v729_v37 = vadd.f32 %v697_v27, %v665_v26  ;;  %v699_v39 = vld [vmem:[#allocation2 + $0x60] sm:$0xff] }
 0x166   : > { %1356 = vmatpush1.bf16.msra.mxu0 %v1355_v61  ;;  %1422 = vmatpush1.bf16.msra.mxu1 %v1355_v61  ;;  %v694_v61 = vld [vmem:[#allocation2 + $0x38] sm:$0xff]  ;;  %v713_v33 = vld [vmem:[#allocation2 + $0xd0] sm:$0xff]  ;;  %v748_v42 = vadd.f32 %v716_v36, %v684_v35  ;;  %v731_v48 = vadd.f32 %v699_v39, %v667_v38 }
 0x167   : > { %1358 = vmatprep.subr.bf16.mxu0 %v1357_v62  ;;  %1407 = vmatprep.subr.bf16.mxu1 %v1357_v62  ;;  %v678_v62 = vld [vmem:[%s1790_s8 + $0xb8] sm:$0xff]  ;;  %v745_v40 = vadd.f32 %v713_v33, %v681_v32  ;;  %v669_v49 = vld [vmem:[%s1790_s8 + $0x70] sm:$0xff] }
 0x168   : > { %v742_v7 = vadd.f32 %v710_v63, %v678_v62  ;;  %v670_v5 = vld [vmem:[%s1790_s8 + $0x78] sm:$0xff]  ;;  %v685_v54 = vld [vmem:[%s1790_s8 + $0xf0] sm:$0xff] }
 0x169   : > { %v702_v45 = vld [vmem:[#allocation2 + $0x78] sm:$0xff] }
 0x16a   : > { %1360 = vmatpush1.bf16.msra.mxu0 %v1359_v3  ;;  %1423 = vmatpush1.bf16.msra.mxu1 %v1359_v3  ;;  %v739_v3 = vadd.f32 %v707_v60, %v675_v59  ;;  %v718_v47 = vld [vmem:[#allocation2 + $0xf8] sm:$0xff]  ;;  %v734_v51 = vadd.f32 %v702_v45, %v670_v5 }
 0x16b   : > { %1362 = vmatprep.subr.bf16.mxu0 %v1361_v4  ;;  %1408 = vmatprep.subr.bf16.mxu1 %v1361_v4  ;;  %v726_v4 = vadd.f32 %v694_v61, %v662_v57 }
 0x16e   : > { %1364 = vmatpush1.bf16.msra.mxu0 %v1363_v10  ;;  %1424 = vmatpush1.bf16.msra.mxu1 %v1363_v10  ;;  %v696_v10 = vld [vmem:[#allocation2 + $0x48] sm:$0xff] }
 0x16f   : > { %1366 = vmatprep.subr.bf16.mxu0 %v1365_v11  ;;  %1409 = vmatprep.subr.bf16.mxu1 %v1365_v11  ;;  %v680_v11 = vld [vmem:[%s1790_s8 + $0xc8] sm:$0xff] }
 0x170   : > { %v744_v19 = vadd.f32 %v712_v12, %v680_v11 }
 0x172   : > { %1368 = vmatpush1.bf16.msra.mxu0 %v1367_v16  ;;  %1425 = vmatpush1.bf16.msra.mxu1 %v1367_v16  ;;  %v741_v16 = vadd.f32 %v709_v9, %v677_v8 }
 0x173   : > { %1370 = vmatprep.subr.bf16.mxu0 %v1369_v17  ;;  %1410 = vmatprep.subr.bf16.mxu1 %v1369_v17  ;;  %v728_v17 = vadd.f32 %v696_v10, %v664_v6 }
 0x176   : > { %1372 = vmatpush1.bf16.msra.mxu0 %v1371_v22  ;;  %1426 = vmatpush1.bf16.msra.mxu1 %v1371_v22  ;;  %v698_v22 = vld [vmem:[#allocation2 + $0x58] sm:$0xff] }
 0x177   : > { %1374 = vmatprep.subr.bf16.mxu0 %v1373_v23  ;;  %1411 = vmatprep.subr.bf16.mxu1 %v1373_v23  ;;  %v682_v23 = vld [vmem:[%s1790_s8 + $0xd8] sm:$0xff] }
 0x178   : > { %v746_v31 = vadd.f32 %v714_v24, %v682_v23 }
 0x17a   : > { %1376 = vmatpush1.bf16.msra.mxu0 %v1375_v28  ;;  %1427 = vmatpush1.bf16.msra.mxu1 %v1375_v28  ;;  %v743_v28 = vadd.f32 %v711_v21, %v679_v20 }
 0x17b   : > { %1378 = vmatprep.subr.bf16.mxu0 %v1377_v29  ;;  %1412 = vmatprep.subr.bf16.mxu1 %v1377_v29  ;;  %v730_v29 = vadd.f32 %v698_v22, %v666_v18 }
 0x17e   : > { %1380 = vmatpush1.bf16.msra.mxu0 %v1379_v34  ;;  %1428 = vmatpush1.bf16.msra.mxu1 %v1379_v34  ;;  %v700_v34 = vld [vmem:[#allocation2 + $0x68] sm:$0xff] }
 0x181   : > { %880 = vmatmul.mubr.f32.vlgmr.msra.gmra.mrb[0].mxu0 %v719_v41  ;;  %928 = vmatmul.mubr.f32.vlgmr.msra.gmra.mrb[0].mxu1 %v735_v43  ;;  %v732_v41 = vadd.f32 %v700_v34, %v668_v30  ;;  %v683_v43 = vld [vmem:[%s1790_s8 + $0xe0] sm:$0xff] }
 0x182   : > { %885 = vmatprep.mubr.f32.mxu0 %v722_v44  ;;  %933 = vmatprep.mubr.f32.mxu1 %v738_v46  ;;  %v715_v44 = vld [vmem:[#allocation2 + $0xe0] sm:$0xff]  ;;  %v686_v46 = vld [vmem:[%s1790_s8 + $0xf8] sm:$0xff] }
 0x183   : > { %v747_v50 = vadd.f32 %v715_v44, %v683_v43  ;;  %v750_v53 = vadd.f32 %v718_v47, %v686_v46 }
 0x185   : > { %886 = vmatmul.mubr.f32.gmra.mrb[2].mxu0 %v721_v52  ;;  %934 = vmatmul.mubr.f32.gmra.mrb[2].mxu1 %v737_v55  ;;  %v701_v52 = vld [vmem:[#allocation2 + $0x70] sm:$0xff] }
 0x186   : > { %891 = vmatprep.mubr.f32.mxu0 %v724_v56  ;;  %939 = vmatprep.mubr.f32.mxu1 %v740_v58  ;;  %v717_v55 = vld [vmem:[#allocation2 + $0xf0] sm:$0xff]  ;;  %v733_v56 = vadd.f32 %v701_v52, %v669_v49 }
 0x187   : > { %v749_v57 = vadd.f32 %v717_v55, %v685_v54 }
 0x189   : > { %892 = vmatmul.mubr.f32.gmra.mrb[4].mxu0 %v723_v0  ;;  %940 = vmatmul.mubr.f32.gmra.mrb[4].mxu1 %v739_v3 }
 0x18a   : > { %897 = vmatprep.mubr.f32.mxu0 %v726_v4  ;;  %945 = vmatprep.mubr.f32.mxu1 %v742_v7 }
 0x18d   : > { %898 = vmatmul.mubr.f32.gmra.mrb[6].mxu0 %v725_v13  ;;  %946 = vmatmul.mubr.f32.gmra.mrb[6].mxu1 %v741_v16 }
 0x18e   : > { %903 = vmatprep.mubr.f32.mxu0 %v728_v17  ;;  %951 = vmatprep.mubr.f32.mxu1 %v744_v19 }
 0x191   : > { %904 = vmatmul.mubr.f32.gmra.mrb[8].mxu0 %v727_v25  ;;  %952 = vmatmul.mubr.f32.gmra.mrb[8].mxu1 %v743_v28 }
 0x192   : > { %909 = vmatprep.mubr.f32.mxu0 %v730_v29  ;;  %957 = vmatprep.mubr.f32.mxu1 %v746_v31 }
 0x195   : > { %910 = vmatmul.mubr.f32.gmra.mrb[10].mxu0 %v729_v37  ;;  %958 = vmatmul.mubr.f32.gmra.mrb[10].mxu1 %v745_v40 }
 0x196   : > { %915 = vmatprep.mubr.f32.mxu0 %v732_v41  ;;  %963 = vmatprep.mubr.f32.mxu1 %v748_v42 }
 0x199   : > { %916 = vmatmul.mubr.f32.gmra.mrb[12].mxu0 %v731_v48  ;;  %964 = vmatmul.mubr.f32.gmra.mrb[12].mxu1 %v747_v50 }
 0x19a   : > { %921 = vmatprep.mubr.f32.mxu0 %v734_v51  ;;  %969 = vmatprep.mubr.f32.mxu1 %v750_v53 }
 0x19d   : > { %922 = vmatmul.mubr.f32.gmra.mrb[14].mxu0 %v733_v56  ;;  %970 = vmatmul.mubr.f32.gmra.mrb[14].mxu1 %v749_v57 }
 0x254   : > { %v881_v58 = vpop.f32.mrb[0].mxu0  ;;  %v1938_v59 = vpop.f32.mrb[0].mxu1 }
 0x255   : > { %976 = vst [vmem:[%s1639_s29] sm:$0xff] %v881_v58  ;;  %v883_v60 = vpop.f32.mrb[1].mxu0  ;;  %992 = vst [vmem:[%s1639_s29 + $0x80] sm:$0xff] %v1938_v59  ;;  %v1943_v61 = vpop.f32.mrb[1].mxu1  ;;  %v1050_v0 = vmul.f32 %v881_v58, %v881_v58 }
 0x256   : > { %977 = vst [vmem:[%s1639_s29 + $0x8] sm:$0xff] %v883_v60  ;;  %993 = vst [vmem:[%s1639_s29 + $0x88] sm:$0xff] %v1943_v61  ;;  %v1051_v6 = vmul.f32 %v883_v60, %v883_v60 }
 0x258   : > { %v887_v62 = vpop.f32.mrb[2].mxu0  ;;  %v1948_v63 = vpop.f32.mrb[2].mxu1 }
 0x259   : > { %978 = vst [vmem:[%s1639_s29 + $0x10] sm:$0xff] %v887_v62  ;;  %v1008_v1 = vadd.f32 %v887_v62, %v881_v58  ;;  %v1052_v2 = vmul.f32 %v887_v62, %v887_v62  ;;  %v889_v3 = vpop.f32.mrb[3].mxu0  ;;  %994 = vst [vmem:[%s1639_s29 + $0x90] sm:$0xff] %v1948_v63  ;;  %v1953_v4 = vpop.f32.mrb[3].mxu1 }
 0x25a   : > { %979 = vst [vmem:[%s1639_s29 + $0x18] sm:$0xff] %v889_v3  ;;  %v1029_v7 = vadd.f32 %v889_v3, %v883_v60  ;;  %v1053_v8 = vmul.f32 %v889_v3, %v889_v3  ;;  %995 = vst [vmem:[%s1639_s29 + $0x98] sm:$0xff] %v1953_v4 }
 0x25b   : > { %v1082_v9 = vadd.f32 %v1052_v2, %v1050_v0 }
 0x25c   : > { %v1103_v10 = vadd.f32 %v1053_v8, %v1051_v6  ;;  %v893_v11 = vpop.f32.mrb[4].mxu0  ;;  %v1958_v12 = vpop.f32.mrb[4].mxu1 }
 0x25d   : > { %980 = vst [vmem:[%s1639_s29 + $0x20] sm:$0xff] %v893_v11  ;;  %v1009_v13 = vadd.f32 %v1008_v1, %v893_v11  ;;  %v1054_v14 = vmul.f32 %v893_v11, %v893_v11  ;;  %v895_v15 = vpop.f32.mrb[5].mxu0  ;;  %996 = vst [vmem:[%s1639_s29 + $0xa0] sm:$0xff] %v1958_v12  ;;  %v1963_v16 = vpop.f32.mrb[5].mxu1 }
 0x25e   : > { %981 = vst [vmem:[%s1639_s29 + $0x28] sm:$0xff] %v895_v15  ;;  %v1030_v17 = vadd.f32 %v1029_v7, %v895_v15  ;;  %v1055_v18 = vmul.f32 %v895_v15, %v895_v15  ;;  %997 = vst [vmem:[%s1639_s29 + $0xa8] sm:$0xff] %v1963_v16 }
 0x25f   : > { %v1083_v19 = vadd.f32 %v1082_v9, %v1054_v14  ;;  %v1066_v9 = vmul.f32 %v1938_v59, %v1938_v59 }
 0x260   : > { %v1104_v20 = vadd.f32 %v1103_v10, %v1055_v18  ;;  %v899_v21 = vpop.f32.mrb[6].mxu0  ;;  %v1968_v22 = vpop.f32.mrb[6].mxu1 }
 0x261   : > { %982 = vst [vmem:[%s1639_s29 + $0x30] sm:$0xff] %v899_v21  ;;  %v1010_v23 = vadd.f32 %v1009_v13, %v899_v21  ;;  %v1056_v24 = vmul.f32 %v899_v21, %v899_v21  ;;  %v901_v25 = vpop.f32.mrb[7].mxu0  ;;  %998 = vst [vmem:[%s1639_s29 + $0xb0] sm:$0xff] %v1968_v22  ;;  %v1973_v26 = vpop.f32.mrb[7].mxu1  ;;  %v1067_v13 = vmul.f32 %v1943_v61, %v1943_v61 }
 0x262   : > { %983 = vst [vmem:[%s1639_s29 + $0x38] sm:$0xff] %v901_v25  ;;  %v1031_v27 = vadd.f32 %v1030_v17, %v901_v25  ;;  %v1057_v28 = vmul.f32 %v901_v25, %v901_v25  ;;  %999 = vst [vmem:[%s1639_s29 + $0xb8] sm:$0xff] %v1973_v26  ;;  %v1068_v17 = vmul.f32 %v1948_v63, %v1948_v63 }
 0x263   : > { %v1084_v29 = vadd.f32 %v1083_v19, %v1056_v24 }
 0x264   : > { %v1105_v30 = vadd.f32 %v1104_v20, %v1057_v28  ;;  %v905_v31 = vpop.f32.mrb[8].mxu0  ;;  %v1978_v32 = vpop.f32.mrb[8].mxu1  ;;  %v1069_v20 = vmul.f32 %v1953_v4, %v1953_v4 }
 0x265   : > { %984 = vst [vmem:[%s1639_s29 + $0x40] sm:$0xff] %v905_v31  ;;  %v1011_v33 = vadd.f32 %v1010_v23, %v905_v31  ;;  %v1058_v34 = vmul.f32 %v905_v31, %v905_v31  ;;  %v907_v35 = vpop.f32.mrb[9].mxu0  ;;  %1000 = vst [vmem:[%s1639_s29 + $0xc0] sm:$0xff] %v1978_v32  ;;  %v1983_v36 = vpop.f32.mrb[9].mxu1 }
 0x266   : > { %985 = vst [vmem:[%s1639_s29 + $0x48] sm:$0xff] %v907_v35  ;;  %v1032_v37 = vadd.f32 %v1031_v27, %v907_v35  ;;  %v1059_v38 = vmul.f32 %v907_v35, %v907_v35  ;;  %1001 = vst [vmem:[%s1639_s29 + $0xc8] sm:$0xff] %v1983_v36 }
 0x267   : > { %v1085_v39 = vadd.f32 %v1084_v29, %v1058_v34  ;;  %v1074_v34 = vmul.f32 %v1978_v32, %v1978_v32 }
 0x268   : > { %v1106_v40 = vadd.f32 %v1105_v30, %v1059_v38  ;;  %v911_v41 = vpop.f32.mrb[10].mxu0  ;;  %v1988_v5 = vpop.f32.mrb[10].mxu1 }
 0x269   : > { %986 = vst [vmem:[%s1639_s29 + $0x50] sm:$0xff] %v911_v41  ;;  %v1012_v42 = vadd.f32 %v1011_v33, %v911_v41  ;;  %v1060_v43 = vmul.f32 %v911_v41, %v911_v41  ;;  %v913_v44 = vpop.f32.mrb[11].mxu0  ;;  %1002 = vst [vmem:[%s1639_s29 + $0xd0] sm:$0xff] %v1988_v5  ;;  %v1993_v45 = vpop.f32.mrb[11].mxu1 }
 0x26a   : > { %987 = vst [vmem:[%s1639_s29 + $0x58] sm:$0xff] %v913_v44  ;;  %v1033_v46 = vadd.f32 %v1032_v37, %v913_v44  ;;  %v1061_v47 = vmul.f32 %v913_v44, %v913_v44  ;;  %1003 = vst [vmem:[%s1639_s29 + $0xd8] sm:$0xff] %v1993_v45  ;;  %v1075_v37 = vmul.f32 %v1983_v36, %v1983_v36 }
 0x26b   : > { %v1086_v48 = vadd.f32 %v1085_v39, %v1060_v43 }
 0x26c   : > { %v1107_v49 = vadd.f32 %v1106_v40, %v1061_v47  ;;  %v917_v50 = vpop.f32.mrb[12].mxu0  ;;  %v965_v51 = vpop.f32.mrb[12].mxu1  ;;  %v1076_v40 = vmul.f32 %v1988_v5, %v1988_v5 }
 0x26d   : > { %988 = vst [vmem:[%s1639_s29 + $0x60] sm:$0xff] %v917_v50  ;;  %v1013_v52 = vadd.f32 %v1012_v42, %v917_v50  ;;  %v1062_v53 = vmul.f32 %v917_v50, %v917_v50  ;;  %v919_v54 = vpop.f32.mrb[13].mxu0  ;;  %1004 = vst [vmem:[%s1639_s29 + $0xe0] sm:$0xff] %v965_v51  ;;  %v967_v55 = vpop.f32.mrb[13].mxu1  ;;  %v1077_v42 = vmul.f32 %v1993_v45, %v1993_v45 }
 0x26e   : > { %989 = vst [vmem:[%s1639_s29 + $0x68] sm:$0xff] %v919_v54  ;;  %v1034_v56 = vadd.f32 %v1033_v46, %v919_v54  ;;  %v1063_v57 = vmul.f32 %v919_v54, %v919_v54  ;;  %1005 = vst [vmem:[%s1639_s29 + $0xe8] sm:$0xff] %v967_v55  ;;  %v1078_v44 = vmul.f32 %v965_v51, %v965_v51 }
 0x26f   : > { %v1087_v58 = vadd.f32 %v1086_v48, %v1062_v53 }
 0x270   : > { %v1108_v60 = vadd.f32 %v1107_v49, %v1063_v57  ;;  %v923_v62 = vpop.f32.mrb[14].mxu0  ;;  %v971_v0 = vpop.f32.mrb[14].mxu1 }
 0x271   : > { %990 = vst [vmem:[%s1639_s29 + $0x70] sm:$0xff] %v923_v62  ;;  %v1014_v1 = vadd.f32 %v1013_v52, %v923_v62  ;;  %v1064_v2 = vmul.f32 %v923_v62, %v923_v62  ;;  %v925_v3 = vpop.f32.mrb[15].mxu0  ;;  %1006 = vst [vmem:[%s1639_s29 + $0xf0] sm:$0xff] %v971_v0  ;;  %v973_v6 = vpop.f32.mrb[15].mxu1  ;;  %v1080_v46 = vmul.f32 %v971_v0, %v971_v0 }
 0x272   : > { %991 = vst [vmem:[%s1639_s29 + $0x78] sm:$0xff] %v925_v3  ;;  %v1035_v7 = vadd.f32 %v1034_v56, %v925_v3  ;;  %v1065_v8 = vmul.f32 %v925_v3, %v925_v3  ;;  %1007 = vst [vmem:[%s1639_s29 + $0xf8] sm:$0xff] %v973_v6  ;;  %v1081_v49 = vmul.f32 %v973_v6, %v973_v6 }
 0x273   : > { %v1015_v10 = vadd.f32 %v1014_v1, %v1938_v59  ;;  %v1088_v11 = vadd.f32 %v1087_v58, %v1064_v2  ;;  %v1070_v59 = vmul.f32 %v1958_v12, %v1958_v12 }
 0x274   : > { %v1036_v14 = vadd.f32 %v1035_v7, %v1943_v61  ;;  %v1109_v15 = vadd.f32 %v1108_v60, %v1065_v8  ;;  %v1071_v61 = vmul.f32 %v1963_v16, %v1963_v16 }
 0x275   : > { %v1016_v18 = vadd.f32 %v1015_v10, %v1948_v63  ;;  %v1089_v19 = vadd.f32 %v1088_v11, %v1066_v9  ;;  %v1072_v63 = vmul.f32 %v1968_v22, %v1968_v22 }
 0x276   : > { %v1037_v21 = vadd.f32 %v1036_v14, %v1953_v4  ;;  %v1110_v23 = vadd.f32 %v1109_v15, %v1067_v13  ;;  %v1073_v4 = vmul.f32 %v1973_v26, %v1973_v26 }
 0x277   : > { %v1090_v24 = vadd.f32 %v1089_v19, %v1068_v17  ;;  %v1017_v25 = vadd.f32 %v1016_v18, %v1958_v12 }
 0x278   : > { %v1111_v27 = vadd.f32 %v1110_v23, %v1069_v20  ;;  %v1038_v28 = vadd.f32 %v1037_v21, %v1963_v16 }
 0x279   : > { %v1018_v29 = vadd.f32 %v1017_v25, %v1968_v22  ;;  %v1091_v30 = vadd.f32 %v1090_v24, %v1070_v59 }
 0x27a   : > { %v1039_v31 = vadd.f32 %v1038_v28, %v1973_v26  ;;  %v1112_v33 = vadd.f32 %v1111_v27, %v1071_v61 }
 0x27b   : > { %v1019_v12 = vadd.f32 %v1018_v29, %v1978_v32  ;;  %v1092_v35 = vadd.f32 %v1091_v30, %v1072_v63 }
 0x27c   : > { %v1040_v16 = vadd.f32 %v1039_v31, %v1983_v36  ;;  %v1113_v38 = vadd.f32 %v1112_v33, %v1073_v4  ;;  %v1079_v36 = vmul.f32 %v967_v55, %v967_v55 }
 0x27d   : > { %v1093_v22 = vadd.f32 %v1092_v35, %v1074_v34  ;;  %v1020_v39 = vadd.f32 %v1019_v12, %v1988_v5 }
 0x27e   : > { %v1114_v26 = vadd.f32 %v1113_v38, %v1075_v37  ;;  %v1041_v41 = vadd.f32 %v1040_v16, %v1993_v45 }
 0x27f   : > { %v1094_v32 = vadd.f32 %v1093_v22, %v1076_v40  ;;  %v1021_v43 = vadd.f32 %v1020_v39, %v965_v51 }
 0x280   : > { %v1115_v47 = vadd.f32 %v1114_v26, %v1077_v42  ;;  %v1042_v48 = vadd.f32 %v1041_v41, %v967_v55 }
 0x281   : > { %v1095_v50 = vadd.f32 %v1094_v32, %v1078_v44  ;;  %v1022_v52 = vadd.f32 %v1021_v43, %v971_v0 }
 0x282   : > { %v1116_v53 = vadd.f32 %v1115_v47, %v1079_v36  ;;  %v1043_v54 = vadd.f32 %v1042_v48, %v973_v6 }
 0x283   : > { %v1023_v56 = vrot.slane %v1022_v52, 4  ;;  %v1096_v5 = vadd.f32 %v1095_v50, %v1080_v46 }
 0x284   : > { %v1044_v57 = vrot.slane %v1043_v54, 4  ;;  %v1117_v58 = vadd.f32 %v1116_v53, %v1081_v49 }
 0x285   : > { %v1024_v60 = vadd.f32 %v1023_v56, %v1022_v52  ;;  %v1097_v62 = vrot.slane %v1096_v5, 4 }
 0x286   : > { %v1045_v1 = vadd.f32 %v1044_v57, %v1043_v54  ;;  %v1118_v45 = vrot.slane %v1117_v58, 4 }
 0x287   : > { %v1025_v2 = vrot.slane %v1024_v60, 2  ;;  %v1098_v3 = vadd.f32 %v1097_v62, %v1096_v5 }
 0x288   : > { %v1046_v51 = vrot.slane %v1045_v1, 2  ;;  %v1119_v7 = vadd.f32 %v1118_v45, %v1117_v58 }
 0x289   : > { %v1026_v8 = vadd.f32 %v1025_v2, %v1024_v60  ;;  %v1099_v9 = vrot.slane %v1098_v3, 2 }
 0x28a   : > { %v1047_v55 = vadd.f32 %v1046_v51, %v1045_v1  ;;  %v1120_v10 = vrot.slane %v1119_v7, 2 }
 0x28b   : > { %v1027_v0 = vrot.slane %v1026_v8, 1  ;;  %v1100_v11 = vadd.f32 %v1099_v9, %v1098_v3 }
 0x28c   : > { %v1048_v6 = vrot.slane %v1047_v55, 1  ;;  %v1121_v13 = vadd.f32 %v1120_v10, %v1119_v7 }
 0x28d   : > { %v1101_v14 = vrot.slane %v1100_v11, 1  ;;  %v1028_v17 = vadd.f32 %v1027_v0, %v1026_v8 }
 0x28e   : > { %v1122_v15 = vrot.slane %v1121_v13, 1  ;;  %v1049_v19 = vadd.f32 %v1048_v6, %v1047_v55 }
 0x28f   : > { %v1102_v18 = vadd.f32 %v1101_v14, %v1100_v11 }
 0x290   : > { %v1123_v20 = vadd.f32 %v1122_v15, %v1121_v13 }
 0x291   : > { %v1125_v21 = vsel %vm1124_vm0, %v1028_v17, %v1102_v18 }
 0x292   : > { %v1126_v23 = vsel %vm1124_vm0, %v1049_v19, %v1123_v20 }
 0x293   : > { %v1129_v59 = vcombine.low %v1125_v21, %v1126_v23 }
 0x295   : > { %1277 = vst.sshfl [vmem:[%s1644_s7] sm:$0x33 pattern:$0x76325410] %v1129_v59 }
 0x296 PF: > { %s15_s21 = sadd.s32 1, %s1541_s21   ;;  %s2069_s15 = smov %s1521_s16 }
 0x297   : > { %p12_p0 = scmp.ge.s32.totalorder %s15_s21, 6   ;;  %s2070_s16 = smov %s1621_s28 }
 0x298   : > { %s2071_s17 = smov %s1533_s19  ;;  %s2072_s18 = smov %s1537_s20 }
 0x299   : > { %s2073_s19 = smov %s2076_s22  ;;  %s2074_s20 = smov %s2080_s23 }
 0x29a   :  { %14 = sbr.rel (!%p12_p0) target bundleno = 4 (0x4), region = 127 }

// kernel: resgcn_forward.11
= control target key start
LH: loop header
LB: loop body
LE: loop exit
PB: predicated region body
PF: predicated region fallthrough
CT: control target
= control target key end

     0   :  { %s603_s9 = smov 0   ;;  %s772_s0 = inlined_call_operand.vmem [shape: f32[256,256], index: 0, kind: input, shape index: {}]   ;;  %s773_s1 = inlined_call_operand.vmem [shape: f32[256,128], index: 1, kind: input, shape index: {}]   ;;  %s774_s2 = inlined_call_operand.vmem [shape: f32[256,128], index: 2, kind: output, shape index: {}]  }
   0x1 LB: > { %s431_s10 = sadd.s32 4294967295, %s586_s9   ;;  %p435_p0 = scmp.ge.s32.totalorder %s586_s9, 1  ;;  %s586_s9 = sphi %s603_s9, %s12_s9  }
   0x2   : > { %p114_p1 = scmp.lt.s32.totalorder %s586_s9, 3 }
   0x4   : > { %p115_p2 = pnand %p435_p0, %p114_p1 }
   0x5   : > { %v198_v0 = vld [vmem:[%s773_s1 + $0x80] sm:$0xff] (!%p115_p2)  ;;  %v199_v1 = vld [vmem:[%s773_s1 + $0x88] sm:$0xff] (!%p115_p2)  ;;  %s436_s17 = sshll.u32 (!%p115_p2), %s431_s10, 4  ;;  %v200_v5 = vld [vmem:[%s773_s1 + $0x90] sm:$0xff] (!%p115_p2) }
   0x6   : > { %118 = sbr.rel (%p115_p2) target bundleno = 285 (0x11d), region = 28  ;;  %v182_v2 = vld [vmem:[%s773_s1] sm:$0xff] (!%p115_p2)  ;;  %v524_v3 = vpack.c.bf16 (!%p115_p2), %v199_v1, %v198_v0  ;;  %v183_v4 = vld [vmem:[%s773_s1 + $0x8] sm:$0xff] (!%p115_p2)  ;;  %v201_v6 = vld [vmem:[%s773_s1 + $0x98] sm:$0xff] (!%p115_p2)  ;;  %p138_p3 = scmp.lt.s32.totalorder (!%p115_p2), %s436_s17, 31 }
   0x7   : > { %v526_v7 = vpack.c.bf16 (!%p115_p2), %v183_v4, %v182_v2  ;;  %v528_v8 = vpack.c.bf16 (!%p115_p2), %v201_v6, %v200_v5  ;;  %v184_v9 = vld [vmem:[%s773_s1 + $0x10] sm:$0xff] (!%p115_p2)  ;;  %v185_v10 = vld [vmem:[%s773_s1 + $0x18] sm:$0xff] (!%p115_p2)  ;;  %v202_v11 = vld [vmem:[%s773_s1 + $0xa0] sm:$0xff] (!%p115_p2) }
   0x8   : > { %525 = vmatprep.subr.bf16.mxu0 (!%p115_p2), %v524_v3  ;;  %556 = vmatprep.subr.bf16.mxu1 (!%p115_p2), %v524_v3  ;;  %v203_v12 = vld [vmem:[%s773_s1 + $0xa8] sm:$0xff] (!%p115_p2)  ;;  %v530_v13 = vpack.c.bf16 (!%p115_p2), %v185_v10, %v184_v9  ;;  %v186_v15 = vld [vmem:[%s773_s1 + $0x20] sm:$0xff] (!%p115_p2)  ;;  %v204_v17 = vld [vmem:[%s773_s1 + $0xb0] sm:$0xff] (!%p115_p2) }
   0x9   : > { %527 = vmatpush3.bf16.msra.mxu0 (!%p115_p2), %v526_v7  ;;  %564 = vmatpush3.bf16.msra.mxu1 (!%p115_p2), %v526_v7  ;;  %v532_v14 = vpack.c.bf16 (!%p115_p2), %v203_v12, %v202_v11  ;;  %v187_v16 = vld [vmem:[%s773_s1 + $0x28] sm:$0xff] (!%p115_p2)  ;;  %v205_v18 = vld [vmem:[%s773_s1 + $0xb8] sm:$0xff] (!%p115_p2)  ;;  %v188_v21 = vld [vmem:[%s773_s1 + $0x30] sm:$0xff] (!%p115_p2) }
   0xa   : > { %529 = vmatprep.subr.bf16.mxu0 (!%p115_p2), %v528_v8  ;;  %557 = vmatprep.subr.bf16.mxu1 (!%p115_p2), %v528_v8  ;;  %v534_v19 = vpack.c.bf16 (!%p115_p2), %v187_v16, %v186_v15  ;;  %v536_v20 = vpack.c.bf16 (!%p115_p2), %v205_v18, %v204_v17  ;;  %v189_v22 = vld [vmem:[%s773_s1 + $0x38] sm:$0xff] (!%p115_p2)  ;;  %v206_v23 = vld [vmem:[%s773_s1 + $0xc0] sm:$0xff] (!%p115_p2)  ;;  %v207_v24 = vld [vmem:[%s773_s1 + $0xc8] sm:$0xff] (!%p115_p2) }
   0xb   : > { %v538_v27 = vpack.c.bf16 (!%p115_p2), %v189_v22, %v188_v21  ;;  %v540_v28 = vpack.c.bf16 (!%p115_p2), %v207_v24, %v206_v23  ;;  %v190_v29 = vld [vmem:[%s773_s1 + $0x40] sm:$0xff] (!%p115_p2)  ;;  %v191_v30 = vld [vmem:[%s773_s1 + $0x48] sm:$0xff] (!%p115_p2)  ;;  %v208_v31 = vld [vmem:[%s773_s1 + $0xd0] sm:$0xff] (!%p115_p2) }
   0xc   : > { %v209_v32 = vld [vmem:[%s773_s1 + $0xd8] sm:$0xff] (!%p115_p2)  ;;  %v542_v33 = vpack.c.bf16 (!%p115_p2), %v191_v30, %v190_v29  ;;  %v192_v35 = vld [vmem:[%s773_s1 + $0x50] sm:$0xff] (!%p115_p2)  ;;  %v210_v37 = vld [vmem:[%s773_s1 + $0xe0] sm:$0xff] (!%p115_p2) }
   0xd   : > { %s776_s17 = smov (!%p138_p3, %s436_s17), 31  ;;  %531 = vmatpush3.bf16.msra.mxu0 %v530_v13  ;;  %565 = vmatpush3.bf16.msra.mxu1 %v530_v13  ;;  %v544_v34 = vpack.c.bf16 %v209_v32, %v208_v31  ;;  %v193_v36 = vld [vmem:[%s773_s1 + $0x58] sm:$0xff]  ;;  %v211_v38 = vld [vmem:[%s773_s1 + $0xe8] sm:$0xff]  ;;  %v194_v41 = vld [vmem:[%s773_s1 + $0x60] sm:$0xff] }
   0xe   : > { %s443_s8 = sshll.u32 %s776_s17, 4  ;;  %533 = vmatprep.subr.bf16.mxu0 %v532_v14  ;;  %558 = vmatprep.subr.bf16.mxu1 %v532_v14  ;;  %v546_v39 = vpack.c.bf16 %v193_v36, %v192_v35  ;;  %v548_v40 = vpack.c.bf16 %v211_v38, %v210_v37  ;;  %v195_v42 = vld [vmem:[%s773_s1 + $0x68] sm:$0xff]  ;;  %v212_v43 = vld [vmem:[%s773_s1 + $0xf0] sm:$0xff]  ;;  %v213_v44 = vld [vmem:[%s773_s1 + $0xf8] sm:$0xff]  ;;  %s440_s29 = sshll.u32 %s776_s17, 3 }
   0xf   : > { %s659_s16 = scalar_lea.vmem %s772_s0, %s443_s8  ;;  %v550_v45 = vpack.c.bf16 %v195_v42, %v194_v41  ;;  %v552_v46 = vpack.c.bf16 %v213_v44, %v212_v43  ;;  %v196_v47 = vld [vmem:[%s773_s1 + $0x70] sm:$0xff]  ;;  %v197_v48 = vld [vmem:[%s773_s1 + $0x78] sm:$0xff]  ;;  %s751_s4 = scalar_lea.vmem %s774_s2, %s440_s29 }
  0x10   : > { %v151_v25 = vld [vmem:[%s659_s16 + $0x8] sm:$0xff]  ;;  %v554_v49 = vpack.c.bf16 %v197_v48, %v196_v47  ;;  %v150_v50 = vld [vmem:[%s659_s16] sm:$0xff]  ;;  %v153_v52 = vld [vmem:[%s659_s16 + $0x18] sm:$0xff] }
  0x11   : > { %278 = vmatprep.mubr.f32.mxu0 %v151_v25  ;;  %v167_v26 = vld [vmem:[%s659_s16 + $0x88] sm:$0xff]  ;;  %535 = vmatpush3.bf16.msra.mxu0 %v534_v19  ;;  %v166_v51 = vld [vmem:[%s659_s16 + $0x80] sm:$0xff]  ;;  %v169_v53 = vld [vmem:[%s659_s16 + $0x98] sm:$0xff] }
  0x12   : > { %566 = vmatpush3.bf16.msra.mxu1 %v534_v19  ;;  %537 = vmatprep.subr.bf16.mxu0 %v536_v20  ;;  %v152_v54 = vld [vmem:[%s659_s16 + $0x10] sm:$0xff]  ;;  %v155_v56 = vld [vmem:[%s659_s16 + $0x28] sm:$0xff]  ;;  %v154_v58 = vld [vmem:[%s659_s16 + $0x20] sm:$0xff] }
  0x13   : > { %559 = vmatprep.subr.bf16.mxu1 %v536_v20  ;;  %318 = vmatprep.mubr.f32.mxu1 %v167_v26  ;;  %v168_v55 = vld [vmem:[%s659_s16 + $0x90] sm:$0xff]  ;;  %v171_v57 = vld [vmem:[%s659_s16 + $0xa8] sm:$0xff]  ;;  %v170_v59 = vld [vmem:[%s659_s16 + $0xa0] sm:$0xff] }
  0x14   : > { %v157_v60 = vld [vmem:[%s659_s16 + $0x38] sm:$0xff]  ;;  %v156_v62 = vld [vmem:[%s659_s16 + $0x30] sm:$0xff]  ;;  %v159_v0 = vld [vmem:[%s659_s16 + $0x48] sm:$0xff] }
  0x15   : > { %539 = vmatpush3.bf16.msra.mxu0 %v538_v27  ;;  %v173_v61 = vld [vmem:[%s659_s16 + $0xb8] sm:$0xff]  ;;  %v172_v63 = vld [vmem:[%s659_s16 + $0xb0] sm:$0xff]  ;;  %v175_v1 = vld [vmem:[%s659_s16 + $0xc8] sm:$0xff] }
  0x16   : > { %567 = vmatpush3.bf16.msra.mxu1 %v538_v27  ;;  %541 = vmatprep.subr.bf16.mxu0 %v540_v28  ;;  %v158_v2 = vld [vmem:[%s659_s16 + $0x40] sm:$0xff]  ;;  %v161_v4 = vld [vmem:[%s659_s16 + $0x58] sm:$0xff]  ;;  %v160_v6 = vld [vmem:[%s659_s16 + $0x50] sm:$0xff] }
  0x17   : > { %560 = vmatprep.subr.bf16.mxu1 %v540_v28  ;;  %v174_v3 = vld [vmem:[%s659_s16 + $0xc0] sm:$0xff]  ;;  %v177_v5 = vld [vmem:[%s659_s16 + $0xd8] sm:$0xff]  ;;  %v176_v7 = vld [vmem:[%s659_s16 + $0xd0] sm:$0xff] }
  0x18   : > { %v163_v8 = vld [vmem:[%s659_s16 + $0x68] sm:$0xff]  ;;  %v162_v10 = vld [vmem:[%s659_s16 + $0x60] sm:$0xff]  ;;  %v165_v12 = vld [vmem:[%s659_s16 + $0x78] sm:$0xff] }
  0x19   : > { %543 = vmatpush3.bf16.msra.mxu0 %v542_v33  ;;  %v179_v9 = vld [vmem:[%s659_s16 + $0xe8] sm:$0xff]  ;;  %v178_v11 = vld [vmem:[%s659_s16 + $0xe0] sm:$0xff]  ;;  %v181_v13 = vld [vmem:[%s659_s16 + $0xf8] sm:$0xff] }
  0x1a   : > { %568 = vmatpush3.bf16.msra.mxu1 %v542_v33  ;;  %545 = vmatprep.subr.bf16.mxu0 %v544_v34  ;;  %v164_v14 = vld [vmem:[%s659_s16 + $0x70] sm:$0xff] }
  0x1b   : > { %561 = vmatprep.subr.bf16.mxu1 %v544_v34  ;;  %v180_v15 = vld [vmem:[%s659_s16 + $0xf0] sm:$0xff] }
  0x1d   : > { %547 = vmatpush3.bf16.msra.mxu0 %v546_v39 }
  0x1e   : > { %569 = vmatpush3.bf16.msra.mxu1 %v546_v39  ;;  %549 = vmatprep.subr.bf16.mxu0 %v548_v40 }
  0x1f   : > { %562 = vmatprep.subr.bf16.mxu1 %v548_v40 }
  0x21   : > { %551 = vmatpush3.bf16.msra.mxu0 %v550_v45 }
  0x22   : > { %570 = vmatpush3.bf16.msra.mxu1 %v550_v45  ;;  %553 = vmatprep.subr.bf16.mxu0 %v552_v46 }
  0x23   : > { %563 = vmatprep.subr.bf16.mxu1 %v552_v46 }
  0x25   : > { %555 = vmatpush3.bf16.msra.mxu0 %v554_v49 }
  0x26   : > { %571 = vmatpush3.bf16.msra.mxu1 %v554_v49 }
  0x28   : > { %279 = vmatmul.mubr.f32.vlgmr.msra.gmra.mrb[0].mxu0 %v150_v50 }
  0x29   : > { %319 = vmatmul.mubr.f32.vlgmr.msra.gmra.mrb[0].mxu1 %v166_v51  ;;  %283 = vmatprep.mubr.f32.mxu0 %v153_v52 }
  0x2a   : > { %323 = vmatprep.mubr.f32.mxu1 %v169_v53 }
  0x2c   : > { %284 = vmatmul.mubr.f32.gmra.mrb[2].mxu0 %v152_v54 }
  0x2d   : > { %324 = vmatmul.mubr.f32.gmra.mrb[2].mxu1 %v168_v55  ;;  %288 = vmatprep.mubr.f32.mxu0 %v155_v56 }
  0x2e   : > { %328 = vmatprep.mubr.f32.mxu1 %v171_v57 }
  0x30   : > { %289 = vmatmul.mubr.f32.gmra.mrb[4].mxu0 %v154_v58 }
  0x31   : > { %329 = vmatmul.mubr.f32.gmra.mrb[4].mxu1 %v170_v59  ;;  %293 = vmatprep.mubr.f32.mxu0 %v157_v60 }
  0x32   : > { %333 = vmatprep.mubr.f32.mxu1 %v173_v61 }
  0x34   : > { %294 = vmatmul.mubr.f32.gmra.mrb[6].mxu0 %v156_v62 }
  0x35   : > { %334 = vmatmul.mubr.f32.gmra.mrb[6].mxu1 %v172_v63  ;;  %298 = vmatprep.mubr.f32.mxu0 %v159_v0 }
  0x36   : > { %338 = vmatprep.mubr.f32.mxu1 %v175_v1 }
  0x38   : > { %299 = vmatmul.mubr.f32.gmra.mrb[8].mxu0 %v158_v2 }
  0x39   : > { %339 = vmatmul.mubr.f32.gmra.mrb[8].mxu1 %v174_v3  ;;  %303 = vmatprep.mubr.f32.mxu0 %v161_v4 }
  0x3a   : > { %343 = vmatprep.mubr.f32.mxu1 %v177_v5 }
  0x3c   : > { %304 = vmatmul.mubr.f32.gmra.mrb[10].mxu0 %v160_v6 }
  0x3d   : > { %344 = vmatmul.mubr.f32.gmra.mrb[10].mxu1 %v176_v7  ;;  %308 = vmatprep.mubr.f32.mxu0 %v163_v8 }
  0x3e   : > { %348 = vmatprep.mubr.f32.mxu1 %v179_v9 }
  0x40   : > { %309 = vmatmul.mubr.f32.gmra.mrb[12].mxu0 %v162_v10 }
  0x41   : > { %349 = vmatmul.mubr.f32.gmra.mrb[12].mxu1 %v178_v11  ;;  %313 = vmatprep.mubr.f32.mxu0 %v165_v12 }
  0x42   : > { %353 = vmatprep.mubr.f32.mxu1 %v181_v13 }
  0x44   : > { %314 = vmatmul.mubr.f32.gmra.mrb[14].mxu0 %v164_v14 }
  0x45   : > { %354 = vmatmul.mubr.f32.gmra.mrb[14].mxu1 %v180_v15 }
  0xfb   : > { %v476_v16 = vpop.f32.mrb[0].mxu0 }
  0xfc   : > { %v500_v17 = vpop.f32.mrb[0].mxu1  ;;  %v477_v18 = vpop.f32.mrb[1].mxu0 }
  0xfd   : > { %v501_v19 = vpop.f32.mrb[1].mxu1  ;;  %v478_v20 = vadd.f32 %v477_v18, %v476_v16 }
  0xfe   : > { %v502_v21 = vadd.f32 %v501_v19, %v500_v17 }
  0xff   : > { %359 = vst [vmem:[%s751_s4] sm:$0xff] %v478_v20  ;;  %v479_v22 = vpop.f32.mrb[2].mxu0 }
 0x100   : > { %367 = vst [vmem:[%s751_s4 + $0x40] sm:$0xff] %v502_v21  ;;  %v503_v23 = vpop.f32.mrb[2].mxu1  ;;  %v480_v24 = vpop.f32.mrb[3].mxu0 }
 0x101   : > { %v504_v25 = vpop.f32.mrb[3].mxu1  ;;  %v481_v26 = vadd.f32 %v480_v24, %v479_v22 }
 0x102   : > { %v505_v27 = vadd.f32 %v504_v25, %v503_v23 }
 0x103   : > { %360 = vst [vmem:[%s751_s4 + $0x8] sm:$0xff] %v481_v26  ;;  %v482_v28 = vpop.f32.mrb[4].mxu0 }
 0x104   : > { %368 = vst [vmem:[%s751_s4 + $0x48] sm:$0xff] %v505_v27  ;;  %v506_v29 = vpop.f32.mrb[4].mxu1  ;;  %v483_v30 = vpop.f32.mrb[5].mxu0 }
 0x105   : > { %v507_v31 = vpop.f32.mrb[5].mxu1  ;;  %v484_v32 = vadd.f32 %v483_v30, %v482_v28 }
 0x106   : > { %v508_v33 = vadd.f32 %v507_v31, %v506_v29 }
 0x107   : > { %361 = vst [vmem:[%s751_s4 + $0x10] sm:$0xff] %v484_v32  ;;  %v485_v34 = vpop.f32.mrb[6].mxu0 }
 0x108   : > { %369 = vst [vmem:[%s751_s4 + $0x50] sm:$0xff] %v508_v33  ;;  %v509_v35 = vpop.f32.mrb[6].mxu1  ;;  %v486_v36 = vpop.f32.mrb[7].mxu0 }
 0x109   : > { %v510_v37 = vpop.f32.mrb[7].mxu1  ;;  %v487_v38 = vadd.f32 %v486_v36, %v485_v34 }
 0x10a   : > { %v511_v39 = vadd.f32 %v510_v37, %v509_v35 }
 0x10b   : > { %362 = vst [vmem:[%s751_s4 + $0x18] sm:$0xff] %v487_v38  ;;  %v488_v40 = vpop.f32.mrb[8].mxu0 }
 0x10c   : > { %370 = vst [vmem:[%s751_s4 + $0x58] sm:$0xff] %v511_v39  ;;  %v512_v41 = vpop.f32.mrb[8].mxu1  ;;  %v489_v42 = vpop.f32.mrb[9].mxu0 }
 0x10d   : > { %v513_v43 = vpop.f32.mrb[9].mxu1  ;;  %v490_v44 = vadd.f32 %v489_v42, %v488_v40 }
 0x10e   : > { %v514_v45 = vadd.f32 %v513_v43, %v512_v41 }
 0x10f   : > { %363 = vst [vmem:[%s751_s4 + $0x20] sm:$0xff] %v490_v44  ;;  %v491_v46 = vpop.f32.mrb[10].mxu0 }
 0x110   : > { %371 = vst [vmem:[%s751_s4 + $0x60] sm:$0xff] %v514_v45  ;;  %v515_v47 = vpop.f32.mrb[10].mxu1  ;;  %v492_v48 = vpop.f32.mrb[11].mxu0 }
 0x111   : > { %v516_v49 = vpop.f32.mrb[11].mxu1  ;;  %v493_v50 = vadd.f32 %v492_v48, %v491_v46 }
 0x112   : > { %v517_v51 = vadd.f32 %v516_v49, %v515_v47 }
 0x113   : > { %364 = vst [vmem:[%s751_s4 + $0x28] sm:$0xff] %v493_v50  ;;  %v494_v52 = vpop.f32.mrb[12].mxu0 }
 0x114   : > { %372 = vst [vmem:[%s751_s4 + $0x68] sm:$0xff] %v517_v51  ;;  %v518_v53 = vpop.f32.mrb[12].mxu1  ;;  %v495_v54 = vpop.f32.mrb[13].mxu0 }
 0x115   : > { %v519_v55 = vpop.f32.mrb[13].mxu1  ;;  %v496_v56 = vadd.f32 %v495_v54, %v494_v52 }
 0x116   : > { %v520_v57 = vadd.f32 %v519_v55, %v518_v53 }
 0x117   : > { %365 = vst [vmem:[%s751_s4 + $0x30] sm:$0xff] %v496_v56  ;;  %v497_v58 = vpop.f32.mrb[14].mxu0 }
 0x118   : > { %373 = vst [vmem:[%s751_s4 + $0x70] sm:$0xff] %v520_v57  ;;  %v521_v59 = vpop.f32.mrb[14].mxu1  ;;  %v498_v60 = vpop.f32.mrb[15].mxu0 }
 0x119   : > { %v522_v61 = vpop.f32.mrb[15].mxu1  ;;  %v499_v62 = vadd.f32 %v498_v60, %v497_v58 }
 0x11a   : > { %v523_v63 = vadd.f32 %v522_v61, %v521_v59 }
 0x11b   : > { %366 = vst [vmem:[%s751_s4 + $0x38] sm:$0xff] %v499_v62 }
 0x11c   : > { %374 = vst [vmem:[%s751_s4 + $0x78] sm:$0xff] %v523_v63 }
 0x11d PF: > { %s12_s9 = sadd.s32 1, %s586_s9  }
 0x11e   : > { %p9_p4 = scmp.ge.s32.totalorder %s12_s9, 4  }
 0x120   :  { %11 = sbr.rel (!%p9_p4) target bundleno = 1 (0x1), region = 58 }

// kernel: resgcn_forward.12
= control target key start
LH: loop header
LB: loop body
LE: loop exit
PB: predicated region body
PF: predicated region fallthrough
CT: control target
= control target key end

     0   :  { %s1046_s12 = smov 0   ;;  %s1048_s13 = smov 0   ;;  %s1224_s0 = inlined_call_operand.vmem [shape: s8[256,256], index: 0, kind: input, shape index: {}]   ;;  %s1225_s1 = inlined_call_operand.vmem [shape: f32[256,128], index: 1, kind: input, shape index: {}]   ;;  %s1226_s2 = inlined_call_operand.vmem [shape: f32[256,128], index: 2, kind: output, shape index: {0}]   ;;  %s1227_s3 = inlined_call_operand.vmem [shape: f32[2,2,128], index: 3, kind: output, shape index: {1}]  }
   0x1   :  { %s1050_s14 = smov 0   ;;  %s1052_s15 = smov 0  }
   0x2   :  { %s1054_s16 = smov 0   ;;  %s1056_s17 = smov 0  }
   0x3   :  { %s1058_s18 = smov 0  }
   0x4 LB: > { %s23_s19 = sadd.s32 1, %s1015_s16  ;;  %s26_s20 = sadd.s32 1, %s1019_s17  ;;  %s1023_s18 = sphi %s1058_s18, %s14_s18   ;;  %s1019_s17 = sphi %s1056_s17, %s1233_s17   ;;  %s1015_s16 = sphi %s1054_s16, %s1232_s16   ;;  %s1011_s15 = sphi %s1052_s15, %s1231_s15   ;;  %s1007_s14 = sphi %s1050_s14, %s1230_s14   ;;  %s1003_s13 = sphi %s1048_s13, %s1229_s13   ;;  %s999_s12 = sphi %s1046_s12, %s1228_s12  }
   0x5   : > { %p24_p0 = scmp.ge.s32.totalorder %s23_s19, 2  ;;  %p42_p1 = scmp.ne.s32.totalorder %s1003_s13, %s999_s12 }
   0x6   : > { %p43_p2 = scmp.eq.s32.totalorder %s1023_s18, 0  ;;  %s35_s24 = sadd.s32 1, %s1003_s13 }
   0x7   : > { %s1235_s19 = smov (%p24_p0, %s23_s19), 0  ;;  %s1237_s20 = smov (!%p24_p0, %s26_s20), %s1019_s17 }
   0x8   : > { %p44_p3 = por %p43_p2, %p42_p1  ;;  %p28_p4 = scmp.ge.s32.totalorder %s1237_s20, 2 }
   0x9   : > { %s31_s21 = ssub.s32 %s1015_s16, %s1235_s19  ;;  %p759_p6 = scmp.ge.s32.totalorder %s1023_s18, 4 }
   0xa   : > { %s1239_s20 = smov (%p28_p4, %s1237_s20), 0 }
   0xb   : > { %s30_s22 = ssub.s32 %s1019_s17, %s1239_s20  ;;  %144 = sbr.rel (%p759_p6) target bundleno = 26 (0x1a), region = 20 }
   0xc   : > { %s32_s23 = sor.u32 %s31_s21, %s30_s22 }
   0xd   : > { %p33_p5 = scmp.eq.s32.totalorder %s32_s23, 0 }
   0xf   : > { %s1097_s25 = scalar_select %p33_p5, %s1003_s13, %s35_s24  }
  0x12   : > { %147 = sbr.rel (!%p44_p3) target bundleno = 26 (0x1a), region = 24  ;;  %s149_s26 = sand.u32 (%p44_p3), 1, %s1003_s13  }
  0x13   : > { %s775_s27 = sshll.u32 (%p44_p3), %s1019_s17, 3  ;;  %s760_s28 = sshll.u32 (%p44_p3), %s149_s26, 5 }
  0x14   : > { %s154_s29 = sadd.s32 (%p44_p3), %s1015_s16, %s775_s27  ;;  %s151_s7 = scalar_lea.vmem (%p44_p3), [#allocation3], %s760_s28 }
  0x15   : > { %s763_s30 = sshll.u32 (%p44_p3), %s154_s29, 3 }
  0x16   : > { %s156_s6 = scalar_lea.vmem (%p44_p3), %s1224_s0, %s763_s30 }
  0x17   : > { %v190_v0 = vld [vmem:[%s156_s6] sm:$0xff] (%p44_p3)  ;;  %v192_v1 = vld [vmem:[%s156_s6 + $0x10] sm:$0xff] (%p44_p3) }
  0x18   : > { %v194_v2 = vld [vmem:[%s156_s6 + $0x20] sm:$0xff] (%p44_p3)  ;;  %191 = vst [vmem:[%s151_s7] sm:$0xff] (%p44_p3), %v190_v0  ;;  %193 = vst [vmem:[%s151_s7 + $0x8] sm:$0xff] (%p44_p3), %v192_v1  ;;  %v196_v3 = vld [vmem:[%s156_s6 + $0x30] sm:$0xff] (%p44_p3) }
  0x19   : > { %195 = vst [vmem:[%s151_s7 + $0x10] sm:$0xff] %v194_v2  ;;  %197 = vst [vmem:[%s151_s7 + $0x18] sm:$0xff] %v196_v3 }
  0x1a PF: > { %p764_p7 = scmp.ge.s32.totalorder %s1023_s18, 1  ;;  %p202_p8 = scmp.lt.s32.totalorder %s1023_s18, 5 }
  0x1c   : > { %p203_p9 = pnand %p764_p7, %p202_p8 }
  0x1d   : > { %s209_s8 = sand.u32 (!%p203_p9), 1, %s999_s12   ;;  %s766_s9 = sshll.u32 (!%p203_p9), %s1011_s15, 4 }
  0x1e   : > { %206 = sbr.rel (%p203_p9) target bundleno = 358 (0x166), region = 62  ;;  %s765_s10 = sshll.u32 (!%p203_p9), %s209_s8, 5 }
  0x1f   : > { %p238_p10 = scmp.lt.s32.totalorder (!%p203_p9), %s766_s9, 31  ;;  %p243_p11 = scmp.lt.s32.totalorder (!%p203_p9), %s1011_s15, 1 }
  0x20   : > { %s1122_s30 = scalar_lea.vmem (!%p203_p9), [#allocation3], %s765_s10  ;;  %p769_p12 = scmp.ne.s32.totalorder (!%p203_p9), %s1007_s14, 0 }
  0x25   : > { %s1241_s9 = smov (!%p238_p10, %s766_s9), 31  ;;  %250 = sbr.rel (%p769_p12) target bundleno = 48 (0x30), region = 70 }
  0x26   : > { %s244_s11 = scalar_select %p243_p11, %s1011_s15, 1 }
  0x27   : > { %s767_s21 = sshll.u32 %s1241_s9, 3  ;;  %v1025_v4 = vmov (!%p769_p12), 0.0  }
  0x28   : > { %s1115_s24 = scalar_lea.vmem %s1226_s2, %s767_s21  ;;  %s768_s26 = sshll.u32 %s244_s11, 1  ;;  %251 = vst [vmem:[#allocation2] sm:$0xff] (!%p769_p12), %v1025_v4  ;;  %252 = vst [vmem:[#allocation2 + $0x8] sm:$0xff] (!%p769_p12), %v1025_v4 }
  0x29   : > { %s1120_s29 = scalar_lea.vmem %s1227_s3, %s768_s26  ;;  %253 = vst [vmem:[#allocation2 + $0x10] sm:$0xff] (!%p769_p12), %v1025_v4  ;;  %254 = vst [vmem:[#allocation2 + $0x18] sm:$0xff] (!%p769_p12), %v1025_v4 }
  0x2a   : > { %255 = vst [vmem:[#allocation2 + $0x20] sm:$0xff] (!%p769_p12), %v1025_v4  ;;  %256 = vst [vmem:[#allocation2 + $0x28] sm:$0xff] (!%p769_p12), %v1025_v4 }
  0x2b   : > { %257 = vst [vmem:[#allocation2 + $0x30] sm:$0xff] (!%p769_p12), %v1025_v4  ;;  %258 = vst [vmem:[#allocation2 + $0x38] sm:$0xff] (!%p769_p12), %v1025_v4 }
  0x2c   : > { %259 = vst [vmem:[#allocation2 + $0x40] sm:$0xff] %v1025_v4  ;;  %260 = vst [vmem:[#allocation2 + $0x48] sm:$0xff] %v1025_v4 }
  0x2d   : > { %261 = vst [vmem:[#allocation2 + $0x50] sm:$0xff] %v1025_v4  ;;  %262 = vst [vmem:[#allocation2 + $0x58] sm:$0xff] %v1025_v4 }
  0x2e   : > { %263 = vst [vmem:[#allocation2 + $0x60] sm:$0xff] %v1025_v4  ;;  %264 = vst [vmem:[#allocation2 + $0x68] sm:$0xff] %v1025_v4 }
  0x2f   : > { %265 = vst [vmem:[#allocation2 + $0x70] sm:$0xff] %v1025_v4  ;;  %266 = vst [vmem:[#allocation2 + $0x78] sm:$0xff] %v1025_v4 }
  0x30 PF: > { %s770_s12 = sshll.u32 %s1007_s14, 7  ;;  %v1127_v5 = vld [vmem:[%s1122_s30] sm:$0xff]  ;;  %v1130_v6 = vld [vmem:[%s1122_s30 + $0x10] sm:$0xff]  ;;  %v302_v39 = vld [vmem:[%s1122_s30 + $0x8] sm:$0xff]  ;;  %p771_p13 = scmp.ne.s32.totalorder %s1007_s14, 1 }
  0x31   : > { %s1135_s6 = scalar_lea.vmem %s1225_s1, %s770_s12  ;;  %v305_v7 = vunpack.c.0.s8 %v1127_v5  ;;  %v313_v8 = vunpack.c.0.s8 %v1130_v6  ;;  %v306_v35 = vunpack.c.1.s8 %v1127_v5  ;;  %v314_v36 = vunpack.c.1.s8 %v1130_v6  ;;  %v304_v40 = vld [vmem:[%s1122_s30 + $0x18] sm:$0xff]  ;;  %s772_s7 = sshll.u32 (!%p771_p13), %s1011_s15, 7 }
  0x32   : > { %v269_v9 = vld [vmem:[%s1135_s6] sm:$0xff]  ;;  %v270_v10 = vld [vmem:[%s1135_s6 + $0x8] sm:$0xff]  ;;  %v271_v11 = vld [vmem:[%s1135_s6 + $0x10] sm:$0xff]  ;;  %v307_v37 = vunpack.c.2.s8 %v1127_v5  ;;  %v315_v38 = vunpack.c.2.s8 %v1130_v6  ;;  %v308_v43 = vunpack.c.3.s8 %v1127_v5  ;;  %v316_v44 = vunpack.c.3.s8 %v1130_v6  ;;  %s1168_s10 = scalar_lea.vmem (!%p771_p13), %s1225_s1, %s772_s7 }
  0x33   : > { %v864_v12 = vpack.c.bf16 %v270_v10, %v269_v9  ;;  %v272_v13 = vld [vmem:[%s1135_s6 + $0x18] sm:$0xff]  ;;  %v273_v15 = vld [vmem:[%s1135_s6 + $0x20] sm:$0xff]  ;;  %v274_v16 = vld [vmem:[%s1135_s6 + $0x28] sm:$0xff]  ;;  %v321_v17 = vcvt.s32.f32 %v305_v7  ;;  %v329_v18 = vcvt.s32.f32 %v313_v8  ;;  %v322_v41 = vcvt.s32.f32 %v306_v35 }
  0x34   : > { %v868_v14 = vpack.c.bf16 %v272_v13, %v271_v11  ;;  %v872_v19 = vpack.c.bf16 %v274_v16, %v273_v15  ;;  %v275_v20 = vld [vmem:[%s1135_s6 + $0x30] sm:$0xff]  ;;  %v276_v21 = vld [vmem:[%s1135_s6 + $0x38] sm:$0xff]  ;;  %v277_v23 = vld [vmem:[%s1135_s6 + $0x40] sm:$0xff]  ;;  %v330_v42 = vcvt.s32.f32 %v314_v36  ;;  %v323_v45 = vcvt.s32.f32 %v307_v37 }
  0x35   : > { %865 = vmatprep.subr.bf16.mxu0 %v864_v12  ;;  %896 = vmatprep.subr.bf16.mxu1 %v864_v12  ;;  %v876_v22 = vpack.c.bf16 %v276_v21, %v275_v20  ;;  %v278_v24 = vld [vmem:[%s1135_s6 + $0x48] sm:$0xff]  ;;  %v279_v26 = vld [vmem:[%s1135_s6 + $0x50] sm:$0xff]  ;;  %v280_v27 = vld [vmem:[%s1135_s6 + $0x58] sm:$0xff]  ;;  %v331_v46 = vcvt.s32.f32 %v315_v38  ;;  %v309_v47 = vunpack.c.0.s8 %v302_v39  ;;  %v317_v48 = vunpack.c.0.s8 %v304_v40 }
  0x36   : > { %867 = vmatpush3.bf16.msra.mxu0 %v864_v12  ;;  %904 = vmatpush3.bf16.msra.mxu1 %v864_v12  ;;  %v880_v25 = vpack.c.bf16 %v278_v24, %v277_v23  ;;  %v884_v28 = vpack.c.bf16 %v280_v27, %v279_v26  ;;  %v281_v29 = vld [vmem:[%s1135_s6 + $0x60] sm:$0xff]  ;;  %v282_v30 = vld [vmem:[%s1135_s6 + $0x68] sm:$0xff]  ;;  %v283_v32 = vld [vmem:[%s1135_s6 + $0x70] sm:$0xff]  ;;  %v324_v49 = vcvt.s32.f32 %v308_v43  ;;  %v332_v50 = vcvt.s32.f32 %v316_v44 }
  0x37   : > { %869 = vmatprep.subr.bf16.mxu0 %v868_v14  ;;  %897 = vmatprep.subr.bf16.mxu1 %v868_v14  ;;  %v888_v31 = vpack.c.bf16 %v282_v30, %v281_v29  ;;  %v284_v33 = vld [vmem:[%s1135_s6 + $0x78] sm:$0xff]  ;;  %v310_v51 = vunpack.c.1.s8 %v302_v39  ;;  %v318_v52 = vunpack.c.1.s8 %v304_v40  ;;  %v325_v53 = vcvt.s32.f32 %v309_v47  ;;  %v286_v1 = vld [vmem:[#allocation2 + $0x8] sm:$0xff]  ;;  %v285_v3 = vld [vmem:[#allocation2] sm:$0xff] }
  0x38   : > { %840 = vmatprep.mubr.f32.mxu0 %v321_v17  ;;  %852 = vmatprep.mubr.f32.mxu1 %v329_v18  ;;  %v892_v34 = vpack.c.bf16 %v284_v33, %v283_v32  ;;  %v333_v54 = vcvt.s32.f32 %v317_v48  ;;  %v311_v55 = vunpack.c.2.s8 %v302_v39  ;;  %v319_v56 = vunpack.c.2.s8 %v304_v40  ;;  %v294_v2 = vld [vmem:[#allocation2 + $0x48] sm:$0xff]  ;;  %v293_v4 = vld [vmem:[#allocation2 + $0x40] sm:$0xff]  ;;  %v288_v13 = vld [vmem:[#allocation2 + $0x18] sm:$0xff] }
  0x39   : > { %v326_v57 = vcvt.s32.f32 %v310_v51  ;;  %v334_v58 = vcvt.s32.f32 %v318_v52  ;;  %v312_v59 = vunpack.c.3.s8 %v302_v39  ;;  %v320_v60 = vunpack.c.3.s8 %v304_v40  ;;  %v287_v15 = vld [vmem:[#allocation2 + $0x10] sm:$0xff]  ;;  %v298_v26 = vld [vmem:[#allocation2 + $0x68] sm:$0xff]  ;;  %v289_v27 = vld [vmem:[#allocation2 + $0x20] sm:$0xff] }
  0x3a   : > { %871 = vmatpush3.bf16.msra.mxu0 %v868_v14  ;;  %905 = vmatpush3.bf16.msra.mxu1 %v868_v14  ;;  %v327_v61 = vcvt.s32.f32 %v311_v55  ;;  %v335_v62 = vcvt.s32.f32 %v319_v56  ;;  %v296_v14 = vld [vmem:[#allocation2 + $0x58] sm:$0xff]  ;;  %v295_v16 = vld [vmem:[#allocation2 + $0x50] sm:$0xff]  ;;  %v520_v55 = vld [vmem:[%s1168_s10] sm:$0xff] (!%p771_p13)  ;;  %vm642_vm0 = vcmask (!%p771_p13), 1040384  }
  0x3b   : > { %873 = vmatprep.subr.bf16.mxu0 %v872_v19  ;;  %898 = vmatprep.subr.bf16.mxu1 %v872_v19  ;;  %v328_v63 = vcvt.s32.f32 %v312_v59  ;;  %v336_v0 = vcvt.s32.f32 %v320_v60  ;;  %v292_v37 = vld [vmem:[#allocation2 + $0x38] sm:$0xff]  ;;  %v291_v39 = vld [vmem:[#allocation2 + $0x30] sm:$0xff]  ;;  %v521_v56 = vld [vmem:[%s1168_s10 + $0x8] sm:$0xff] (!%p771_p13) }
  0x3c   : > { %v300_v38 = vld [vmem:[#allocation2 + $0x78] sm:$0xff]  ;;  %v299_v40 = vld [vmem:[#allocation2 + $0x70] sm:$0xff] }
  0x3e   : > { %875 = vmatpush3.bf16.msra.mxu0 %v872_v19  ;;  %906 = vmatpush3.bf16.msra.mxu1 %v872_v19 }
  0x3f   : > { %877 = vmatprep.subr.bf16.mxu0 %v876_v22  ;;  %899 = vmatprep.subr.bf16.mxu1 %v876_v22 }
  0x42   : > { %879 = vmatpush3.bf16.msra.mxu0 %v876_v22  ;;  %907 = vmatpush3.bf16.msra.mxu1 %v876_v22 }
  0x43   : > { %881 = vmatprep.subr.bf16.mxu0 %v880_v25  ;;  %900 = vmatprep.subr.bf16.mxu1 %v880_v25 }
  0x46   : > { %883 = vmatpush3.bf16.msra.mxu0 %v880_v25  ;;  %908 = vmatpush3.bf16.msra.mxu1 %v880_v25  ;;  %v290_v25 = vld [vmem:[#allocation2 + $0x28] sm:$0xff] }
  0x47   : > { %885 = vmatprep.subr.bf16.mxu0 %v884_v28  ;;  %901 = vmatprep.subr.bf16.mxu1 %v884_v28 }
  0x4a   : > { %887 = vmatpush3.bf16.msra.mxu0 %v884_v28  ;;  %909 = vmatpush3.bf16.msra.mxu1 %v884_v28  ;;  %v297_v28 = vld [vmem:[#allocation2 + $0x60] sm:$0xff] }
  0x4b   : > { %889 = vmatprep.subr.bf16.mxu0 %v888_v31  ;;  %902 = vmatprep.subr.bf16.mxu1 %v888_v31 }
  0x4e   : > { %891 = vmatpush3.bf16.msra.mxu0 %v888_v31  ;;  %910 = vmatpush3.bf16.msra.mxu1 %v888_v31 }
  0x4f   : > { %893 = vmatprep.subr.bf16.mxu0 %v892_v34  ;;  %903 = vmatprep.subr.bf16.mxu1 %v892_v34 }
  0x52   : > { %895 = vmatpush3.bf16.msra.mxu0 %v892_v34  ;;  %911 = vmatpush3.bf16.msra.mxu1 %v892_v34 }
  0x55   : > { %841 = vmatmul.mubr.f32.vlgmr.msra.gmra.mrb[0].mxu0 %v322_v41  ;;  %853 = vmatmul.mubr.f32.vlgmr.msra.gmra.mrb[0].mxu1 %v330_v42 }
  0x56   : > { %843 = vmatprep.mubr.f32.mxu0 %v323_v45  ;;  %855 = vmatprep.mubr.f32.mxu1 %v331_v46 }
  0x59   : > { %844 = vmatmul.mubr.f32.gmra.mrb[2].mxu0 %v324_v49  ;;  %856 = vmatmul.mubr.f32.gmra.mrb[2].mxu1 %v332_v50 }
  0x5a   : > { %846 = vmatprep.mubr.f32.mxu0 %v325_v53  ;;  %858 = vmatprep.mubr.f32.mxu1 %v333_v54 }
  0x5d   : > { %847 = vmatmul.mubr.f32.gmra.mrb[4].mxu0 %v326_v57  ;;  %859 = vmatmul.mubr.f32.gmra.mrb[4].mxu1 %v334_v58  ;;  %v522_v57 = vld [vmem:[%s1168_s10 + $0x10] sm:$0xff] (!%p771_p13) }
  0x5e   : > { %849 = vmatprep.mubr.f32.mxu0 %v327_v61  ;;  %861 = vmatprep.mubr.f32.mxu1 %v335_v62  ;;  %v523_v61 = vld [vmem:[%s1168_s10 + $0x18] sm:$0xff] (!%p771_p13)  ;;  %v524_v62 = vld [vmem:[%s1168_s10 + $0x20] sm:$0xff] (!%p771_p13) }
  0x61   : > { %850 = vmatmul.mubr.f32.gmra.mrb[6].mxu0 %v328_v63  ;;  %862 = vmatmul.mubr.f32.gmra.mrb[6].mxu1 %v336_v0  ;;  %v525_v63 = vld [vmem:[%s1168_s10 + $0x28] sm:$0xff] (!%p771_p13) }
 0x128   : > { %v842_v5 = vpop.f32.mrb[0].mxu0  ;;  %v854_v6 = vpop.f32.mrb[0].mxu1 }
 0x129   : > { %v483_v7 = vadd.f32 %v842_v5, %v286_v1  ;;  %v491_v8 = vadd.f32 %v854_v6, %v294_v2  ;;  %v403_v9 = vpop.f32.mrb[1].mxu0  ;;  %v443_v10 = vpop.f32.mrb[1].mxu1  ;;  %v527_v5 = vld [vmem:[%s1168_s10 + $0x38] sm:$0xff] (!%p771_p13) }
 0x12a   : > { %v482_v11 = vadd.f32 %v403_v9, %v285_v3  ;;  %v490_v12 = vadd.f32 %v443_v10, %v293_v4  ;;  %v526_v3 = vld [vmem:[%s1168_s10 + $0x30] sm:$0xff] (!%p771_p13) }
 0x12b   : > { %499 = vst [vmem:[#allocation2 + $0x8] sm:$0xff] %v483_v7  ;;  %507 = vst [vmem:[#allocation2 + $0x48] sm:$0xff] %v491_v8 }
 0x12c   : > { %498 = vst [vmem:[#allocation2] sm:$0xff] %v482_v11  ;;  %506 = vst [vmem:[#allocation2 + $0x40] sm:$0xff] %v490_v12  ;;  %v845_v17 = vpop.f32.mrb[2].mxu0  ;;  %v857_v18 = vpop.f32.mrb[2].mxu1  ;;  %v528_v11 = vld [vmem:[%s1168_s10 + $0x40] sm:$0xff] (!%p771_p13) }
 0x12d   : > { %v485_v19 = vadd.f32 %v845_v17, %v288_v13  ;;  %v493_v20 = vadd.f32 %v857_v18, %v296_v14  ;;  %v413_v21 = vpop.f32.mrb[3].mxu0  ;;  %v453_v22 = vpop.f32.mrb[3].mxu1  ;;  %v530_v17 = vld [vmem:[%s1168_s10 + $0x50] sm:$0xff] (!%p771_p13) }
 0x12e   : > { %v484_v23 = vadd.f32 %v413_v21, %v287_v15  ;;  %v492_v24 = vadd.f32 %v453_v22, %v295_v16  ;;  %v529_v15 = vld [vmem:[%s1168_s10 + $0x48] sm:$0xff] (!%p771_p13) }
 0x12f   : > { %501 = vst [vmem:[#allocation2 + $0x18] sm:$0xff] %v485_v19  ;;  %509 = vst [vmem:[#allocation2 + $0x58] sm:$0xff] %v493_v20 }
 0x130   : > { %500 = vst [vmem:[#allocation2 + $0x10] sm:$0xff] %v484_v23  ;;  %508 = vst [vmem:[#allocation2 + $0x50] sm:$0xff] %v492_v24  ;;  %v848_v29 = vpop.f32.mrb[4].mxu0  ;;  %v860_v30 = vpop.f32.mrb[4].mxu1  ;;  %v531_v23 = vld [vmem:[%s1168_s10 + $0x58] sm:$0xff] (!%p771_p13) }
 0x131   : > { %v487_v31 = vadd.f32 %v848_v29, %v290_v25  ;;  %v495_v32 = vadd.f32 %v860_v30, %v298_v26  ;;  %v423_v33 = vpop.f32.mrb[5].mxu0  ;;  %v463_v34 = vpop.f32.mrb[5].mxu1  ;;  %v533_v30 = vld [vmem:[%s1168_s10 + $0x68] sm:$0xff] (!%p771_p13) }
 0x132   : > { %v486_v35 = vadd.f32 %v423_v33, %v289_v27  ;;  %v494_v36 = vadd.f32 %v463_v34, %v297_v28  ;;  %517 = sbr.rel (%p771_p13) target bundleno = 358 (0x166), region = 74  ;;  %v537_v50 = vld [vmem:[#allocation2 + $0x8] sm:$0xff] (!%p771_p13)  ;;  %v532_v28 = vld [vmem:[%s1168_s10 + $0x60] sm:$0xff] (!%p771_p13) }
 0x133   : > { %503 = vst [vmem:[#allocation2 + $0x28] sm:$0xff] %v487_v31  ;;  %511 = vst [vmem:[#allocation2 + $0x68] sm:$0xff] %v495_v32  ;;  %v536_v49 = vld [vmem:[#allocation2] sm:$0xff] (!%p771_p13)  ;;  %v553_v59 = vadd.f32 (!%p771_p13), %v537_v50, %v521_v56  ;;  %v545_v16 = vld [vmem:[#allocation2 + $0x48] sm:$0xff] (!%p771_p13) }
 0x134   : > { %502 = vst [vmem:[#allocation2 + $0x20] sm:$0xff] %v486_v35  ;;  %510 = vst [vmem:[#allocation2 + $0x60] sm:$0xff] %v494_v36  ;;  %v851_v41 = vpop.f32.mrb[6].mxu0  ;;  %v863_v42 = vpop.f32.mrb[6].mxu1  ;;  %v552_v58 = vadd.f32 (!%p771_p13), %v536_v49, %v520_v55  ;;  %v544_v12 = vld [vmem:[#allocation2 + $0x40] sm:$0xff] (!%p771_p13)  ;;  %v561_v25 = vadd.f32 (!%p771_p13), %v545_v16, %v529_v15  ;;  %v534_v35 = vld [vmem:[%s1168_s10 + $0x70] sm:$0xff] (!%p771_p13) }
 0x135   : > { %v489_v43 = vadd.f32 %v851_v41, %v292_v37  ;;  %v497_v44 = vadd.f32 %v863_v42, %v300_v38  ;;  %v433_v45 = vpop.f32.mrb[7].mxu0  ;;  %v473_v46 = vpop.f32.mrb[7].mxu1  ;;  %569 = vst [vmem:[%s1115_s24 + $0x8] sm:$0xff] (!%p771_p13), %v553_v59  ;;  %v606_v8 = vmul.f32 (!%p771_p13), %v553_v59, %v553_v59  ;;  %v560_v21 = vadd.f32 (!%p771_p13), %v544_v12, %v528_v11 }
 0x136   : > { %v488_v47 = vadd.f32 %v433_v45, %v291_v39  ;;  %v496_v48 = vadd.f32 %v473_v46, %v299_v40  ;;  %v539_v52 = vld [vmem:[#allocation2 + $0x18] sm:$0xff] (!%p771_p13)  ;;  %568 = vst [vmem:[%s1115_s24] sm:$0xff] (!%p771_p13), %v552_v58  ;;  %v605_v6 = vmul.f32 (!%p771_p13), %v552_v58, %v552_v58  ;;  %v584_v7 = vadd.f32 (!%p771_p13), %v553_v59, %v552_v58 }
 0x137   : > { %505 = vst [vmem:[#allocation2 + $0x38] sm:$0xff] %v489_v43  ;;  %513 = vst [vmem:[#allocation2 + $0x78] sm:$0xff] %v497_v44  ;;  %v538_v51 = vld [vmem:[#allocation2 + $0x10] sm:$0xff] (!%p771_p13)  ;;  %v555_v0 = vadd.f32 (!%p771_p13), %v539_v52, %v523_v61  ;;  %v547_v24 = vld [vmem:[#allocation2 + $0x58] sm:$0xff] (!%p771_p13) }
 0x138   : > { %504 = vst [vmem:[#allocation2 + $0x30] sm:$0xff] %v488_v47  ;;  %512 = vst [vmem:[#allocation2 + $0x70] sm:$0xff] %v496_v48  ;;  %v554_v60 = vadd.f32 (!%p771_p13), %v538_v51, %v522_v57  ;;  %v621_v18 = vadd.f32 (!%p771_p13), %v606_v8, %v605_v6  ;;  %v546_v22 = vld [vmem:[#allocation2 + $0x50] sm:$0xff] (!%p771_p13)  ;;  %v563_v27 = vadd.f32 (!%p771_p13), %v547_v24, %v531_v23  ;;  %v535_v39 = vld [vmem:[%s1168_s10 + $0x78] sm:$0xff] (!%p771_p13) }
 0x139   : > { %571 = vst [vmem:[%s1115_s24 + $0x18] sm:$0xff] %v555_v0  ;;  %v608_v13 = vmul.f32 %v555_v0, %v555_v0  ;;  %v562_v26 = vadd.f32 %v546_v22, %v530_v17  ;;  %576 = vst [vmem:[%s1115_s24 + $0x40] sm:$0xff] %v560_v21  ;;  %v614_v57 = vmul.f32 %v561_v25, %v561_v25 }
 0x13a   : > { %v541_v54 = vld [vmem:[#allocation2 + $0x28] sm:$0xff]  ;;  %570 = vst [vmem:[%s1115_s24 + $0x10] sm:$0xff] %v554_v60  ;;  %v607_v9 = vmul.f32 %v554_v60, %v554_v60  ;;  %v585_v19 = vadd.f32 %v584_v7, %v554_v60  ;;  %577 = vst [vmem:[%s1115_s24 + $0x48] sm:$0xff] %v561_v25 }
 0x13b   : > { %v540_v53 = vld [vmem:[#allocation2 + $0x20] sm:$0xff]  ;;  %v557_v2 = vadd.f32 %v541_v54, %v525_v63  ;;  %v549_v34 = vld [vmem:[#allocation2 + $0x68] sm:$0xff]  ;;  %578 = vst [vmem:[%s1115_s24 + $0x50] sm:$0xff] %v562_v26  ;;  %579 = vst [vmem:[%s1115_s24 + $0x58] sm:$0xff] %v563_v27  ;;  %v613_v54 = vmul.f32 %v560_v21, %v560_v21  ;;  %v615_v60 = vmul.f32 %v562_v26, %v562_v26 }
 0x13c   : > { %v556_v1 = vadd.f32 %v540_v53, %v524_v62  ;;  %v548_v29 = vld [vmem:[#allocation2 + $0x60] sm:$0xff]  ;;  %v622_v31 = vadd.f32 %v621_v18, %v607_v9  ;;  %v586_v32 = vadd.f32 %v585_v19, %v555_v0  ;;  %v565_v43 = vadd.f32 %v549_v34, %v533_v30 }
 0x13d   : > { %573 = vst [vmem:[%s1115_s24 + $0x28] sm:$0xff] %v557_v2  ;;  %v610_v37 = vmul.f32 %v557_v2, %v557_v2  ;;  %v564_v38 = vadd.f32 %v548_v29, %v532_v28  ;;  %v616_v63 = vmul.f32 %v563_v27, %v563_v27 }
 0x13e   : > { %v543_v10 = vld [vmem:[#allocation2 + $0x38] sm:$0xff]  ;;  %572 = vst [vmem:[%s1115_s24 + $0x20] sm:$0xff] %v556_v1  ;;  %v609_v33 = vmul.f32 %v556_v1, %v556_v1  ;;  %v623_v41 = vadd.f32 %v622_v31, %v608_v13  ;;  %v587_v42 = vadd.f32 %v586_v32, %v556_v1  ;;  %581 = vst [vmem:[%s1115_s24 + $0x68] sm:$0xff] %v565_v43 }
 0x13f   : > { %v542_v4 = vld [vmem:[#allocation2 + $0x30] sm:$0xff]  ;;  %v559_v20 = vadd.f32 %v543_v10, %v527_v5  ;;  %v551_v40 = vld [vmem:[#allocation2 + $0x78] sm:$0xff]  ;;  %580 = vst [vmem:[%s1115_s24 + $0x60] sm:$0xff] %v564_v38  ;;  %v618_v5 = vmul.f32 %v565_v43, %v565_v43 }
 0x140   : > { %v558_v14 = vadd.f32 %v542_v4, %v526_v3  ;;  %v550_v36 = vld [vmem:[#allocation2 + $0x70] sm:$0xff]  ;;  %v567_v45 = vadd.f32 %v551_v40, %v535_v39  ;;  %v624_v46 = vadd.f32 %v623_v41, %v609_v33  ;;  %v588_v47 = vadd.f32 %v587_v42, %v557_v2 }
 0x141   : > { %575 = vst [vmem:[%s1115_s24 + $0x38] sm:$0xff] %v559_v20  ;;  %v566_v44 = vadd.f32 %v550_v36, %v534_v35  ;;  %v612_v51 = vmul.f32 %v559_v20, %v559_v20  ;;  %v617_v2 = vmul.f32 %v564_v38, %v564_v38 }
 0x142   : > { %574 = vst [vmem:[%s1115_s24 + $0x30] sm:$0xff] %v558_v14  ;;  %v611_v48 = vmul.f32 %v558_v14, %v558_v14  ;;  %583 = vst [vmem:[%s1115_s24 + $0x78] sm:$0xff] %v567_v45  ;;  %v625_v49 = vadd.f32 %v624_v46, %v610_v37  ;;  %v589_v50 = vadd.f32 %v588_v47, %v558_v14 }
 0x143   : > { %582 = vst [vmem:[%s1115_s24 + $0x70] sm:$0xff] %v566_v44  ;;  %v619_v8 = vmul.f32 %v566_v44, %v566_v44  ;;  %v620_v11 = vmul.f32 %v567_v45, %v567_v45 }
 0x144   : > { %v626_v52 = vadd.f32 %v625_v49, %v611_v48  ;;  %v590_v53 = vadd.f32 %v589_v50, %v559_v20 }
 0x146   : > { %v627_v55 = vadd.f32 %v626_v52, %v612_v51  ;;  %v591_v56 = vadd.f32 %v590_v53, %v560_v21 }
 0x148   : > { %v628_v58 = vadd.f32 %v627_v55, %v613_v54  ;;  %v592_v59 = vadd.f32 %v591_v56, %v561_v25 }
 0x14a   : > { %v629_v61 = vadd.f32 %v628_v58, %v614_v57  ;;  %v593_v62 = vadd.f32 %v592_v59, %v562_v26 }
 0x14c   : > { %v630_v0 = vadd.f32 %v629_v61, %v615_v60  ;;  %v594_v1 = vadd.f32 %v593_v62, %v563_v27 }
 0x14e   : > { %v631_v3 = vadd.f32 %v630_v0, %v616_v63  ;;  %v595_v4 = vadd.f32 %v594_v1, %v564_v38 }
 0x150   : > { %v632_v6 = vadd.f32 %v631_v3, %v617_v2  ;;  %v596_v7 = vadd.f32 %v595_v4, %v565_v43 }
 0x152   : > { %v633_v9 = vadd.f32 %v632_v6, %v618_v5  ;;  %v597_v10 = vadd.f32 %v596_v7, %v566_v44 }
 0x154   : > { %v634_v12 = vadd.f32 %v633_v9, %v619_v8  ;;  %v598_v13 = vadd.f32 %v597_v10, %v567_v45 }
 0x156   : > { %v599_v14 = vrot.slane %v598_v13, 4  ;;  %v635_v15 = vadd.f32 %v634_v12, %v620_v11 }
 0x158   : > { %v600_v16 = vadd.f32 %v599_v14, %v598_v13  ;;  %v636_v17 = vrot.slane %v635_v15, 4 }
 0x15a   : > { %v601_v18 = vrot.slane %v600_v16, 2  ;;  %v637_v19 = vadd.f32 %v636_v17, %v635_v15 }
 0x15c   : > { %v602_v20 = vadd.f32 %v601_v18, %v600_v16  ;;  %v638_v21 = vrot.slane %v637_v19, 2 }
 0x15e   : > { %v603_v22 = vrot.slane %v602_v20, 1  ;;  %v639_v23 = vadd.f32 %v638_v21, %v637_v19 }
 0x160   : > { %v604_v24 = vadd.f32 %v603_v22, %v602_v20  ;;  %v640_v25 = vrot.slane %v639_v23, 1 }
 0x162   : > { %v641_v26 = vadd.f32 %v640_v25, %v639_v23 }
 0x164   : > { %v643_v27 = vsel %vm642_vm0, %v604_v24, %v641_v26 }
 0x165   : > { %644 = vst [vmem:[%s1120_s29] sm:$0x3] %v643_v27 }
 0x166 PF: > { %s14_s18 = sadd.s32 1, %s1023_s18   ;;  %s1228_s12 = smov %s1003_s13 }
 0x167   : > { %p11_p0 = scmp.ge.s32.totalorder %s14_s18, 6   ;;  %s1229_s13 = smov %s1097_s25 }
 0x168   : > { %s1230_s14 = smov %s1015_s16  ;;  %s1231_s15 = smov %s1019_s17 }
 0x169   : > { %s1232_s16 = smov %s1235_s19  ;;  %s1233_s17 = smov %s1239_s20 }
 0x16a   :  { %13 = sbr.rel (!%p11_p0) target bundleno = 4 (0x4), region = 123 }

// kernel: resgcn_forward.13
= control target key start
LH: loop header
LB: loop body
LE: loop exit
PB: predicated region body
PF: predicated region fallthrough
CT: control target
= control target key end

     0   :  { %s864_s18 = smov 0   ;;  %s1128_s0 = inlined_call_operand.vmem [shape: f32[256,128], index: 0, kind: input, shape index: {}]   ;;  %s1129_s1 = inlined_call_operand.vmem [shape: f32[2,128], index: 1, kind: input, shape index: {}]   ;;  %s1130_s2 = inlined_call_operand.vmem [shape: f32[256,256], index: 2, kind: input, shape index: {}]   ;;  %s1131_s3 = inlined_call_operand.vmem [shape: f32[256,128], index: 3, kind: input, shape index: {}]   ;;  %s1132_s4 = inlined_call_operand.vmem [shape: f32[1,128], index: 4, kind: input, shape index: {}]   ;;  %s1133_s5 = inlined_call_operand.vmem [shape: f32[256,128], index: 5, kind: output, shape index: {}]  }
   0x1 LB: > { %s674_s19 = sadd.s32 4294967295, %s832_s18   ;;  %p678_p0 = scmp.ge.s32.totalorder %s832_s18, 1  ;;  %s832_s18 = sphi %s864_s18, %s15_s18  }
   0x2   : > { %p200_p1 = scmp.lt.s32.totalorder %s832_s18, 3 }
   0x4   : > { %p201_p2 = pnand %p678_p0, %p200_p1 }
   0x5   : > { %v406_v0 = vld [vmem:[%s1131_s3 + $0x80] sm:$0xff] (!%p201_p2)  ;;  %v407_v1 = vld [vmem:[%s1131_s3 + $0x88] sm:$0xff] (!%p201_p2)  ;;  %s679_s26 = sshll.u32 (!%p201_p2), %s674_s19, 4  ;;  %v408_v5 = vld [vmem:[%s1131_s3 + $0x90] sm:$0xff] (!%p201_p2) }
   0x6   : > { %204 = sbr.rel (%p201_p2) target bundleno = 289 (0x121), region = 40  ;;  %v390_v2 = vld [vmem:[%s1131_s3] sm:$0xff] (!%p201_p2)  ;;  %v770_v3 = vpack.c.bf16 (!%p201_p2), %v407_v1, %v406_v0  ;;  %v391_v4 = vld [vmem:[%s1131_s3 + $0x8] sm:$0xff] (!%p201_p2)  ;;  %v409_v6 = vld [vmem:[%s1131_s3 + $0x98] sm:$0xff] (!%p201_p2)  ;;  %p235_p3 = scmp.lt.s32.totalorder (!%p201_p2), %s679_s26, 31 }
   0x7   : > { %v772_v7 = vpack.c.bf16 (!%p201_p2), %v391_v4, %v390_v2  ;;  %v774_v8 = vpack.c.bf16 (!%p201_p2), %v409_v6, %v408_v5  ;;  %v392_v9 = vld [vmem:[%s1131_s3 + $0x10] sm:$0xff] (!%p201_p2)  ;;  %v393_v10 = vld [vmem:[%s1131_s3 + $0x18] sm:$0xff] (!%p201_p2)  ;;  %v410_v11 = vld [vmem:[%s1131_s3 + $0xa0] sm:$0xff] (!%p201_p2) }
   0x8   : > { %771 = vmatprep.subr.bf16.mxu0 (!%p201_p2), %v770_v3  ;;  %802 = vmatprep.subr.bf16.mxu1 (!%p201_p2), %v770_v3  ;;  %v411_v12 = vld [vmem:[%s1131_s3 + $0xa8] sm:$0xff] (!%p201_p2)  ;;  %v776_v13 = vpack.c.bf16 (!%p201_p2), %v393_v10, %v392_v9  ;;  %v394_v15 = vld [vmem:[%s1131_s3 + $0x20] sm:$0xff] (!%p201_p2)  ;;  %v412_v17 = vld [vmem:[%s1131_s3 + $0xb0] sm:$0xff] (!%p201_p2) }
   0x9   : > { %773 = vmatpush3.bf16.msra.mxu0 (!%p201_p2), %v772_v7  ;;  %810 = vmatpush3.bf16.msra.mxu1 (!%p201_p2), %v772_v7  ;;  %v778_v14 = vpack.c.bf16 (!%p201_p2), %v411_v12, %v410_v11  ;;  %v395_v16 = vld [vmem:[%s1131_s3 + $0x28] sm:$0xff] (!%p201_p2)  ;;  %v413_v18 = vld [vmem:[%s1131_s3 + $0xb8] sm:$0xff] (!%p201_p2)  ;;  %v396_v21 = vld [vmem:[%s1131_s3 + $0x30] sm:$0xff] (!%p201_p2) }
   0xa   : > { %775 = vmatprep.subr.bf16.mxu0 (!%p201_p2), %v774_v8  ;;  %803 = vmatprep.subr.bf16.mxu1 (!%p201_p2), %v774_v8  ;;  %v780_v19 = vpack.c.bf16 (!%p201_p2), %v395_v16, %v394_v15  ;;  %v782_v20 = vpack.c.bf16 (!%p201_p2), %v413_v18, %v412_v17  ;;  %v397_v22 = vld [vmem:[%s1131_s3 + $0x38] sm:$0xff] (!%p201_p2)  ;;  %v414_v23 = vld [vmem:[%s1131_s3 + $0xc0] sm:$0xff] (!%p201_p2)  ;;  %v415_v24 = vld [vmem:[%s1131_s3 + $0xc8] sm:$0xff] (!%p201_p2)  ;;  %v270_v16 = vlaneseq (!%p201_p2) }
   0xb   : > { %v784_v27 = vpack.c.bf16 (!%p201_p2), %v397_v22, %v396_v21  ;;  %v786_v28 = vpack.c.bf16 (!%p201_p2), %v415_v24, %v414_v23  ;;  %v398_v29 = vld [vmem:[%s1131_s3 + $0x40] sm:$0xff] (!%p201_p2)  ;;  %v399_v30 = vld [vmem:[%s1131_s3 + $0x48] sm:$0xff] (!%p201_p2)  ;;  %v416_v31 = vld [vmem:[%s1131_s3 + $0xd0] sm:$0xff] (!%p201_p2) }
   0xc   : > { %v417_v32 = vld [vmem:[%s1131_s3 + $0xd8] sm:$0xff] (!%p201_p2)  ;;  %v788_v33 = vpack.c.bf16 (!%p201_p2), %v399_v30, %v398_v29  ;;  %v400_v35 = vld [vmem:[%s1131_s3 + $0x50] sm:$0xff] (!%p201_p2)  ;;  %v418_v37 = vld [vmem:[%s1131_s3 + $0xe0] sm:$0xff] (!%p201_p2)  ;;  %v271_v17 = vshrl.u32 (!%p201_p2), %v270_v16, 7 }
   0xd   : > { %s1135_s26 = smov (!%p235_p3, %s679_s26), 31  ;;  %777 = vmatpush3.bf16.msra.mxu0 %v776_v13  ;;  %811 = vmatpush3.bf16.msra.mxu1 %v776_v13  ;;  %v790_v34 = vpack.c.bf16 %v417_v32, %v416_v31  ;;  %v401_v36 = vld [vmem:[%s1131_s3 + $0x58] sm:$0xff]  ;;  %v419_v38 = vld [vmem:[%s1131_s3 + $0xe8] sm:$0xff]  ;;  %v402_v41 = vld [vmem:[%s1131_s3 + $0x60] sm:$0xff] }
   0xe   : > { %s689_s21 = sshll.u32 %s1135_s26, 4  ;;  %779 = vmatprep.subr.bf16.mxu0 %v778_v14  ;;  %804 = vmatprep.subr.bf16.mxu1 %v778_v14  ;;  %v792_v39 = vpack.c.bf16 %v401_v36, %v400_v35  ;;  %v794_v40 = vpack.c.bf16 %v419_v38, %v418_v37  ;;  %v403_v42 = vld [vmem:[%s1131_s3 + $0x68] sm:$0xff]  ;;  %v420_v43 = vld [vmem:[%s1131_s3 + $0xf0] sm:$0xff]  ;;  %v421_v44 = vld [vmem:[%s1131_s3 + $0xf8] sm:$0xff]  ;;  %s680_s20 = sshll.u32 %s1135_s26, 3  ;;  %v272_v18 = vsub.s32 0, %v271_v17 }
   0xf   : > { %s920_s29 = scalar_lea.vmem %s1130_s2, %s689_s21  ;;  %v796_v45 = vpack.c.bf16 %v403_v42, %v402_v41  ;;  %v798_v46 = vpack.c.bf16 %v421_v44, %v420_v43  ;;  %v404_v47 = vld [vmem:[%s1131_s3 + $0x70] sm:$0xff]  ;;  %v405_v48 = vld [vmem:[%s1131_s3 + $0x78] sm:$0xff]  ;;  %s1017_s25 = scalar_lea.vmem %s1128_s0, %s680_s20  ;;  %v292_v21 = vsub.s32 1, %v271_v17  ;;  %v1043_v44 = vld [vmem:[%s1132_s4] ss:$0 sm:$0xff] }
  0x10   : > { %v359_v25 = vld [vmem:[%s920_s29 + $0x8] sm:$0xff]  ;;  %v800_v49 = vpack.c.bf16 %v405_v48, %v404_v47  ;;  %v358_v50 = vld [vmem:[%s920_s29] sm:$0xff]  ;;  %v361_v52 = vld [vmem:[%s920_s29 + $0x18] sm:$0xff]  ;;  %s1060_s6 = scalar_lea.vmem %s1133_s5, %s680_s20 }
  0x11   : > { %493 = vmatprep.mubr.f32.mxu0 %v359_v25  ;;  %v375_v26 = vld [vmem:[%s920_s29 + $0x88] sm:$0xff]  ;;  %781 = vmatpush3.bf16.msra.mxu0 %v780_v19  ;;  %v374_v51 = vld [vmem:[%s920_s29 + $0x80] sm:$0xff]  ;;  %v377_v53 = vld [vmem:[%s920_s29 + $0x98] sm:$0xff] }
  0x12   : > { %812 = vmatpush3.bf16.msra.mxu1 %v780_v19  ;;  %783 = vmatprep.subr.bf16.mxu0 %v782_v20  ;;  %v360_v54 = vld [vmem:[%s920_s29 + $0x10] sm:$0xff]  ;;  %v363_v56 = vld [vmem:[%s920_s29 + $0x28] sm:$0xff]  ;;  %v362_v58 = vld [vmem:[%s920_s29 + $0x20] sm:$0xff] }
  0x13   : > { %805 = vmatprep.subr.bf16.mxu1 %v782_v20  ;;  %533 = vmatprep.mubr.f32.mxu1 %v375_v26  ;;  %v376_v55 = vld [vmem:[%s920_s29 + $0x90] sm:$0xff]  ;;  %v379_v57 = vld [vmem:[%s920_s29 + $0xa8] sm:$0xff]  ;;  %v378_v59 = vld [vmem:[%s920_s29 + $0xa0] sm:$0xff] }
  0x14   : > { %v365_v60 = vld [vmem:[%s920_s29 + $0x38] sm:$0xff]  ;;  %v364_v62 = vld [vmem:[%s920_s29 + $0x30] sm:$0xff]  ;;  %v367_v0 = vld [vmem:[%s920_s29 + $0x48] sm:$0xff] }
  0x15   : > { %785 = vmatpush3.bf16.msra.mxu0 %v784_v27  ;;  %v381_v61 = vld [vmem:[%s920_s29 + $0xb8] sm:$0xff]  ;;  %v380_v63 = vld [vmem:[%s920_s29 + $0xb0] sm:$0xff]  ;;  %v383_v1 = vld [vmem:[%s920_s29 + $0xc8] sm:$0xff] }
  0x16   : > { %813 = vmatpush3.bf16.msra.mxu1 %v784_v27  ;;  %787 = vmatprep.subr.bf16.mxu0 %v786_v28  ;;  %v366_v2 = vld [vmem:[%s920_s29 + $0x40] sm:$0xff]  ;;  %v369_v4 = vld [vmem:[%s920_s29 + $0x58] sm:$0xff]  ;;  %v368_v6 = vld [vmem:[%s920_s29 + $0x50] sm:$0xff] }
  0x17   : > { %806 = vmatprep.subr.bf16.mxu1 %v786_v28  ;;  %v382_v3 = vld [vmem:[%s920_s29 + $0xc0] sm:$0xff]  ;;  %v385_v5 = vld [vmem:[%s920_s29 + $0xd8] sm:$0xff]  ;;  %v384_v7 = vld [vmem:[%s920_s29 + $0xd0] sm:$0xff] }
  0x18   : > { %v371_v8 = vld [vmem:[%s920_s29 + $0x68] sm:$0xff]  ;;  %v370_v10 = vld [vmem:[%s920_s29 + $0x60] sm:$0xff]  ;;  %v373_v12 = vld [vmem:[%s920_s29 + $0x78] sm:$0xff] }
  0x19   : > { %789 = vmatpush3.bf16.msra.mxu0 %v788_v33  ;;  %v387_v9 = vld [vmem:[%s920_s29 + $0xe8] sm:$0xff]  ;;  %v386_v11 = vld [vmem:[%s920_s29 + $0xe0] sm:$0xff]  ;;  %v389_v13 = vld [vmem:[%s920_s29 + $0xf8] sm:$0xff] }
  0x1a   : > { %814 = vmatpush3.bf16.msra.mxu1 %v788_v33  ;;  %791 = vmatprep.subr.bf16.mxu0 %v790_v34  ;;  %v372_v14 = vld [vmem:[%s920_s29 + $0x70] sm:$0xff]  ;;  %v253_v19 = vld [vmem:[%s1129_s1] sm:$0x3]  ;;  %v255_v27 = vld [vmem:[%s1017_s25 + $0x8] sm:$0xff] }
  0x1b   : > { %807 = vmatprep.subr.bf16.mxu1 %v790_v34  ;;  %v388_v15 = vld [vmem:[%s920_s29 + $0xf0] sm:$0xff]  ;;  %v1019_v20 = vrot.slane %v253_v19, %v272_v18  ;;  %v254_v22 = vld [vmem:[%s1017_s25] sm:$0xff]  ;;  %v1024_v25 = vrot.slane %v253_v19, %v292_v21  ;;  %v263_v28 = vld [vmem:[%s1017_s25 + $0x48] sm:$0xff] }
  0x1c   : > { %v262_v23 = vld [vmem:[%s1017_s25 + $0x40] sm:$0xff]  ;;  %v256_v29 = vld [vmem:[%s1017_s25 + $0x10] sm:$0xff]  ;;  %v265_v47 = vld [vmem:[%s1017_s25 + $0x58] sm:$0xff] }
  0x1d   : > { %793 = vmatpush3.bf16.msra.mxu0 %v792_v39  ;;  %v274_v24 = vmul.f32 %v1019_v20, %v254_v22  ;;  %v282_v26 = vmul.f32 %v1019_v20, %v262_v23  ;;  %v275_v32 = vmul.f32 %v1019_v20, %v255_v27  ;;  %v264_v33 = vld [vmem:[%s1017_s25 + $0x50] sm:$0xff]  ;;  %v283_v34 = vmul.f32 %v1019_v20, %v263_v28 }
  0x1e   : > { %815 = vmatpush3.bf16.msra.mxu1 %v792_v39  ;;  %795 = vmatprep.subr.bf16.mxu0 %v794_v40  ;;  %v276_v35 = vmul.f32 %v1019_v20, %v256_v29  ;;  %v284_v36 = vmul.f32 %v1019_v20, %v264_v33 }
  0x1f   : > { %808 = vmatprep.subr.bf16.mxu1 %v794_v40  ;;  %v294_v30 = vadd.f32 %v1024_v25, %v274_v24  ;;  %v302_v31 = vadd.f32 %v1024_v25, %v282_v26  ;;  %v295_v39 = vadd.f32 %v1024_v25, %v275_v32  ;;  %v303_v40 = vadd.f32 %v1024_v25, %v283_v34 }
  0x20   : > { %v296_v41 = vadd.f32 %v1024_v25, %v276_v35 }
  0x21   : > { %797 = vmatpush3.bf16.msra.mxu0 %v796_v45  ;;  %v326_v37 = vmul.f32 0.01, %v294_v30  ;;  %v334_v38 = vmul.f32 0.01, %v302_v31  ;;  %vm310_vm0 = vcmp.ge.f32.partialorder %v294_v30, 0.0  ;;  %vm318_vm1 = vcmp.ge.f32.partialorder %v302_v31, 0.0 }
  0x22   : > { %816 = vmatpush3.bf16.msra.mxu1 %v796_v45  ;;  %799 = vmatprep.subr.bf16.mxu0 %v798_v46  ;;  %v304_v45 = vadd.f32 %v1024_v25, %v284_v36  ;;  %vm311_vm2 = vcmp.ge.f32.partialorder %v295_v39, 0.0  ;;  %vm319_vm3 = vcmp.ge.f32.partialorder %v303_v40, 0.0  ;;  %vm312_vm4 = vcmp.ge.f32.partialorder %v296_v41, 0.0 }
  0x23   : > { %809 = vmatprep.subr.bf16.mxu1 %v798_v46  ;;  %v257_v46 = vld [vmem:[%s1017_s25 + $0x18] sm:$0xff]  ;;  %v342_v48 = vsel %vm310_vm0, %v294_v30, %v326_v37 }
  0x24   : > { %vm320_vm5 = vcmp.ge.f32.partialorder %v304_v45, 0.0 }
  0x25   : > { %801 = vmatpush3.bf16.msra.mxu0 %v800_v49 }
  0x26   : > { %817 = vmatpush3.bf16.msra.mxu1 %v800_v49 }
  0x28   : > { %494 = vmatmul.mubr.f32.vlgmr.msra.gmra.mrb[0].mxu0 %v358_v50  ;;  %v350_v50 = vsel %vm318_vm1, %v302_v31, %v334_v38 }
  0x29   : > { %534 = vmatmul.mubr.f32.vlgmr.msra.gmra.mrb[0].mxu1 %v374_v51  ;;  %498 = vmatprep.mubr.f32.mxu0 %v361_v52  ;;  %v327_v52 = vmul.f32 0.01, %v295_v39 }
  0x2a   : > { %538 = vmatprep.mubr.f32.mxu1 %v377_v53  ;;  %v258_v53 = vld [vmem:[%s1017_s25 + $0x20] sm:$0xff] }
  0x2c   : > { %499 = vmatmul.mubr.f32.gmra.mrb[2].mxu0 %v360_v54 }
  0x2d   : > { %539 = vmatmul.mubr.f32.gmra.mrb[2].mxu1 %v376_v55  ;;  %503 = vmatprep.mubr.f32.mxu0 %v363_v56  ;;  %v266_v56 = vld [vmem:[%s1017_s25 + $0x60] sm:$0xff] }
  0x2e   : > { %543 = vmatprep.mubr.f32.mxu1 %v379_v57  ;;  %v335_v57 = vmul.f32 0.01, %v303_v40 }
  0x30   : > { %504 = vmatmul.mubr.f32.gmra.mrb[4].mxu0 %v362_v58  ;;  %v328_v58 = vmul.f32 0.01, %v296_v41 }
  0x31   : > { %544 = vmatmul.mubr.f32.gmra.mrb[4].mxu1 %v378_v59  ;;  %508 = vmatprep.mubr.f32.mxu0 %v365_v60  ;;  %v277_v59 = vmul.f32 %v1019_v20, %v257_v46  ;;  %v285_v60 = vmul.f32 %v1019_v20, %v265_v47 }
  0x32   : > { %548 = vmatprep.mubr.f32.mxu1 %v381_v61  ;;  %v344_v23 = vsel %vm312_vm4, %v296_v41, %v328_v58 }
  0x34   : > { %509 = vmatmul.mubr.f32.gmra.mrb[6].mxu0 %v364_v62 }
  0x35   : > { %549 = vmatmul.mubr.f32.gmra.mrb[6].mxu1 %v380_v63  ;;  %513 = vmatprep.mubr.f32.mxu0 %v367_v0 }
  0x36   : > { %553 = vmatprep.mubr.f32.mxu1 %v383_v1  ;;  %v336_v1 = vmul.f32 0.01, %v304_v45 }
  0x38   : > { %514 = vmatmul.mubr.f32.gmra.mrb[8].mxu0 %v366_v2  ;;  %v278_v2 = vmul.f32 %v1019_v20, %v258_v53  ;;  %v352_v26 = vsel %vm320_vm5, %v304_v45, %v336_v1 }
  0x39   : > { %554 = vmatmul.mubr.f32.gmra.mrb[8].mxu1 %v382_v3  ;;  %518 = vmatprep.mubr.f32.mxu0 %v369_v4 }
  0x3a   : > { %558 = vmatprep.mubr.f32.mxu1 %v385_v5  ;;  %v286_v5 = vmul.f32 %v1019_v20, %v266_v56  ;;  %v298_v21 = vadd.f32 %v1024_v25, %v278_v2 }
  0x3c   : > { %519 = vmatmul.mubr.f32.gmra.mrb[10].mxu0 %v368_v6  ;;  %v259_v6 = vld [vmem:[%s1017_s25 + $0x28] sm:$0xff]  ;;  %v306_v28 = vadd.f32 %v1024_v25, %v286_v5  ;;  %vm314_vm8 = vcmp.ge.f32.partialorder %v298_v21, 0.0 }
  0x3d   : > { %559 = vmatmul.mubr.f32.gmra.mrb[10].mxu1 %v384_v7  ;;  %523 = vmatprep.mubr.f32.mxu0 %v371_v8  ;;  %v279_v22 = vmul.f32 %v1019_v20, %v259_v6 }
  0x3e   : > { %563 = vmatprep.mubr.f32.mxu1 %v387_v9  ;;  %vm322_vm9 = vcmp.ge.f32.partialorder %v306_v28, 0.0  ;;  %v338_v47 = vmul.f32 0.01, %v306_v28 }
  0x3f   : > { %v299_v41 = vadd.f32 %v1024_v25, %v279_v22 }
  0x40   : > { %524 = vmatmul.mubr.f32.gmra.mrb[12].mxu0 %v370_v10  ;;  %v354_v2 = vsel %vm322_vm9, %v306_v28, %v338_v47 }
  0x41   : > { %564 = vmatmul.mubr.f32.gmra.mrb[12].mxu1 %v386_v11  ;;  %528 = vmatprep.mubr.f32.mxu0 %v373_v12  ;;  %v267_v11 = vld [vmem:[%s1017_s25 + $0x68] sm:$0xff]  ;;  %v343_v12 = vsel %vm311_vm2, %v295_v39, %v327_v52  ;;  %vm315_vm10 = vcmp.ge.f32.partialorder %v299_v41, 0.0 }
  0x42   : > { %568 = vmatprep.mubr.f32.mxu1 %v389_v13  ;;  %v351_v13 = vsel %vm319_vm3, %v303_v40, %v335_v57  ;;  %v287_v29 = vmul.f32 %v1019_v20, %v267_v11  ;;  %v330_v40 = vmul.f32 0.01, %v298_v21 }
  0x44   : > { %529 = vmatmul.mubr.f32.gmra.mrb[14].mxu0 %v372_v14  ;;  %v297_v14 = vadd.f32 %v1024_v25, %v277_v59 }
  0x45   : > { %569 = vmatmul.mubr.f32.gmra.mrb[14].mxu1 %v388_v15  ;;  %v305_v15 = vadd.f32 %v1024_v25, %v285_v60 }
  0x46   : > { %vm313_vm6 = vcmp.ge.f32.partialorder %v297_v14, 0.0  ;;  %v329_v34 = vmul.f32 0.01, %v297_v14 }
  0x47   : > { %vm321_vm7 = vcmp.ge.f32.partialorder %v305_v15, 0.0  ;;  %v337_v35 = vmul.f32 0.01, %v305_v15 }
  0x48   : > { %v345_v53 = vsel %vm313_vm6, %v297_v14, %v329_v34 }
  0xfb   : > { %v722_v42 = vpop.f32.mrb[0].mxu0 }
  0xfc   : > { %v746_v43 = vpop.f32.mrb[0].mxu1  ;;  %v723_v49 = vpop.f32.mrb[1].mxu0 }
  0xfd   : > { %v747_v51 = vpop.f32.mrb[1].mxu1  ;;  %v724_v54 = vadd.f32 %v723_v49, %v722_v42  ;;  %v260_v42 = vld [vmem:[%s1017_s25 + $0x30] sm:$0xff] }
  0xfe   : > { %v748_v55 = vadd.f32 %v747_v51, %v746_v43  ;;  %v268_v43 = vld [vmem:[%s1017_s25 + $0x70] sm:$0xff] }
  0xff   : > { %v496_v61 = vadd.f32 %v724_v54, %v1043_v44  ;;  %v725_v63 = vpop.f32.mrb[2].mxu0  ;;  %v353_v54 = vsel %vm321_vm7, %v305_v15, %v337_v35  ;;  %v288_v56 = vmul.f32 %v1019_v20, %v268_v43 }
 0x100   : > { %v536_v62 = vadd.f32 %v748_v55, %v1043_v44  ;;  %v749_v0 = vpop.f32.mrb[2].mxu1  ;;  %v726_v3 = vpop.f32.mrb[3].mxu0  ;;  %v280_v55 = vmul.f32 %v1019_v20, %v260_v42 }
 0x101   : > { %v750_v4 = vpop.f32.mrb[3].mxu1  ;;  %v574_v7 = vadd.f32 %v496_v61, %v342_v48  ;;  %v727_v9 = vadd.f32 %v726_v3, %v725_v63  ;;  %v307_v48 = vadd.f32 %v1024_v25, %v287_v29  ;;  %v346_v61 = vsel %vm314_vm8, %v298_v21, %v330_v40  ;;  %v261_v63 = vld [vmem:[%s1017_s25 + $0x38] sm:$0xff] }
 0x102   : > { %v582_v8 = vadd.f32 %v536_v62, %v350_v50  ;;  %v751_v10 = vadd.f32 %v750_v4, %v749_v0  ;;  %v331_v62 = vmul.f32 0.01, %v299_v41  ;;  %v269_v0 = vld [vmem:[%s1017_s25 + $0x78] sm:$0xff]  ;;  %v281_v11 = vmul.f32 %v1019_v20, %v261_v63 }
 0x103   : > { %590 = vst [vmem:[%s1060_s6] sm:$0xff] %v574_v7  ;;  %v501_v16 = vadd.f32 %v727_v9, %v1043_v44  ;;  %v728_v18 = vpop.f32.mrb[4].mxu0  ;;  %vm323_vm11 = vcmp.ge.f32.partialorder %v307_v48, 0.0  ;;  %v339_v4 = vmul.f32 0.01, %v307_v48  ;;  %v300_v9 = vadd.f32 %v1024_v25, %v280_v55 }
 0x104   : > { %598 = vst [vmem:[%s1060_s6 + $0x40] sm:$0xff] %v582_v8  ;;  %v541_v17 = vadd.f32 %v751_v10, %v1043_v44  ;;  %v752_v19 = vpop.f32.mrb[4].mxu1  ;;  %v729_v24 = vpop.f32.mrb[5].mxu0  ;;  %v308_v10 = vadd.f32 %v1024_v25, %v288_v56  ;;  %v301_v28 = vadd.f32 %v1024_v25, %v281_v11 }
 0x105   : > { %v753_v27 = vpop.f32.mrb[5].mxu1  ;;  %v575_v30 = vadd.f32 %v501_v16, %v343_v12  ;;  %v730_v32 = vadd.f32 %v729_v24, %v728_v18  ;;  %v289_v12 = vmul.f32 %v1019_v20, %v269_v0  ;;  %vm316_vm12 = vcmp.ge.f32.partialorder %v300_v9, 0.0 }
 0x106   : > { %v583_v31 = vadd.f32 %v541_v17, %v351_v13  ;;  %v754_v33 = vadd.f32 %v753_v27, %v752_v19  ;;  %v347_v17 = vsel %vm315_vm10, %v299_v41, %v331_v62  ;;  %v355_v19 = vsel %vm323_vm11, %v307_v48, %v339_v4 }
 0x107   : > { %591 = vst [vmem:[%s1060_s6 + $0x8] sm:$0xff] %v575_v30  ;;  %v506_v36 = vadd.f32 %v730_v32, %v1043_v44  ;;  %v731_v38 = vpop.f32.mrb[6].mxu0  ;;  %v340_v27 = vmul.f32 0.01, %v308_v10  ;;  %v309_v29 = vadd.f32 %v1024_v25, %v289_v12  ;;  %vm324_vm13 = vcmp.ge.f32.partialorder %v308_v10, 0.0 }
 0x108   : > { %599 = vst [vmem:[%s1060_s6 + $0x48] sm:$0xff] %v583_v31  ;;  %v546_v37 = vadd.f32 %v754_v33, %v1043_v44  ;;  %v755_v39 = vpop.f32.mrb[6].mxu1  ;;  %v732_v45 = vpop.f32.mrb[7].mxu0  ;;  %v333_v41 = vmul.f32 0.01, %v301_v28  ;;  %vm317_vm14 = vcmp.ge.f32.partialorder %v301_v28, 0.0 }
 0x109   : > { %v756_v46 = vpop.f32.mrb[7].mxu1  ;;  %v576_v49 = vadd.f32 %v506_v36, %v344_v23  ;;  %v733_v51 = vadd.f32 %v732_v45, %v731_v38  ;;  %v356_v25 = vsel %vm324_vm13, %v308_v10, %v340_v27  ;;  %v341_v42 = vmul.f32 0.01, %v309_v29 }
 0x10a   : > { %v584_v50 = vadd.f32 %v546_v37, %v352_v26  ;;  %v757_v52 = vadd.f32 %v756_v46, %v755_v39  ;;  %v332_v26 = vmul.f32 0.01, %v300_v9  ;;  %vm325_vm15 = vcmp.ge.f32.partialorder %v309_v29, 0.0 }
 0x10b   : > { %592 = vst [vmem:[%s1060_s6 + $0x10] sm:$0xff] %v576_v49  ;;  %v511_v57 = vadd.f32 %v733_v51, %v1043_v44  ;;  %v734_v59 = vpop.f32.mrb[8].mxu0  ;;  %v357_v55 = vsel %vm325_vm15, %v309_v29, %v341_v42 }
 0x10c   : > { %600 = vst [vmem:[%s1060_s6 + $0x50] sm:$0xff] %v584_v50  ;;  %v551_v58 = vadd.f32 %v757_v52, %v1043_v44  ;;  %v758_v60 = vpop.f32.mrb[8].mxu1  ;;  %v735_v1 = vpop.f32.mrb[9].mxu0  ;;  %v348_v40 = vsel %vm316_vm12, %v300_v9, %v332_v26 }
 0x10d   : > { %v759_v3 = vpop.f32.mrb[9].mxu1  ;;  %v577_v5 = vadd.f32 %v511_v57, %v345_v53  ;;  %v736_v7 = vadd.f32 %v735_v1, %v734_v59 }
 0x10e   : > { %v585_v6 = vadd.f32 %v551_v58, %v353_v54  ;;  %v760_v8 = vadd.f32 %v759_v3, %v758_v60  ;;  %v349_v54 = vsel %vm317_vm14, %v301_v28, %v333_v41 }
 0x10f   : > { %593 = vst [vmem:[%s1060_s6 + $0x18] sm:$0xff] %v577_v5  ;;  %v516_v13 = vadd.f32 %v736_v7, %v1043_v44  ;;  %v737_v15 = vpop.f32.mrb[10].mxu0 }
 0x110   : > { %601 = vst [vmem:[%s1060_s6 + $0x58] sm:$0xff] %v585_v6  ;;  %v556_v14 = vadd.f32 %v760_v8, %v1043_v44  ;;  %v761_v16 = vpop.f32.mrb[10].mxu1  ;;  %v738_v18 = vpop.f32.mrb[11].mxu0 }
 0x111   : > { %v762_v21 = vpop.f32.mrb[11].mxu1  ;;  %v578_v22 = vadd.f32 %v516_v13, %v346_v61  ;;  %v739_v24 = vadd.f32 %v738_v18, %v737_v15 }
 0x112   : > { %v586_v23 = vadd.f32 %v556_v14, %v354_v2  ;;  %v763_v20 = vadd.f32 %v762_v21, %v761_v16 }
 0x113   : > { %594 = vst [vmem:[%s1060_s6 + $0x20] sm:$0xff] %v578_v22  ;;  %v521_v30 = vadd.f32 %v739_v24, %v1043_v44  ;;  %v740_v32 = vpop.f32.mrb[12].mxu0 }
 0x114   : > { %602 = vst [vmem:[%s1060_s6 + $0x60] sm:$0xff] %v586_v23  ;;  %v561_v31 = vadd.f32 %v763_v20, %v1043_v44  ;;  %v764_v33 = vpop.f32.mrb[12].mxu1  ;;  %v741_v34 = vpop.f32.mrb[13].mxu0 }
 0x115   : > { %v765_v35 = vpop.f32.mrb[13].mxu1  ;;  %v579_v36 = vadd.f32 %v521_v30, %v347_v17  ;;  %v742_v38 = vadd.f32 %v741_v34, %v740_v32 }
 0x116   : > { %v587_v37 = vadd.f32 %v561_v31, %v355_v19  ;;  %v766_v39 = vadd.f32 %v765_v35, %v764_v33 }
 0x117   : > { %595 = vst [vmem:[%s1060_s6 + $0x28] sm:$0xff] %v579_v36  ;;  %v526_v43 = vadd.f32 %v742_v38, %v1043_v44  ;;  %v743_v46 = vpop.f32.mrb[14].mxu0 }
 0x118   : > { %603 = vst [vmem:[%s1060_s6 + $0x68] sm:$0xff] %v587_v37  ;;  %v566_v45 = vadd.f32 %v766_v39, %v1043_v44  ;;  %v767_v47 = vpop.f32.mrb[14].mxu1  ;;  %v744_v48 = vpop.f32.mrb[15].mxu0 }
 0x119   : > { %v768_v49 = vpop.f32.mrb[15].mxu1  ;;  %v580_v50 = vadd.f32 %v526_v43, %v348_v40  ;;  %v745_v52 = vadd.f32 %v744_v48, %v743_v46 }
 0x11a   : > { %v588_v51 = vadd.f32 %v566_v45, %v356_v25  ;;  %v769_v53 = vadd.f32 %v768_v49, %v767_v47 }
 0x11b   : > { %596 = vst [vmem:[%s1060_s6 + $0x30] sm:$0xff] %v580_v50  ;;  %v531_v56 = vadd.f32 %v745_v52, %v1043_v44 }
 0x11c   : > { %604 = vst [vmem:[%s1060_s6 + $0x70] sm:$0xff] %v588_v51  ;;  %v571_v57 = vadd.f32 %v769_v53, %v1043_v44 }
 0x11d   : > { %v581_v58 = vadd.f32 %v531_v56, %v349_v54 }
 0x11e   : > { %v589_v59 = vadd.f32 %v571_v57, %v357_v55 }
 0x11f   : > { %597 = vst [vmem:[%s1060_s6 + $0x38] sm:$0xff] %v581_v58 }
 0x120   : > { %605 = vst [vmem:[%s1060_s6 + $0x78] sm:$0xff] %v589_v59 }
 0x121 PF: > { %s15_s18 = sadd.s32 1, %s832_s18  }
 0x122   : > { %p12_p4 = scmp.ge.s32.totalorder %s15_s18, 4  }
 0x124   :  { %14 = sbr.rel (!%p12_p4) target bundleno = 1 (0x1), region = 73 }

</bundles_post_ra>
